<compile_context>
chip_gen: v7x
topology: tpu7x:2x2x1
jax: 0.10.0
libtpu: 0.0.40
codegen_flags: <defaults>
</compile_context>

<pallas_src>
import jax
import jax.numpy as jnp
from jax.experimental import pallas as pl
from jax.experimental.pallas import tpu as pltpu


# --------------------------------------------------------------------------- #
# In-kernel helpers
# --------------------------------------------------------------------------- #
def _layernorm(x, gamma, beta, eps=1e-6):
    # two-pass (centered) variance for numerical stability
    mean = jnp.mean(x, axis=-1, keepdims=True)
    c = x - mean
    var = jnp.mean(c * c, axis=-1, keepdims=True)
    return c * jax.lax.rsqrt(var + eps) * gamma + beta


def _split_heads(p, n_head, d):
    # (L, H*d) -> (H, L, d)
    L = p.shape[0]
    return jnp.swapaxes(p.reshape(L, n_head, d), 0, 1)


def _mha_block(x_res, q_in_bf, kv_in_bf, bias_ref, attn_ref,
               wq, bq, wk, bk, wv, bv, wo_h, bo, gamma, beta,
               *, n_head, d_k, d_v, attn_dtype):
    """Batched-heads attention + per-head output projection + residual + post-LN.

    q_in_bf : (Lq_tile, D) bf16     kv_in_bf : (Lk, D) bf16
    wq/wk/wv: (D, H*d)  (scale folded into wq/bq)   wo_h: (H, d_v, D)
    bias_ref: optional (1, Lq_tile, Lk) additive (0 / -1e9) ref.
    Writes attention probs (attn_dtype) to attn_ref[0] = (H, Lq_tile, Lk).
    """
    bf = jnp.bfloat16

    # separate, well-shaped 2-D projections (contract D) -> no lane-axis slicing
    qp = jnp.dot(q_in_bf, wq[...], preferred_element_type=jnp.float32) + bq[...]
    kp = jnp.dot(kv_in_bf, wk[...], preferred_element_type=jnp.float32) + bk[...]
    vp = jnp.dot(kv_in_bf, wv[...], preferred_element_type=jnp.float32) + bv[...]

    qh = _split_heads(qp, n_head, d_k).astype(bf)   # (H, q, dk)
    kh = _split_heads(kp, n_head, d_k).astype(bf)   # (H, k, dk)
    vh = _split_heads(vp, n_head, d_v).astype(bf)   # (H, k, dv)

    # all heads in one batched matmul
    s = jnp.einsum('hqd,hkd->hqk', qh, kh, preferred_element_type=jnp.float32)
    if bias_ref is not None:
        s = s + bias_ref[0][None, :, :]

    # softmax in f32, exact normalization
    s = s - jnp.max(s, axis=-1, keepdims=True)
    p = jnp.exp(s)
    p = p * pl.reciprocal(jnp.sum(p, axis=-1, keepdims=True), approx=False)

    attn_ref[0] = p.astype(attn_dtype)              # bf16 writeback (halved HBM traffic)

    ctx = jnp.einsum('hqk,hkd->hqd', p.astype(bf), vh,
                     preferred_element_type=jnp.float32)          # (H, q, dv)

    # per-head output projection, summed over heads (no head-merge transpose)
    out = jnp.einsum('hqd,hdD->hqD', ctx.astype(bf), wo_h[...],
                     preferred_element_type=jnp.float32)
    out = jnp.sum(out, axis=0) + bo[...]
    return _layernorm(out + x_res, gamma[...], beta[...])


# --------------------------------------------------------------------------- #
# Fused decoder-layer kernel (one batch element x one query tile per grid step)
# --------------------------------------------------------------------------- #
def _build_kernel(*, n_head, d_k, d_v, has_sbias, has_cbias, attn_dtype):
    def kernel(*refs):
        i = 0
        xq_ref = refs[i]; i += 1      # (1, tq, D) decoder rows of this query tile
        xf_ref = refs[i]; i += 1      # (1, Lq, D) full decoder sequence (self K/V)
        enc_ref = refs[i]; i += 1     # (1, Lk, D) encoder output (cross K/V)
        sbias_ref = None
        cbias_ref = None
        if has_sbias:
            sbias_ref = refs[i]; i += 1
        if has_cbias:
            cbias_ref = refs[i]; i += 1
        (s_wq, s_bq, s_wk, s_bk, s_wv, s_bv, s_wo, s_bo, s_g, s_b,
         c_wq, c_bq, c_wk, c_bk, c_wv, c_bv, c_wo, c_bo, c_g, c_b,
         w1, b1, w2, b2, f_g, f_b) = refs[i:i + 26]
        out_ref, slf_ref, crs_ref = refs[i + 26:i + 29]

        bf = jnp.bfloat16
        x_q = xq_ref[0]                       # (tq, D) f32 (residual stream)
        x_full_bf = xf_ref[0].astype(bf)      # (Lq, D)
        enc_bf = enc_ref[0].astype(bf)        # (Lk, D)

        # ---- self-attention ----
        x1 = _mha_block(x_q, x_q.astype(bf), x_full_bf, sbias_ref, slf_ref,
                        s_wq, s_bq, s_wk, s_bk, s_wv, s_bv, s_wo, s_bo, s_g, s_b,
                        n_head=n_head, d_k=d_k, d_v=d_v, attn_dtype=attn_dtype)

        # ---- cross-attention ----
        x2 = _mha_block(x1, x1.astype(bf), enc_bf, cbias_ref, crs_ref,
                        c_wq, c_bq, c_wk, c_bk, c_wv, c_bv, c_wo, c_bo, c_g, c_b,
                        n_head=n_head, d_k=d_k, d_v=d_v, attn_dtype=attn_dtype)

        # ---- positionwise FFN ----
        h = jnp.dot(x2.astype(bf), w1[...], preferred_element_type=jnp.float32) + b1[...]
        h = jnp.maximum(h, 0.0)
        y = jnp.dot(h.astype(bf), w2[...], preferred_element_type=jnp.float32) + b2[...]
        out_ref[0] = _layernorm(y + x2, f_g[...], f_b[...])

    return kernel


# --------------------------------------------------------------------------- #
# Host-side parameter preparation (scale folding, per-head wo, bf16 cast)
# --------------------------------------------------------------------------- #
_WEIGHT_ORDER = ("s_wq", "s_bq", "s_wk", "s_bk", "s_wv", "s_bv", "s_wo", "s_bo", "s_g", "s_b",
                 "c_wq", "c_bq", "c_wk", "c_bk", "c_wv", "c_bv", "c_wo", "c_bo", "c_g", "c_b",
                 "w1", "b1", "w2", "b2", "f_g", "f_b")


def prepare_params(params, n_head, d_k, d_v):
    scale = 1.0 / (d_k ** 0.5)
    bf = jnp.bfloat16
    f32 = jnp.float32

    def mha(p, prefix):
        d_model = p["wo"].shape[-1]
        return {
            prefix + "_wq": (p["wq"] * scale).astype(bf),
            prefix + "_bq": (p["bq"] * scale).astype(f32),
            prefix + "_wk": p["wk"].astype(bf),
            prefix + "_bk": p["bk"].astype(f32),
            prefix + "_wv": p["wv"].astype(bf),
            prefix + "_bv": p["bv"].astype(f32),
            # (H*d_v, D) -> (H, d_v, D): per-head out-projection, summed over heads in-kernel
            prefix + "_wo": p["wo"].reshape(n_head, d_v, d_model).astype(bf),
            prefix + "_bo": p["bo"].astype(f32),
            prefix + "_g": p["gamma"].astype(f32),
            prefix + "_b": p["beta"].astype(f32),
        }

    ff = params["pos_ffn"]
    out = {}
    out.update(mha(params["slf_attn"], "s"))
    out.update(mha(params["cross_attn"], "c"))
    out.update({
        "w1": ff["w1"].astype(bf), "b1": ff["b1"].astype(f32),
        "w2": ff["w2"].astype(bf), "b2": ff["b2"].astype(f32),
        "f_g": ff["gamma"].astype(f32), "f_b": ff["beta"].astype(f32),
    })
    return out


def _mask_to_bias(mask):
    """1/0 keep-mask -> additive bias (0 / -1e9). None stays None (kernel specialization)."""
    if mask is None:
        return None, True
    m = mask.astype(jnp.float32)
    if m.ndim == 2:
        m = m[None]
    bias = jnp.where(m == 0, -1e9, 0.0).astype(jnp.float32)
    return bias, bias.shape[0] == 1


def _pick_q_tile(lq):
    for t in (256, 128):
        if lq % t == 0:
            return t
    return lq


def _vmem_limit_bytes(lq, lk, d_model, tq, n_head, has_sbias, has_cbias,
                      weights, attn_itemsize):
    f32 = 4
    dbl = (tq * d_model + lq * d_model + lk * d_model + tq * d_model) * f32
    dbl += n_head * tq * (lq + lk) * attn_itemsize
    if has_sbias:
        dbl += tq * lq * f32
    if has_cbias:
        dbl += tq * lk * f32
    sgl = sum(int(w.size) * w.dtype.itemsize for w in weights)   # single-buffered weights
    est = int(1.75 * (2 * dbl + sgl))                            # 2x pipelining + temporaries
    # clamp: >= default scoped (32 MiB), <= v7x physical (64 MiB)
    return max(32 * 1024 * 1024, min(est, 64 * 1024 * 1024))


# --------------------------------------------------------------------------- #
# DecoderLayer forward (single pallas_call)
# --------------------------------------------------------------------------- #
def decoder_layer(dec_input, enc_output, params, *, n_head, d_k, d_v,
                  slf_attn_mask=None, dec_enc_attn_mask=None,
                  attn_dtype=jnp.bfloat16):
    B, Lq, D = dec_input.shape
    Lk = enc_output.shape[1]
    tq = _pick_q_tile(Lq)
    nq = Lq // tq

    prep = prepare_params(params, n_head, d_k, d_v)
    weights = [prep[n] for n in _WEIGHT_ORDER]

    sbias, s_shared = _mask_to_bias(slf_attn_mask)
    cbias, c_shared = _mask_to_bias(dec_enc_attn_mask)
    has_sbias = sbias is not None
    has_cbias = cbias is not None

    def weight_spec(arr):
        nd = arr.ndim
        return pl.BlockSpec(arr.shape, lambda b, q, _nd=nd: (0,) * _nd,
                            pipeline_mode=pl.Buffered(1))   # fetched once, single-buffered

    def bias_spec(shared, lk):
        if shared:
            return pl.BlockSpec((1, tq, lk), lambda b, q: (0, q, 0))
        return pl.BlockSpec((1, tq, lk), lambda b, q: (b, q, 0))

    in_specs = [
        pl.BlockSpec((1, tq, D), lambda b, q: (b, q, 0)),   # decoder rows of this q tile
        pl.BlockSpec((1, Lq, D), lambda b, q: (b, 0, 0)),   # full decoder seq (self K/V)
        pl.BlockSpec((1, Lk, D), lambda b, q: (b, 0, 0)),   # encoder output (cross K/V)
    ]
    inputs = [dec_input, dec_input, enc_output]
    if has_sbias:
        in_specs.append(bias_spec(s_shared, Lq))
        inputs.append(sbias)
    if has_cbias:
        in_specs.append(bias_spec(c_shared, Lk))
        inputs.append(cbias)
    in_specs += [weight_spec(w) for w in weights]
    inputs += weights

    out_specs = (
        pl.BlockSpec((1, tq, D), lambda b, q: (b, q, 0)),
        pl.BlockSpec((1, n_head, tq, Lq), lambda b, q: (b, 0, q, 0)),
        pl.BlockSpec((1, n_head, tq, Lk), lambda b, q: (b, 0, q, 0)),
    )
    out_shape = (
        jax.ShapeDtypeStruct((B, Lq, D), jnp.float32),
        jax.ShapeDtypeStruct((B, n_head, Lq, Lq), attn_dtype),
        jax.ShapeDtypeStruct((B, n_head, Lq, Lk), attn_dtype),
    )

    vmem_limit = _vmem_limit_bytes(Lq, Lk, D, tq, n_head, has_sbias, has_cbias,
                                   weights, jnp.dtype(attn_dtype).itemsize)

    kernel = _build_kernel(n_head=n_head, d_k=d_k, d_v=d_v,
                           has_sbias=has_sbias, has_cbias=has_cbias,
                           attn_dtype=attn_dtype)

    out, slf_attn, crs_attn = pl.pallas_call(
        kernel,
        out_shape=out_shape,
        grid=(B, nq),
        in_specs=in_specs,
        out_specs=out_specs,
        compiler_params=pltpu.CompilerParams(
            dimension_semantics=("parallel", "parallel"),
            vmem_limit_bytes=vmem_limit),
    )(*inputs)

    return out, slf_attn, crs_attn


# --------------------------------------------------------------------------- #
# Parameter construction (deterministic, synthetic)
# --------------------------------------------------------------------------- #
def init_mha_params(key, d_model, n_head, d_k, d_v):
    ks = jax.random.split(key, 4)
    s = 0.05
    return {
        "wq": jax.random.normal(ks[0], (d_model, n_head * d_k), jnp.float32) * s,
        "bq": jnp.zeros((1, n_head * d_k), jnp.float32),
        "wk": jax.random.normal(ks[1], (d_model, n_head * d_k), jnp.float32) * s,
        "bk": jnp.zeros((1, n_head * d_k), jnp.float32),
        "wv": jax.random.normal(ks[2], (d_model, n_head * d_v), jnp.float32) * s,
        "bv": jnp.zeros((1, n_head * d_v), jnp.float32),
        "wo": jax.random.normal(ks[3], (n_head * d_v, d_model), jnp.float32) * s,
        "bo": jnp.zeros((1, d_model), jnp.float32),
        "gamma": jnp.ones((1, d_model), jnp.float32),
        "beta": jnp.zeros((1, d_model), jnp.float32),
    }


def init_ffn_params(key, d_model, d_inner):
    k1, k2 = jax.random.split(key)
    s = 0.05
    return {
        "w1": jax.random.normal(k1, (d_model, d_inner), jnp.float32) * s,
        "b1": jnp.zeros((1, d_inner), jnp.float32),
        "w2": jax.random.normal(k2, (d_inner, d_model), jnp.float32) * s,
        "b2": jnp.zeros((1, d_model), jnp.float32),
        "gamma": jnp.ones((1, d_model), jnp.float32),
        "beta": jnp.zeros((1, d_model), jnp.float32),
    }


# --------------------------------------------------------------------------- #
# Demo
# --------------------------------------------------------------------------- #
if __name__ == "__main__":
    B, Lq, Lk = 2, 8, 8
    d_model, d_inner, n_head, d_k, d_v = 32, 64, 4, 8, 8

    root = jax.random.PRNGKey(0)
    k_in, k_enc, k_slf, k_crs, k_ffn = jax.random.split(root, 5)

    dec_input = jax.random.normal(k_in, (B, Lq, d_model), jnp.float32)
    enc_output = jax.random.normal(k_enc, (B, Lk, d_model), jnp.float32)

    params = {
        "slf_attn": init_mha_params(k_slf, d_model, n_head, d_k, d_v),
        "cross_attn": init_mha_params(k_crs, d_model, n_head, d_k, d_v),
        "pos_ffn": init_ffn_params(k_ffn, d_model, d_inner),
    }

    # Causal mask for self-attention, shared across the batch (single (1, Lq, Lq) copy in
    # HBM); cross-attention mask is None -> that bias/add path is compiled out.
    slf_mask = jnp.tril(jnp.ones((Lq, Lq), jnp.float32))[None]

    dec_out, slf_attn, enc_attn = decoder_layer(
        dec_input, enc_output, params,
        n_head=n_head, d_k=d_k, d_v=d_v,
        slf_attn_mask=slf_mask, dec_enc_attn_mask=None)

    jax.block_until_ready((dec_out, slf_attn, enc_attn))

    assert dec_out.shape == (B, Lq, d_model)
    assert slf_attn.shape == (B, n_head, Lq, Lq)
    assert enc_attn.shape == (B, n_head, Lq, Lk)
    assert slf_attn.dtype == jnp.bfloat16 and enc_attn.dtype == jnp.bfloat16
    assert bool(jnp.all(jnp.isfinite(dec_out)))
    assert bool(jnp.all(jnp.isfinite(slf_attn.astype(jnp.float32))))
    # causal mask respected: upper-triangular probabilities are exactly zero
    assert bool(jnp.all(slf_attn.astype(jnp.float32)[:, :, 0, 1:] == 0.0))
    print("KERNEL_OK")
</pallas_src>

<mosaic_0001>
module attributes {stable_mosaic.version = 11 : i64} {
  func.func @kernel(%arg0: i32, %arg1: i32, %arg2: memref<1x8x32xf32, #tpu.memory_space<vmem>>, %arg3: memref<1x8x32xf32, #tpu.memory_space<vmem>>, %arg4: memref<1x8x32xf32, #tpu.memory_space<vmem>>, %arg5: memref<1x8x8xf32, #tpu.memory_space<vmem>>, %arg6: memref<32x32xbf16, #tpu.memory_space<vmem>>, %arg7: memref<1x32xf32, #tpu.memory_space<vmem>>, %arg8: memref<32x32xbf16, #tpu.memory_space<vmem>>, %arg9: memref<1x32xf32, #tpu.memory_space<vmem>>, %arg10: memref<32x32xbf16, #tpu.memory_space<vmem>>, %arg11: memref<1x32xf32, #tpu.memory_space<vmem>>, %arg12: memref<4x8x32xbf16, #tpu.memory_space<vmem>>, %arg13: memref<1x32xf32, #tpu.memory_space<vmem>>, %arg14: memref<1x32xf32, #tpu.memory_space<vmem>>, %arg15: memref<1x32xf32, #tpu.memory_space<vmem>>, %arg16: memref<32x32xbf16, #tpu.memory_space<vmem>>, %arg17: memref<1x32xf32, #tpu.memory_space<vmem>>, %arg18: memref<32x32xbf16, #tpu.memory_space<vmem>>, %arg19: memref<1x32xf32, #tpu.memory_space<vmem>>, %arg20: memref<32x32xbf16, #tpu.memory_space<vmem>>, %arg21: memref<1x32xf32, #tpu.memory_space<vmem>>, %arg22: memref<4x8x32xbf16, #tpu.memory_space<vmem>>, %arg23: memref<1x32xf32, #tpu.memory_space<vmem>>, %arg24: memref<1x32xf32, #tpu.memory_space<vmem>>, %arg25: memref<1x32xf32, #tpu.memory_space<vmem>>, %arg26: memref<32x64xbf16, #tpu.memory_space<vmem>>, %arg27: memref<1x64xf32, #tpu.memory_space<vmem>>, %arg28: memref<64x32xbf16, #tpu.memory_space<vmem>>, %arg29: memref<1x32xf32, #tpu.memory_space<vmem>>, %arg30: memref<1x32xf32, #tpu.memory_space<vmem>>, %arg31: memref<1x32xf32, #tpu.memory_space<vmem>>, %arg32: memref<1x8x32xf32, #tpu.memory_space<vmem>>, %arg33: memref<1x4x8x8xbf16, #tpu.memory_space<vmem>>, %arg34: memref<1x4x8x8xbf16, #tpu.memory_space<vmem>>) attributes {dimension_semantics = [#tpu.dimension_semantics<parallel>, #tpu.dimension_semantics<parallel>], iteration_bounds = array<i64: 2, 1>, scalar_prefetch = 0 : i64, scratch_operands = 0 : i64, tpu.core_type = #tpu.core_type<tc>, window_params = [{transform_indices = @transform_0, window_bounds = array<i64: 1, 8, 32>}, {transform_indices = @transform_1, window_bounds = array<i64: 1, 8, 32>}, {transform_indices = @transform_2, window_bounds = array<i64: 1, 8, 32>}, {transform_indices = @transform_3, window_bounds = array<i64: 1, 8, 8>}, {pipeline_mode = #tpu.pipeline_mode<synchronous>, transform_indices = @transform_4, window_bounds = array<i64: 32, 32>}, {pipeline_mode = #tpu.pipeline_mode<synchronous>, transform_indices = @transform_5, window_bounds = array<i64: 1, 32>}, {pipeline_mode = #tpu.pipeline_mode<synchronous>, transform_indices = @transform_6, window_bounds = array<i64: 32, 32>}, {pipeline_mode = #tpu.pipeline_mode<synchronous>, transform_indices = @transform_7, window_bounds = array<i64: 1, 32>}, {pipeline_mode = #tpu.pipeline_mode<synchronous>, transform_indices = @transform_8, window_bounds = array<i64: 32, 32>}, {pipeline_mode = #tpu.pipeline_mode<synchronous>, transform_indices = @transform_9, window_bounds = array<i64: 1, 32>}, {pipeline_mode = #tpu.pipeline_mode<synchronous>, transform_indices = @transform_10, window_bounds = array<i64: 4, 8, 32>}, {pipeline_mode = #tpu.pipeline_mode<synchronous>, transform_indices = @transform_11, window_bounds = array<i64: 1, 32>}, {pipeline_mode = #tpu.pipeline_mode<synchronous>, transform_indices = @transform_12, window_bounds = array<i64: 1, 32>}, {pipeline_mode = #tpu.pipeline_mode<synchronous>, transform_indices = @transform_13, window_bounds = array<i64: 1, 32>}, {pipeline_mode = #tpu.pipeline_mode<synchronous>, transform_indices = @transform_14, window_bounds = array<i64: 32, 32>}, {pipeline_mode = #tpu.pipeline_mode<synchronous>, transform_indices = @transform_15, window_bounds = array<i64: 1, 32>}, {pipeline_mode = #tpu.pipeline_mode<synchronous>, transform_indices = @transform_16, window_bounds = array<i64: 32, 32>}, {pipeline_mode = #tpu.pipeline_mode<synchronous>, transform_indices = @transform_17, window_bounds = array<i64: 1, 32>}, {pipeline_mode = #tpu.pipeline_mode<synchronous>, transform_indices = @transform_18, window_bounds = array<i64: 32, 32>}, {pipeline_mode = #tpu.pipeline_mode<synchronous>, transform_indices = @transform_19, window_bounds = array<i64: 1, 32>}, {pipeline_mode = #tpu.pipeline_mode<synchronous>, transform_indices = @transform_20, window_bounds = array<i64: 4, 8, 32>}, {pipeline_mode = #tpu.pipeline_mode<synchronous>, transform_indices = @transform_21, window_bounds = array<i64: 1, 32>}, {pipeline_mode = #tpu.pipeline_mode<synchronous>, transform_indices = @transform_22, window_bounds = array<i64: 1, 32>}, {pipeline_mode = #tpu.pipeline_mode<synchronous>, transform_indices = @transform_23, window_bounds = array<i64: 1, 32>}, {pipeline_mode = #tpu.pipeline_mode<synchronous>, transform_indices = @transform_24, window_bounds = array<i64: 32, 64>}, {pipeline_mode = #tpu.pipeline_mode<synchronous>, transform_indices = @transform_25, window_bounds = array<i64: 1, 64>}, {pipeline_mode = #tpu.pipeline_mode<synchronous>, transform_indices = @transform_26, window_bounds = array<i64: 64, 32>}, {pipeline_mode = #tpu.pipeline_mode<synchronous>, transform_indices = @transform_27, window_bounds = array<i64: 1, 32>}, {pipeline_mode = #tpu.pipeline_mode<synchronous>, transform_indices = @transform_28, window_bounds = array<i64: 1, 32>}, {pipeline_mode = #tpu.pipeline_mode<synchronous>, transform_indices = @transform_29, window_bounds = array<i64: 1, 32>}, {transform_indices = @transform_30, window_bounds = array<i64: 1, 8, 32>}, {transform_indices = @transform_31, window_bounds = array<i64: 1, 4, 8, 8>}, {transform_indices = @transform_32, window_bounds = array<i64: 1, 4, 8, 8>}]} {
    %c0 = arith.constant 0 : index
    %c0_0 = arith.constant 0 : index
    %c0_1 = arith.constant 0 : index
    %0 = vector.load %arg2[%c0, %c0_0, %c0_1] : memref<1x8x32xf32, #tpu.memory_space<vmem>>, vector<1x8x32xf32>
    %1 = vector.shape_cast %0 : vector<1x8x32xf32> to vector<8x32xf32>
    %c0_2 = arith.constant 0 : index
    %c0_3 = arith.constant 0 : index
    %c0_4 = arith.constant 0 : index
    %2 = vector.load %arg3[%c0_2, %c0_3, %c0_4] : memref<1x8x32xf32, #tpu.memory_space<vmem>>, vector<1x8x32xf32>
    %3 = vector.shape_cast %2 : vector<1x8x32xf32> to vector<8x32xf32>
    %4 = arith.truncf %3 : vector<8x32xf32> to vector<8x32xbf16>
    %c0_5 = arith.constant 0 : index
    %c0_6 = arith.constant 0 : index
    %c0_7 = arith.constant 0 : index
    %5 = vector.load %arg4[%c0_5, %c0_6, %c0_7] : memref<1x8x32xf32, #tpu.memory_space<vmem>>, vector<1x8x32xf32>
    %6 = vector.shape_cast %5 : vector<1x8x32xf32> to vector<8x32xf32>
    %7 = arith.truncf %6 : vector<8x32xf32> to vector<8x32xbf16>
    %8 = arith.truncf %1 : vector<8x32xf32> to vector<8x32xbf16>
    %c0_8 = arith.constant 0 : index
    %c0_9 = arith.constant 0 : index
    %9 = vector.load %arg6[%c0_8, %c0_9] : memref<32x32xbf16, #tpu.memory_space<vmem>>, vector<32x32xbf16>
    %cst = arith.constant dense<0.000000e+00> : vector<8x32xf32>
    %10 = tpu.matmul %8, %9, %cst {dimension_numbers = #tpu.dot_dimension_numbers<[1], [0], [0], [1], [0, 0, 1, 1], [], []>} : vector<8x32xbf16>, vector<32x32xbf16>, vector<8x32xf32> -> vector<8x32xf32>
    %c0_10 = arith.constant 0 : index
    %c0_11 = arith.constant 0 : index
    %11 = vector.load %arg7[%c0_10, %c0_11] : memref<1x32xf32, #tpu.memory_space<vmem>>, vector<1x32xf32>
    %12 = vector.broadcast %11 : vector<1x32xf32> to vector<8x32xf32>
    %13 = arith.addf %10, %12 : vector<8x32xf32>
    %c0_12 = arith.constant 0 : index
    %c0_13 = arith.constant 0 : index
    %14 = vector.load %arg8[%c0_12, %c0_13] : memref<32x32xbf16, #tpu.memory_space<vmem>>, vector<32x32xbf16>
    %cst_14 = arith.constant dense<0.000000e+00> : vector<8x32xf32>
    %15 = tpu.matmul %4, %14, %cst_14 {dimension_numbers = #tpu.dot_dimension_numbers<[1], [0], [0], [1], [0, 0, 1, 1], [], []>} : vector<8x32xbf16>, vector<32x32xbf16>, vector<8x32xf32> -> vector<8x32xf32>
    %c0_15 = arith.constant 0 : index
    %c0_16 = arith.constant 0 : index
    %16 = vector.load %arg9[%c0_15, %c0_16] : memref<1x32xf32, #tpu.memory_space<vmem>>, vector<1x32xf32>
    %17 = vector.broadcast %16 : vector<1x32xf32> to vector<8x32xf32>
    %18 = arith.addf %15, %17 : vector<8x32xf32>
    %c0_17 = arith.constant 0 : index
    %c0_18 = arith.constant 0 : index
    %19 = vector.load %arg10[%c0_17, %c0_18] : memref<32x32xbf16, #tpu.memory_space<vmem>>, vector<32x32xbf16>
    %cst_19 = arith.constant dense<0.000000e+00> : vector<8x32xf32>
    %20 = tpu.matmul %4, %19, %cst_19 {dimension_numbers = #tpu.dot_dimension_numbers<[1], [0], [0], [1], [0, 0, 1, 1], [], []>} : vector<8x32xbf16>, vector<32x32xbf16>, vector<8x32xf32> -> vector<8x32xf32>
    %c0_20 = arith.constant 0 : index
    %c0_21 = arith.constant 0 : index
    %21 = vector.load %arg11[%c0_20, %c0_21] : memref<1x32xf32, #tpu.memory_space<vmem>>, vector<1x32xf32>
    %22 = vector.broadcast %21 : vector<1x32xf32> to vector<8x32xf32>
    %23 = arith.addf %20, %22 : vector<8x32xf32>
    %24 = vector.shape_cast %13 : vector<8x32xf32> to vector<8x4x8xf32>
    %25 = tpu.transpose %24, [1, 0, 2] : vector<8x4x8xf32> -> vector<4x8x8xf32>
    %26 = arith.truncf %25 : vector<4x8x8xf32> to vector<4x8x8xbf16>
    %27 = vector.shape_cast %18 : vector<8x32xf32> to vector<8x4x8xf32>
    %28 = tpu.transpose %27, [1, 0, 2] : vector<8x4x8xf32> -> vector<4x8x8xf32>
    %29 = arith.truncf %28 : vector<4x8x8xf32> to vector<4x8x8xbf16>
    %30 = vector.shape_cast %23 : vector<8x32xf32> to vector<8x4x8xf32>
    %31 = tpu.transpose %30, [1, 0, 2] : vector<8x4x8xf32> -> vector<4x8x8xf32>
    %32 = arith.truncf %31 : vector<4x8x8xf32> to vector<4x8x8xbf16>
    "tpu.trace_start"() <{level = 10 : i32, message = "hqd,hkd->hqk"}> : () -> ()
    %cst_22 = arith.constant dense<0.000000e+00> : vector<4x8x8xf32>
    %33 = tpu.matmul %26, %29, %cst_22 {dimension_numbers = #tpu.dot_dimension_numbers<[2], [2], [1], [1], [0, 0, 0, 1, 1, 1], [0], [0]>} : vector<4x8x8xbf16>, vector<4x8x8xbf16>, vector<4x8x8xf32> -> vector<4x8x8xf32>
    "tpu.trace_stop"() : () -> ()
    %c0_23 = arith.constant 0 : index
    %c0_24 = arith.constant 0 : index
    %c0_25 = arith.constant 0 : index
    %34 = vector.load %arg5[%c0_23, %c0_24, %c0_25] : memref<1x8x8xf32, #tpu.memory_space<vmem>>, vector<1x8x8xf32>
    %35 = vector.shape_cast %34 : vector<1x8x8xf32> to vector<8x8xf32>
    %36 = vector.shape_cast %35 : vector<8x8xf32> to vector<1x8x8xf32>
    %37 = vector.broadcast %36 : vector<1x8x8xf32> to vector<4x8x8xf32>
    %38 = arith.addf %33, %37 : vector<4x8x8xf32>
    %cst_26 = arith.constant dense<0xFF800000> : vector<4x8xf32>
    %39 = vector.multi_reduction <maximumf>, %38, %cst_26 [2] : vector<4x8x8xf32> to vector<4x8xf32>
    %40 = vector.shape_cast %39 : vector<4x8xf32> to vector<4x8x1xf32>
    %41 = vector.broadcast %40 : vector<4x8x1xf32> to vector<4x8x8xf32>
    %42 = arith.subf %38, %41 : vector<4x8x8xf32>
    %43 = math.exp %42 : vector<4x8x8xf32>
    %cst_27 = arith.constant dense<0.000000e+00> : vector<4x8xf32>
    %44 = vector.multi_reduction <add>, %43, %cst_27 [2] : vector<4x8x8xf32> to vector<4x8xf32>
    %45 = vector.shape_cast %44 : vector<4x8xf32> to vector<4x8x1xf32>
    %46 = tpu.reciprocal %45 : vector<4x8x1xf32> -> vector<4x8x1xf32>
    %47 = vector.broadcast %46 : vector<4x8x1xf32> to vector<4x8x8xf32>
    %48 = arith.mulf %43, %47 : vector<4x8x8xf32>
    %49 = arith.truncf %48 : vector<4x8x8xf32> to vector<4x8x8xbf16>
    %c0_28 = arith.constant 0 : index
    %c0_29 = arith.constant 0 : index
    %c0_30 = arith.constant 0 : index
    %c0_31 = arith.constant 0 : index
    %50 = vector.load %arg33[%c0_28, %c0_29, %c0_30, %c0_31] : memref<1x4x8x8xbf16, #tpu.memory_space<vmem>>, vector<1x4x8x8xbf16>
    %51 = vector.shape_cast %50 : vector<1x4x8x8xbf16> to vector<4x8x8xbf16>
    %52 = vector.shape_cast %49 : vector<4x8x8xbf16> to vector<1x4x8x8xbf16>
    tpu.vector_store %arg33[%c0_28, %c0_29, %c0_30, %c0_31], %52 {strides = array<i32>} : memref<1x4x8x8xbf16, #tpu.memory_space<vmem>>, vector<1x4x8x8xbf16>,
    %53 = arith.truncf %48 : vector<4x8x8xf32> to vector<4x8x8xbf16>
    "tpu.trace_start"() <{level = 10 : i32, message = "hqk,hkd->hqd"}> : () -> ()
    %cst_32 = arith.constant dense<0.000000e+00> : vector<4x8x8xf32>
    %54 = tpu.matmul %53, %32, %cst_32 {dimension_numbers = #tpu.dot_dimension_numbers<[2], [1], [1], [2], [0, 0, 0, 1, 1, 2], [0], [0]>} : vector<4x8x8xbf16>, vector<4x8x8xbf16>, vector<4x8x8xf32> -> vector<4x8x8xf32>
    "tpu.trace_stop"() : () -> ()
    %55 = arith.truncf %54 : vector<4x8x8xf32> to vector<4x8x8xbf16>
    %c0_33 = arith.constant 0 : index
    %c0_34 = arith.constant 0 : index
    %c0_35 = arith.constant 0 : index
    %56 = vector.load %arg12[%c0_33, %c0_34, %c0_35] : memref<4x8x32xbf16, #tpu.memory_space<vmem>>, vector<4x8x32xbf16>
    "tpu.trace_start"() <{level = 10 : i32, message = "hqd,hdD->hqD"}> : () -> ()
    %cst_36 = arith.constant dense<0.000000e+00> : vector<4x8x32xf32>
    %57 = tpu.matmul %55, %56, %cst_36 {dimension_numbers = #tpu.dot_dimension_numbers<[2], [1], [1], [2], [0, 0, 0, 1, 1, 2], [0], [0]>} : vector<4x8x8xbf16>, vector<4x8x32xbf16>, vector<4x8x32xf32> -> vector<4x8x32xf32>
    "tpu.trace_stop"() : () -> ()
    %cst_37 = arith.constant dense<0.000000e+00> : vector<8x32xf32>
    %58 = vector.multi_reduction <add>, %57, %cst_37 [0] : vector<4x8x32xf32> to vector<8x32xf32>
    %c0_38 = arith.constant 0 : index
    %c0_39 = arith.constant 0 : index
    %59 = vector.load %arg13[%c0_38, %c0_39] : memref<1x32xf32, #tpu.memory_space<vmem>>, vector<1x32xf32>
    %60 = vector.broadcast %59 : vector<1x32xf32> to vector<8x32xf32>
    %61 = arith.addf %58, %60 : vector<8x32xf32>
    %62 = arith.addf %61, %1 : vector<8x32xf32>
    %c0_40 = arith.constant 0 : index
    %c0_41 = arith.constant 0 : index
    %63 = vector.load %arg14[%c0_40, %c0_41] : memref<1x32xf32, #tpu.memory_space<vmem>>, vector<1x32xf32>
    %c0_42 = arith.constant 0 : index
    %c0_43 = arith.constant 0 : index
    %64 = vector.load %arg15[%c0_42, %c0_43] : memref<1x32xf32, #tpu.memory_space<vmem>>, vector<1x32xf32>
    %cst_44 = arith.constant dense<0.000000e+00> : vector<8xf32>
    %65 = vector.multi_reduction <add>, %62, %cst_44 [1] : vector<8x32xf32> to vector<8xf32>
    %66 = vector.shape_cast %65 : vector<8xf32> to vector<8x1xf32>
    %cst_45 = arith.constant 3.200000e+01 : f32
    %67 = vector.broadcast %cst_45 : f32 to vector<8x1xf32>
    %68 = arith.divf %66, %67 : vector<8x1xf32>
    %69 = vector.broadcast %68 : vector<8x1xf32> to vector<8x32xf32>
    %70 = arith.subf %62, %69 : vector<8x32xf32>
    %71 = arith.mulf %70, %70 : vector<8x32xf32>
    %cst_46 = arith.constant dense<0.000000e+00> : vector<8xf32>
    %72 = vector.multi_reduction <add>, %71, %cst_46 [1] : vector<8x32xf32> to vector<8xf32>
    %73 = vector.shape_cast %72 : vector<8xf32> to vector<8x1xf32>
    %cst_47 = arith.constant 3.200000e+01 : f32
    %74 = vector.broadcast %cst_47 : f32 to vector<8x1xf32>
    %75 = arith.divf %73, %74 : vector<8x1xf32>
    %cst_48 = arith.constant 9.99999997E-7 : f32
    %76 = vector.broadcast %cst_48 : f32 to vector<8x1xf32>
    %77 = arith.addf %75, %76 : vector<8x1xf32>
    %78 = math.rsqrt %77 : vector<8x1xf32>
    %79 = vector.broadcast %78 : vector<8x1xf32> to vector<8x32xf32>
    %80 = arith.mulf %70, %79 : vector<8x32xf32>
    %81 = vector.broadcast %63 : vector<1x32xf32> to vector<8x32xf32>
    %82 = arith.mulf %80, %81 : vector<8x32xf32>
    %83 = vector.broadcast %64 : vector<1x32xf32> to vector<8x32xf32>
    %84 = arith.addf %82, %83 : vector<8x32xf32>
    %85 = arith.truncf %84 : vector<8x32xf32> to vector<8x32xbf16>
    %c0_49 = arith.constant 0 : index
    %c0_50 = arith.constant 0 : index
    %86 = vector.load %arg16[%c0_49, %c0_50] : memref<32x32xbf16, #tpu.memory_space<vmem>>, vector<32x32xbf16>
    %cst_51 = arith.constant dense<0.000000e+00> : vector<8x32xf32>
    %87 = tpu.matmul %85, %86, %cst_51 {dimension_numbers = #tpu.dot_dimension_numbers<[1], [0], [0], [1], [0, 0, 1, 1], [], []>} : vector<8x32xbf16>, vector<32x32xbf16>, vector<8x32xf32> -> vector<8x32xf32>
    %c0_52 = arith.constant 0 : index
    %c0_53 = arith.constant 0 : index
    %88 = vector.load %arg17[%c0_52, %c0_53] : memref<1x32xf32, #tpu.memory_space<vmem>>, vector<1x32xf32>
    %89 = vector.broadcast %88 : vector<1x32xf32> to vector<8x32xf32>
    %90 = arith.addf %87, %89 : vector<8x32xf32>
    %c0_54 = arith.constant 0 : index
    %c0_55 = arith.constant 0 : index
    %91 = vector.load %arg18[%c0_54, %c0_55] : memref<32x32xbf16, #tpu.memory_space<vmem>>, vector<32x32xbf16>
    %cst_56 = arith.constant dense<0.000000e+00> : vector<8x32xf32>
    %92 = tpu.matmul %7, %91, %cst_56 {dimension_numbers = #tpu.dot_dimension_numbers<[1], [0], [0], [1], [0, 0, 1, 1], [], []>} : vector<8x32xbf16>, vector<32x32xbf16>, vector<8x32xf32> -> vector<8x32xf32>
    %c0_57 = arith.constant 0 : index
    %c0_58 = arith.constant 0 : index
    %93 = vector.load %arg19[%c0_57, %c0_58] : memref<1x32xf32, #tpu.memory_space<vmem>>, vector<1x32xf32>
    %94 = vector.broadcast %93 : vector<1x32xf32> to vector<8x32xf32>
    %95 = arith.addf %92, %94 : vector<8x32xf32>
    %c0_59 = arith.constant 0 : index
    %c0_60 = arith.constant 0 : index
    %96 = vector.load %arg20[%c0_59, %c0_60] : memref<32x32xbf16, #tpu.memory_space<vmem>>, vector<32x32xbf16>
    %cst_61 = arith.constant dense<0.000000e+00> : vector<8x32xf32>
    %97 = tpu.matmul %7, %96, %cst_61 {dimension_numbers = #tpu.dot_dimension_numbers<[1], [0], [0], [1], [0, 0, 1, 1], [], []>} : vector<8x32xbf16>, vector<32x32xbf16>, vector<8x32xf32> -> vector<8x32xf32>
    %c0_62 = arith.constant 0 : index
    %c0_63 = arith.constant 0 : index
    %98 = vector.load %arg21[%c0_62, %c0_63] : memref<1x32xf32, #tpu.memory_space<vmem>>, vector<1x32xf32>
    %99 = vector.broadcast %98 : vector<1x32xf32> to vector<8x32xf32>
    %100 = arith.addf %97, %99 : vector<8x32xf32>
    %101 = vector.shape_cast %90 : vector<8x32xf32> to vector<8x4x8xf32>
    %102 = tpu.transpose %101, [1, 0, 2] : vector<8x4x8xf32> -> vector<4x8x8xf32>
    %103 = arith.truncf %102 : vector<4x8x8xf32> to vector<4x8x8xbf16>
    %104 = vector.shape_cast %95 : vector<8x32xf32> to vector<8x4x8xf32>
    %105 = tpu.transpose %104, [1, 0, 2] : vector<8x4x8xf32> -> vector<4x8x8xf32>
    %106 = arith.truncf %105 : vector<4x8x8xf32> to vector<4x8x8xbf16>
    %107 = vector.shape_cast %100 : vector<8x32xf32> to vector<8x4x8xf32>
    %108 = tpu.transpose %107, [1, 0, 2] : vector<8x4x8xf32> -> vector<4x8x8xf32>
    %109 = arith.truncf %108 : vector<4x8x8xf32> to vector<4x8x8xbf16>
    "tpu.trace_start"() <{level = 10 : i32, message = "hqd,hkd->hqk"}> : () -> ()
    %cst_64 = arith.constant dense<0.000000e+00> : vector<4x8x8xf32>
    %110 = tpu.matmul %103, %106, %cst_64 {dimension_numbers = #tpu.dot_dimension_numbers<[2], [2], [1], [1], [0, 0, 0, 1, 1, 1], [0], [0]>} : vector<4x8x8xbf16>, vector<4x8x8xbf16>, vector<4x8x8xf32> -> vector<4x8x8xf32>
    "tpu.trace_stop"() : () -> ()
    %cst_65 = arith.constant dense<0xFF800000> : vector<4x8xf32>
    %111 = vector.multi_reduction <maximumf>, %110, %cst_65 [2] : vector<4x8x8xf32> to vector<4x8xf32>
    %112 = vector.shape_cast %111 : vector<4x8xf32> to vector<4x8x1xf32>
    %113 = vector.broadcast %112 : vector<4x8x1xf32> to vector<4x8x8xf32>
    %114 = arith.subf %110, %113 : vector<4x8x8xf32>
    %115 = math.exp %114 : vector<4x8x8xf32>
    %cst_66 = arith.constant dense<0.000000e+00> : vector<4x8xf32>
    %116 = vector.multi_reduction <add>, %115, %cst_66 [2] : vector<4x8x8xf32> to vector<4x8xf32>
    %117 = vector.shape_cast %116 : vector<4x8xf32> to vector<4x8x1xf32>
    %118 = tpu.reciprocal %117 : vector<4x8x1xf32> -> vector<4x8x1xf32>
    %119 = vector.broadcast %118 : vector<4x8x1xf32> to vector<4x8x8xf32>
    %120 = arith.mulf %115, %119 : vector<4x8x8xf32>
    %121 = arith.truncf %120 : vector<4x8x8xf32> to vector<4x8x8xbf16>
    %c0_67 = arith.constant 0 : index
    %c0_68 = arith.constant 0 : index
    %c0_69 = arith.constant 0 : index
    %c0_70 = arith.constant 0 : index
    %122 = vector.load %arg34[%c0_67, %c0_68, %c0_69, %c0_70] : memref<1x4x8x8xbf16, #tpu.memory_space<vmem>>, vector<1x4x8x8xbf16>
    %123 = vector.shape_cast %122 : vector<1x4x8x8xbf16> to vector<4x8x8xbf16>
    %124 = vector.shape_cast %121 : vector<4x8x8xbf16> to vector<1x4x8x8xbf16>
    tpu.vector_store %arg34[%c0_67, %c0_68, %c0_69, %c0_70], %124 {strides = array<i32>} : memref<1x4x8x8xbf16, #tpu.memory_space<vmem>>, vector<1x4x8x8xbf16>,
    %125 = arith.truncf %120 : vector<4x8x8xf32> to vector<4x8x8xbf16>
    "tpu.trace_start"() <{level = 10 : i32, message = "hqk,hkd->hqd"}> : () -> ()
    %cst_71 = arith.constant dense<0.000000e+00> : vector<4x8x8xf32>
    %126 = tpu.matmul %125, %109, %cst_71 {dimension_numbers = #tpu.dot_dimension_numbers<[2], [1], [1], [2], [0, 0, 0, 1, 1, 2], [0], [0]>} : vector<4x8x8xbf16>, vector<4x8x8xbf16>, vector<4x8x8xf32> -> vector<4x8x8xf32>
    "tpu.trace_stop"() : () -> ()
    %127 = arith.truncf %126 : vector<4x8x8xf32> to vector<4x8x8xbf16>
    %c0_72 = arith.constant 0 : index
    %c0_73 = arith.constant 0 : index
    %c0_74 = arith.constant 0 : index
    %128 = vector.load %arg22[%c0_72, %c0_73, %c0_74] : memref<4x8x32xbf16, #tpu.memory_space<vmem>>, vector<4x8x32xbf16>
    "tpu.trace_start"() <{level = 10 : i32, message = "hqd,hdD->hqD"}> : () -> ()
    %cst_75 = arith.constant dense<0.000000e+00> : vector<4x8x32xf32>
    %129 = tpu.matmul %127, %128, %cst_75 {dimension_numbers = #tpu.dot_dimension_numbers<[2], [1], [1], [2], [0, 0, 0, 1, 1, 2], [0], [0]>} : vector<4x8x8xbf16>, vector<4x8x32xbf16>, vector<4x8x32xf32> -> vector<4x8x32xf32>
    "tpu.trace_stop"() : () -> ()
    %cst_76 = arith.constant dense<0.000000e+00> : vector<8x32xf32>
    %130 = vector.multi_reduction <add>, %129, %cst_76 [0] : vector<4x8x32xf32> to vector<8x32xf32>
    %c0_77 = arith.constant 0 : index
    %c0_78 = arith.constant 0 : index
    %131 = vector.load %arg23[%c0_77, %c0_78] : memref<1x32xf32, #tpu.memory_space<vmem>>, vector<1x32xf32>
    %132 = vector.broadcast %131 : vector<1x32xf32> to vector<8x32xf32>
    %133 = arith.addf %130, %132 : vector<8x32xf32>
    %134 = arith.addf %133, %84 : vector<8x32xf32>
    %c0_79 = arith.constant 0 : index
    %c0_80 = arith.constant 0 : index
    %135 = vector.load %arg24[%c0_79, %c0_80] : memref<1x32xf32, #tpu.memory_space<vmem>>, vector<1x32xf32>
    %c0_81 = arith.constant 0 : index
    %c0_82 = arith.constant 0 : index
    %136 = vector.load %arg25[%c0_81, %c0_82] : memref<1x32xf32, #tpu.memory_space<vmem>>, vector<1x32xf32>
    %cst_83 = arith.constant dense<0.000000e+00> : vector<8xf32>
    %137 = vector.multi_reduction <add>, %134, %cst_83 [1] : vector<8x32xf32> to vector<8xf32>
    %138 = vector.shape_cast %137 : vector<8xf32> to vector<8x1xf32>
    %cst_84 = arith.constant 3.200000e+01 : f32
    %139 = vector.broadcast %cst_84 : f32 to vector<8x1xf32>
    %140 = arith.divf %138, %139 : vector<8x1xf32>
    %141 = vector.broadcast %140 : vector<8x1xf32> to vector<8x32xf32>
    %142 = arith.subf %134, %141 : vector<8x32xf32>
    %143 = arith.mulf %142, %142 : vector<8x32xf32>
    %cst_85 = arith.constant dense<0.000000e+00> : vector<8xf32>
    %144 = vector.multi_reduction <add>, %143, %cst_85 [1] : vector<8x32xf32> to vector<8xf32>
    %145 = vector.shape_cast %144 : vector<8xf32> to vector<8x1xf32>
    %cst_86 = arith.constant 3.200000e+01 : f32
    %146 = vector.broadcast %cst_86 : f32 to vector<8x1xf32>
    %147 = arith.divf %145, %146 : vector<8x1xf32>
    %cst_87 = arith.constant 9.99999997E-7 : f32
    %148 = vector.broadcast %cst_87 : f32 to vector<8x1xf32>
    %149 = arith.addf %147, %148 : vector<8x1xf32>
    %150 = math.rsqrt %149 : vector<8x1xf32>
    %151 = vector.broadcast %150 : vector<8x1xf32> to vector<8x32xf32>
    %152 = arith.mulf %142, %151 : vector<8x32xf32>
    %153 = vector.broadcast %135 : vector<1x32xf32> to vector<8x32xf32>
    %154 = arith.mulf %152, %153 : vector<8x32xf32>
    %155 = vector.broadcast %136 : vector<1x32xf32> to vector<8x32xf32>
    %156 = arith.addf %154, %155 : vector<8x32xf32>
    %157 = arith.truncf %156 : vector<8x32xf32> to vector<8x32xbf16>
    %c0_88 = arith.constant 0 : index
    %c0_89 = arith.constant 0 : index
    %158 = vector.load %arg26[%c0_88, %c0_89] : memref<32x64xbf16, #tpu.memory_space<vmem>>, vector<32x64xbf16>
    %cst_90 = arith.constant dense<0.000000e+00> : vector<8x64xf32>
    %159 = tpu.matmul %157, %158, %cst_90 {dimension_numbers = #tpu.dot_dimension_numbers<[1], [0], [0], [1], [0, 0, 1, 1], [], []>} : vector<8x32xbf16>, vector<32x64xbf16>, vector<8x64xf32> -> vector<8x64xf32>
    %c0_91 = arith.constant 0 : index
    %c0_92 = arith.constant 0 : index
    %160 = vector.load %arg27[%c0_91, %c0_92] : memref<1x64xf32, #tpu.memory_space<vmem>>, vector<1x64xf32>
    %161 = vector.broadcast %160 : vector<1x64xf32> to vector<8x64xf32>
    %162 = arith.addf %159, %161 : vector<8x64xf32>
    %cst_93 = arith.constant 0.000000e+00 : f32
    %163 = vector.broadcast %cst_93 : f32 to vector<8x64xf32>
    %164 = arith.maximumf %162, %163 : vector<8x64xf32>
    %165 = arith.truncf %164 : vector<8x64xf32> to vector<8x64xbf16>
    %c0_94 = arith.constant 0 : index
    %c0_95 = arith.constant 0 : index
    %166 = vector.load %arg28[%c0_94, %c0_95] : memref<64x32xbf16, #tpu.memory_space<vmem>>, vector<64x32xbf16>
    %cst_96 = arith.constant dense<0.000000e+00> : vector<8x32xf32>
    %167 = tpu.matmul %165, %166, %cst_96 {dimension_numbers = #tpu.dot_dimension_numbers<[1], [0], [0], [1], [0, 0, 1, 1], [], []>} : vector<8x64xbf16>, vector<64x32xbf16>, vector<8x32xf32> -> vector<8x32xf32>
    %c0_97 = arith.constant 0 : index
    %c0_98 = arith.constant 0 : index
    %168 = vector.load %arg29[%c0_97, %c0_98] : memref<1x32xf32, #tpu.memory_space<vmem>>, vector<1x32xf32>
    %169 = vector.broadcast %168 : vector<1x32xf32> to vector<8x32xf32>
    %170 = arith.addf %167, %169 : vector<8x32xf32>
    %171 = arith.addf %170, %156 : vector<8x32xf32>
    %c0_99 = arith.constant 0 : index
    %c0_100 = arith.constant 0 : index
    %172 = vector.load %arg30[%c0_99, %c0_100] : memref<1x32xf32, #tpu.memory_space<vmem>>, vector<1x32xf32>
    %c0_101 = arith.constant 0 : index
    %c0_102 = arith.constant 0 : index
    %173 = vector.load %arg31[%c0_101, %c0_102] : memref<1x32xf32, #tpu.memory_space<vmem>>, vector<1x32xf32>
    %cst_103 = arith.constant dense<0.000000e+00> : vector<8xf32>
    %174 = vector.multi_reduction <add>, %171, %cst_103 [1] : vector<8x32xf32> to vector<8xf32>
    %175 = vector.shape_cast %174 : vector<8xf32> to vector<8x1xf32>
    %cst_104 = arith.constant 3.200000e+01 : f32
    %176 = vector.broadcast %cst_104 : f32 to vector<8x1xf32>
    %177 = arith.divf %175, %176 : vector<8x1xf32>
    %178 = vector.broadcast %177 : vector<8x1xf32> to vector<8x32xf32>
    %179 = arith.subf %171, %178 : vector<8x32xf32>
    %180 = arith.mulf %179, %179 : vector<8x32xf32>
    %cst_105 = arith.constant dense<0.000000e+00> : vector<8xf32>
    %181 = vector.multi_reduction <add>, %180, %cst_105 [1] : vector<8x32xf32> to vector<8xf32>
    %182 = vector.shape_cast %181 : vector<8xf32> to vector<8x1xf32>
    %cst_106 = arith.constant 3.200000e+01 : f32
    %183 = vector.broadcast %cst_106 : f32 to vector<8x1xf32>
    %184 = arith.divf %182, %183 : vector<8x1xf32>
    %cst_107 = arith.constant 9.99999997E-7 : f32
    %185 = vector.broadcast %cst_107 : f32 to vector<8x1xf32>
    %186 = arith.addf %184, %185 : vector<8x1xf32>
    %187 = math.rsqrt %186 : vector<8x1xf32>
    %188 = vector.broadcast %187 : vector<8x1xf32> to vector<8x32xf32>
    %189 = arith.mulf %179, %188 : vector<8x32xf32>
    %190 = vector.broadcast %172 : vector<1x32xf32> to vector<8x32xf32>
    %191 = arith.mulf %189, %190 : vector<8x32xf32>
    %192 = vector.broadcast %173 : vector<1x32xf32> to vector<8x32xf32>
    %193 = arith.addf %191, %192 : vector<8x32xf32>
    %c0_108 = arith.constant 0 : index
    %c0_109 = arith.constant 0 : index
    %c0_110 = arith.constant 0 : index
    %194 = vector.load %arg32[%c0_108, %c0_109, %c0_110] : memref<1x8x32xf32, #tpu.memory_space<vmem>>, vector<1x8x32xf32>
    %195 = vector.shape_cast %194 : vector<1x8x32xf32> to vector<8x32xf32>
    %196 = vector.shape_cast %193 : vector<8x32xf32> to vector<1x8x32xf32>
    tpu.vector_store %arg32[%c0_108, %c0_109, %c0_110], %196 {strides = array<i32>} : memref<1x8x32xf32, #tpu.memory_space<vmem>>, vector<1x8x32xf32>,
    return
  }
  func.func @transform_0(%arg0: i32, %arg1: i32) -> (i32, i32, i32) {
    %c0_i32 = arith.constant 0 : i32
    %c0_i32_0 = arith.constant 0 : i32
    return %arg0, %arg1, %c0_i32 : i32, i32, i32
  }
  func.func @transform_1(%arg0: i32, %arg1: i32) -> (i32, i32, i32) {
    %c0_i32 = arith.constant 0 : i32
    %c0_i32_0 = arith.constant 0 : i32
    %c0_i32_1 = arith.constant 0 : i32
    return %arg0, %c0_i32, %c0_i32_0 : i32, i32, i32
  }
  func.func @transform_2(%arg0: i32, %arg1: i32) -> (i32, i32, i32) {
    %c0_i32 = arith.constant 0 : i32
    %c0_i32_0 = arith.constant 0 : i32
    %c0_i32_1 = arith.constant 0 : i32
    return %arg0, %c0_i32, %c0_i32_0 : i32, i32, i32
  }
  func.func @transform_3(%arg0: i32, %arg1: i32) -> (i32, i32, i32) {
    %c0_i32 = arith.constant 0 : i32
    %c0_i32_0 = arith.constant 0 : i32
    %c0_i32_1 = arith.constant 0 : i32
    return %c0_i32, %arg1, %c0_i32_0 : i32, i32, i32
  }
  func.func @transform_4(%arg0: i32, %arg1: i32) -> (i32, i32) {
    %c0_i32 = arith.constant 0 : i32
    %c0_i32_0 = arith.constant 0 : i32
    %c0_i32_1 = arith.constant 0 : i32
    return %c0_i32, %c0_i32_0 : i32, i32
  }
  func.func @transform_5(%arg0: i32, %arg1: i32) -> (i32, i32) {
    %c0_i32 = arith.constant 0 : i32
    %c0_i32_0 = arith.constant 0 : i32
    %c0_i32_1 = arith.constant 0 : i32
    return %c0_i32, %c0_i32_0 : i32, i32
  }
  func.func @transform_6(%arg0: i32, %arg1: i32) -> (i32, i32) {
    %c0_i32 = arith.constant 0 : i32
    %c0_i32_0 = arith.constant 0 : i32
    %c0_i32_1 = arith.constant 0 : i32
    return %c0_i32, %c0_i32_0 : i32, i32
  }
  func.func @transform_7(%arg0: i32, %arg1: i32) -> (i32, i32) {
    %c0_i32 = arith.constant 0 : i32
    %c0_i32_0 = arith.constant 0 : i32
    %c0_i32_1 = arith.constant 0 : i32
    return %c0_i32, %c0_i32_0 : i32, i32
  }
  func.func @transform_8(%arg0: i32, %arg1: i32) -> (i32, i32) {
    %c0_i32 = arith.constant 0 : i32
    %c0_i32_0 = arith.constant 0 : i32
    %c0_i32_1 = arith.constant 0 : i32
    return %c0_i32, %c0_i32_0 : i32, i32
  }
  func.func @transform_9(%arg0: i32, %arg1: i32) -> (i32, i32) {
    %c0_i32 = arith.constant 0 : i32
    %c0_i32_0 = arith.constant 0 : i32
    %c0_i32_1 = arith.constant 0 : i32
    return %c0_i32, %c0_i32_0 : i32, i32
  }
  func.func @transform_10(%arg0: i32, %arg1: i32) -> (i32, i32, i32) {
    %c0_i32 = arith.constant 0 : i32
    %c0_i32_0 = arith.constant 0 : i32
    %c0_i32_1 = arith.constant 0 : i32
    %c0_i32_2 = arith.constant 0 : i32
    return %c0_i32, %c0_i32_0, %c0_i32_1 : i32, i32, i32
  }
  func.func @transform_11(%arg0: i32, %arg1: i32) -> (i32, i32) {
    %c0_i32 = arith.constant 0 : i32
    %c0_i32_0 = arith.constant 0 : i32
    %c0_i32_1 = arith.constant 0 : i32
    return %c0_i32, %c0_i32_0 : i32, i32
  }
  func.func @transform_12(%arg0: i32, %arg1: i32) -> (i32, i32) {
    %c0_i32 = arith.constant 0 : i32
    %c0_i32_0 = arith.constant 0 : i32
    %c0_i32_1 = arith.constant 0 : i32
    return %c0_i32, %c0_i32_0 : i32, i32
  }
  func.func @transform_13(%arg0: i32, %arg1: i32) -> (i32, i32) {
    %c0_i32 = arith.constant 0 : i32
    %c0_i32_0 = arith.constant 0 : i32
    %c0_i32_1 = arith.constant 0 : i32
    return %c0_i32, %c0_i32_0 : i32, i32
  }
  func.func @transform_14(%arg0: i32, %arg1: i32) -> (i32, i32) {
    %c0_i32 = arith.constant 0 : i32
    %c0_i32_0 = arith.constant 0 : i32
    %c0_i32_1 = arith.constant 0 : i32
    return %c0_i32, %c0_i32_0 : i32, i32
  }
  func.func @transform_15(%arg0: i32, %arg1: i32) -> (i32, i32) {
    %c0_i32 = arith.constant 0 : i32
    %c0_i32_0 = arith.constant 0 : i32
    %c0_i32_1 = arith.constant 0 : i32
    return %c0_i32, %c0_i32_0 : i32, i32
  }
  func.func @transform_16(%arg0: i32, %arg1: i32) -> (i32, i32) {
    %c0_i32 = arith.constant 0 : i32
    %c0_i32_0 = arith.constant 0 : i32
    %c0_i32_1 = arith.constant 0 : i32
    return %c0_i32, %c0_i32_0 : i32, i32
  }
  func.func @transform_17(%arg0: i32, %arg1: i32) -> (i32, i32) {
    %c0_i32 = arith.constant 0 : i32
    %c0_i32_0 = arith.constant 0 : i32
    %c0_i32_1 = arith.constant 0 : i32
    return %c0_i32, %c0_i32_0 : i32, i32
  }
  func.func @transform_18(%arg0: i32, %arg1: i32) -> (i32, i32) {
    %c0_i32 = arith.constant 0 : i32
    %c0_i32_0 = arith.constant 0 : i32
    %c0_i32_1 = arith.constant 0 : i32
    return %c0_i32, %c0_i32_0 : i32, i32
  }
  func.func @transform_19(%arg0: i32, %arg1: i32) -> (i32, i32) {
    %c0_i32 = arith.constant 0 : i32
    %c0_i32_0 = arith.constant 0 : i32
    %c0_i32_1 = arith.constant 0 : i32
    return %c0_i32, %c0_i32_0 : i32, i32
  }
  func.func @transform_20(%arg0: i32, %arg1: i32) -> (i32, i32, i32) {
    %c0_i32 = arith.constant 0 : i32
    %c0_i32_0 = arith.constant 0 : i32
    %c0_i32_1 = arith.constant 0 : i32
    %c0_i32_2 = arith.constant 0 : i32
    return %c0_i32, %c0_i32_0, %c0_i32_1 : i32, i32, i32
  }
  func.func @transform_21(%arg0: i32, %arg1: i32) -> (i32, i32) {
    %c0_i32 = arith.constant 0 : i32
    %c0_i32_0 = arith.constant 0 : i32
    %c0_i32_1 = arith.constant 0 : i32
    return %c0_i32, %c0_i32_0 : i32, i32
  }
  func.func @transform_22(%arg0: i32, %arg1: i32) -> (i32, i32) {
    %c0_i32 = arith.constant 0 : i32
    %c0_i32_0 = arith.constant 0 : i32
    %c0_i32_1 = arith.constant 0 : i32
    return %c0_i32, %c0_i32_0 : i32, i32
  }
  func.func @transform_23(%arg0: i32, %arg1: i32) -> (i32, i32) {
    %c0_i32 = arith.constant 0 : i32
    %c0_i32_0 = arith.constant 0 : i32
    %c0_i32_1 = arith.constant 0 : i32
    return %c0_i32, %c0_i32_0 : i32, i32
  }
  func.func @transform_24(%arg0: i32, %arg1: i32) -> (i32, i32) {
    %c0_i32 = arith.constant 0 : i32
    %c0_i32_0 = arith.constant 0 : i32
    %c0_i32_1 = arith.constant 0 : i32
    return %c0_i32, %c0_i32_0 : i32, i32
  }
  func.func @transform_25(%arg0: i32, %arg1: i32) -> (i32, i32) {
    %c0_i32 = arith.constant 0 : i32
    %c0_i32_0 = arith.constant 0 : i32
    %c0_i32_1 = arith.constant 0 : i32
    return %c0_i32, %c0_i32_0 : i32, i32
  }
  func.func @transform_26(%arg0: i32, %arg1: i32) -> (i32, i32) {
    %c0_i32 = arith.constant 0 : i32
    %c0_i32_0 = arith.constant 0 : i32
    %c0_i32_1 = arith.constant 0 : i32
    return %c0_i32, %c0_i32_0 : i32, i32
  }
  func.func @transform_27(%arg0: i32, %arg1: i32) -> (i32, i32) {
    %c0_i32 = arith.constant 0 : i32
    %c0_i32_0 = arith.constant 0 : i32
    %c0_i32_1 = arith.constant 0 : i32
    return %c0_i32, %c0_i32_0 : i32, i32
  }
  func.func @transform_28(%arg0: i32, %arg1: i32) -> (i32, i32) {
    %c0_i32 = arith.constant 0 : i32
    %c0_i32_0 = arith.constant 0 : i32
    %c0_i32_1 = arith.constant 0 : i32
    return %c0_i32, %c0_i32_0 : i32, i32
  }
  func.func @transform_29(%arg0: i32, %arg1: i32) -> (i32, i32) {
    %c0_i32 = arith.constant 0 : i32
    %c0_i32_0 = arith.constant 0 : i32
    %c0_i32_1 = arith.constant 0 : i32
    return %c0_i32, %c0_i32_0 : i32, i32
  }
  func.func @transform_30(%arg0: i32, %arg1: i32) -> (i32, i32, i32) {
    %c0_i32 = arith.constant 0 : i32
    %c0_i32_0 = arith.constant 0 : i32
    return %arg0, %arg1, %c0_i32 : i32, i32, i32
  }
  func.func @transform_31(%arg0: i32, %arg1: i32) -> (i32, i32, i32, i32) {
    %c0_i32 = arith.constant 0 : i32
    %c0_i32_0 = arith.constant 0 : i32
    %c0_i32_1 = arith.constant 0 : i32
    return %arg0, %c0_i32, %arg1, %c0_i32_0 : i32, i32, i32, i32
  }
  func.func @transform_32(%arg0: i32, %arg1: i32) -> (i32, i32, i32, i32) {
    %c0_i32 = arith.constant 0 : i32
    %c0_i32_0 = arith.constant 0 : i32
    %c0_i32_1 = arith.constant 0 : i32
    return %arg0, %c0_i32, %arg1, %c0_i32_0 : i32, i32, i32, i32
  }
}

</mosaic_0001>

<bundles_post_ra>
// kernel: tpu_custom_call.1
= control target key start
LH: loop header
LB: loop body
LE: loop exit
PB: predicated region body
PF: predicated region fallthrough
CT: control target
= control target key end

     0   :  { %s5730_s6 = smov 1   ;;  %s5731_s10 = smov 2   ;;  %s6762_s0 = inlined_call_operand.smem [shape: u32[33], index: -1, kind: input, shape index: {}] }
   0x1   :  { %s5798_s5 = sld [smem:[%s6762_s0]]   ;;  %s5732_s14 = smov 3  }
   0x2   :  { %s5803_s9 = sld [smem:[%s6762_s0 + %s5730_s6]]   ;;  %s5733_s18 = smov 4  }
   0x3   :  { %s5808_s13 = sld [smem:[%s6762_s0 + %s5731_s10]]   ;;  %s5734_s22 = smov 5  }
   0x4   :  { %s5813_s17 = sld [smem:[%s6762_s0 + %s5732_s14]]   ;;  %s5735_s26 = smov 6  }
   0x5   :  { %s5818_s21 = sld [smem:[%s6762_s0 + %s5733_s18]]   ;;  %s5736_s30 = smov 7  }
   0x6   :  { %s5823_s25 = sld [smem:[%s6762_s0 + %s5734_s22]]   ;;  %s5737_s4 = smov 8  }
   0x7   :  { %6790 = sst [smem:[#allocation39_spill]] %s5798_s5  ;;  %s5738_s10 = smov 9  }
   0x8   :  { %6791 = sst [smem:[#allocation40_spill]] %s5803_s9  ;;  %s5739_s15 = smov 10  }
   0x9   :  { %6792 = sst [smem:[#allocation41_spill]] %s5808_s13  ;;  %s5740_s20 = smov 11  }
   0xa   :  { %s5828_s29 = sld [smem:[%s6762_s0 + %s5735_s26]]   ;;  %s5741_s26 = smov 12  }
   0xb   :  { %6793 = sst [smem:[#allocation42_spill]] %s5818_s21  ;;  %s5742_s1 = smov 13  }
   0xc   :  { %s5833_s3 = sld [smem:[%s6762_s0 + %s5736_s30]]   ;;  %s5743_s7 = smov 14  }
   0xd   :  { %s5838_s8 = sld [smem:[%s6762_s0 + %s5737_s4]]   ;;  %s5745_s22 = smov 16  }
   0xe   :  { %s5843_s14 = sld [smem:[%s6762_s0 + %s5738_s10]]   ;;  %s5746_s28 = smov 17  }
   0xf   :  { %s5848_s19 = sld [smem:[%s6762_s0 + %s5739_s15]]   ;;  %s5744_s15 = smov 15  }
  0x10   :  { %s5853_s24 = sld [smem:[%s6762_s0 + %s5740_s20]]  }
  0x11   :  { %s5858_s30 = sld [smem:[%s6762_s0 + %s5741_s26]]  }
  0x12   :  { %6794 = sst [smem:[#allocation43_spill]] %s5833_s3 }
  0x13   :  { %6795 = sst [smem:[#allocation44_spill]] %s5838_s8 }
  0x14   :  { %s5863_s6 = sld [smem:[%s6762_s0 + %s5742_s1]]  }
  0x15   :  { %6796 = sst [smem:[#allocation45_spill]] %s5848_s19 }
  0x16   :  { %s5868_s12 = sld [smem:[%s6762_s0 + %s5743_s7]]   ;;  %s5747_s7 = smov 18  }
  0x17   :  { %s5873_s20 = sld [smem:[%s6762_s0 + %s5744_s15]]   ;;  %s5748_s15 = smov 19  }
  0x18   :  { %s5878_s27 = sld [smem:[%s6762_s0 + %s5745_s22]]   ;;  %s5749_s22 = smov 20  }
  0x19   :  { %s5883_s4 = sld [smem:[%s6762_s0 + %s5746_s28]]   ;;  %s5750_s28 = smov 21  }
  0x1a   :  { %6797 = sst [smem:[#allocation46_spill]] %s5863_s6 }
  0x1b   :  { %s5893_s13 = sld [smem:[%s6762_s0 + %s5748_s15]]   ;;  %s5752_s15 = smov 23  }
  0x1c   :  { %6798 = sst [smem:[#allocation47_spill]] %s5868_s12 }
  0x1d   :  { %s5888_s12 = sld [smem:[%s6762_s0 + %s5747_s7]]   ;;  %s5751_s7 = smov 22  }
  0x1e   :  { %s5898_s19 = sld [smem:[%s6762_s0 + %s5749_s22]]   ;;  %s5753_s22 = smov 24  }
  0x1f   :  { %6799 = sst [smem:[#allocation48_spill]] %s5883_s4 }
  0x20   :  { %s5903_s5 = sld [smem:[%s6762_s0 + %s5750_s28]]   ;;  %s5754_s28 = smov 25  }
  0x21   :  { %6801 = sst [smem:[#allocation50_spill]] %s5893_s13 }
  0x22   :  { %s5913_s13 = sld [smem:[%s6762_s0 + %s5752_s15]]   ;;  %s5756_s15 = smov 27  }
  0x23   :  { %6800 = sst [smem:[#allocation49_spill]] %s5888_s12 }
  0x24   :  { %s5908_s12 = sld [smem:[%s6762_s0 + %s5751_s7]]   ;;  %s5755_s7 = smov 26  }
  0x25   :  { %s5918_s9 = sld [smem:[%s6762_s0 + %s5753_s22]]   ;;  %s5757_s22 = smov 28  }
  0x26   :  { %6802 = sst [smem:[#allocation51_spill]] %s5903_s5 }
  0x27   :  { %s5923_s5 = sld [smem:[%s6762_s0 + %s5754_s28]]   ;;  %s5758_s28 = smov 29  }
  0x28   :  { %6804 = sst [smem:[#allocation53_spill]] %s5913_s13 }
  0x29   :  { %s5933_s13 = sld [smem:[%s6762_s0 + %s5756_s15]]   ;;  %s5760_s15 = smov 31  }
  0x2a   :  { %6803 = sst [smem:[#allocation52_spill]] %s5908_s12 }
  0x2b   :  { %6805 = sst [smem:[#allocation54_spill]] %s5918_s9 }
  0x2c   :  { %s5928_s12 = sld [smem:[%s6762_s0 + %s5755_s7]]   ;;  %s5759_s7 = smov 30  }
  0x2d   :  { %6806 = sst [smem:[#allocation55_spill]] %s5923_s5 }
  0x2e   :  { %s5938_s9 = sld [smem:[%s6762_s0 + %s5757_s22]]   ;;  %s5761_s22 = smov 32  }
  0x2f   :  { %6808 = sst [smem:[#allocation57_spill]] %s5933_s13 }
  0x30   :  { %s5943_s5 = sld [smem:[%s6762_s0 + %s5758_s28]]  }
  0x31   :  { %s5953_s13 = sld [smem:[%s6762_s0 + %s5760_s15]]  }
  0x32   :  { %6807 = sst [smem:[#allocation56_spill]] %s5928_s12 }
  0x33   :  { %s5948_s12 = sld [smem:[%s6762_s0 + %s5759_s7]]  }
  0x34   :  { %6809 = sst [smem:[#allocation58_spill]] %s5938_s9 }
  0x35   :  { %s5958_s9 = sld [smem:[%s6762_s0 + %s5761_s22]]  }
  0x36   :  { %6810 = sst [smem:[#allocation59_spill]] %s5943_s5 }
  0x39   :  { %6811 = sst [smem:[#allocation60_spill]] %s5948_s12 }
  0x3a   :  { %71 = vsyncpa [#allocation3], 0 }
  0x3b   :  { %72 = vsyncpa [#allocation6], 0 }
  0x3c   :  { %73 = vsyncpa [#allocation9], 0 }
  0x3d   :  { %74 = vsyncpa [#allocation12], 0 }
  0x3e   :  { %75 = vsyncpa [#allocation15], 0 }
  0x3f   :  { %76 = vsyncpa [#allocation18], 0 }
  0x40   :  { %77 = vsyncpa [#allocation21], 0 }
  0x41   :  { %78 = vsyncpa [#allocation24], 0 }
  0x42   :  { %79 = vsyncpa [#allocation4], 0 }
  0x43   :  { %81 = vsyncpa [#allocation4 + $0x1], 0 }
  0x44   :  { %82 = vsyncpa [#allocation27], 0 }
  0x45   :  { %84 = vsyncpa [#allocation27 + $0x1], 0  ;;  %s5960_s28 = smov 0   ;;  %s5962_s1 = smov 0  }
  0x46   :  { %s5964_s2 = smov 0   ;;  %s5966_s0 = smov 0  }
  0x47   :  { %s5968_s7 = smov 0   ;;  %s5970_s10 = smov 0  }
  0x48 LB: > { %s6812_s8 = sld [smem:[#allocation44_spill]]  ;;  %s6813_s6 = sld [smem:[#allocation46_spill]]  ;;  %s5724_s7 = sphi %s5968_s7, %s6876_s7   ;;  %s5720_s0 = sphi %s5966_s0, %s6875_s0   ;;  %s5716_s2 = sphi %s5964_s2, %s6874_s2   ;;  %s5712_s1 = sphi %s5962_s1, %s6878_s1   ;;  %s5708_s28 = sphi %s5960_s28, %s6877_s28   ;;  %s5728_s10 = sphi %s5970_s10, %s90_s10  }
  0x49   : > { %s6814_s4 = sld [smem:[#allocation48_spill]]  ;;  %s6815_s3 = sld [smem:[#allocation43_spill]] }
  0x4a   : > { %s6816_s21 = sld [smem:[#allocation42_spill]]  ;;  %6817 = sst [smem:[#allocation61_spill]] %s5708_s28 }
  0x4b   : > { %6818 = sst [smem:[#allocation62_spill]] %s5716_s2  ;;  %s5991_s11 = sadd.s32 4294967295, %s5728_s10  }
  0x4c   : > { %6819 = sst [smem:[#allocation63_spill]] %s5724_s7  ;;  %s6770_s15 = sadd.s32 4294967294, %s5728_s10  }
  0x4d   : > { %6820 = sst [smem:[#allocation64_spill]] %s5728_s10  ;;  %s102_s16 = sadd.s32 1, %s5724_s7 }
  0x4e   : > { %s763_s18 = sadd.s32 1, %s5716_s2  ;;  %p104_p0 = scmp.ge.s32.totalorder %s102_s16, 2 }
  0x4f   : > { %p773_p1 = scmp.ne.s32.totalorder %s5716_s2, %s5712_s1  ;;  %p774_p2 = scmp.eq.s32.totalorder %s5991_s11, 1 }
  0x50   : > { %p779_p3 = scmp.ne.s32.totalorder %s5712_s1, %s5708_s28  ;;  %s6880_s16 = smov (%p104_p0, %s102_s16), 0 }
  0x51   : > { %6821 = sst [smem:[#allocation65_spill]] %s6880_s16  ;;  %p6003_p4 = por %p774_p2, %p773_p1 }
  0x52   : > { %p780_p5 = scmp.eq.s32.totalorder %s6770_s15, 1  ;;  %s758_s23 = ssub.s32 %s5724_s7, %s6880_s16 }
  0x53   : > { %s6822_s22 = scalar_select %p6003_p4, 1, 0 }
  0x54   : > { %p4448_p6 = scmp.ge.s32.totalorder %s5728_s10, 1  ;;  %p761_p7 = scmp.eq.s32.totalorder %s758_s23, 0 }
  0x55   : > { %p6012_p8 = por %p780_p5, %p779_p3  ;;  %p843_p9 = scmp.lt.s32.totalorder %s5728_s10, 3 }
  0x56   : > { %s6018_s28 = scalar_select %p761_p7, %s5716_s2, %s763_s18  }
  0x57   : > { %s6823_s26 = scalar_select %p6012_p8, 1, 0 }
  0x58   : > { %6825 = sst [smem:[#allocation67_spill]] %s6018_s28  ;;  %p6020_p10 = pnand %p4448_p6, %p843_p9 }
  0x59   : > { %6824 = sst [smem:[#allocation66_spill]] %s6823_s26  ;;  %p6774_p11 = scmp.eq.s32.totalorder %s5991_s11, 0 }
  0x5a   : > { %s6826_s12 = scalar_select %p6020_p10, 1, 0 }
  0x5b   : > { %p4923_p12 = pneg %p6020_p10  ;;  %s5762_s15 = smov [#allocation5]  }
  0x5c   : > { %s868_s16 = sshll.u32 %s5762_s15, 4  ;;  %s5763_s18 = smov [#allocation8]   ;;  %s869_s16 = int_to_ptr.vmem [resolvable:$true] %s868_s16 }
  0x5d   : > { %p6029_p13 = pnand %p6774_p11, %p4923_p12  ;;  %s892_s7 = sshll.u32 %s5763_s18, 4  ;;  %s6033_s7 = int_to_ptr.vmem [resolvable:$true] %s892_s7 }
  0x5e   : > { %s5166_s28 = scalar_lea.hbm %s6816_s21, 256 }
  0x5f   : > { %p5167_p0 = scmp.ne.s32.totalorder %s6816_s21, %s5166_s28  ;;  %p6039_p1 = pneg %p6029_p13 }
  0x60   : > { %p5173_p5 = scmp.lt.u32.totalorder %s5166_s28, %s6816_s21 }
  0x61   : > { %p5169_p2 = pnand %p6039_p1, %p5167_p0 }
  0x63   : > { %p5170_p3 = pneg %p5169_p2 }
  0x65   : > { %p5175_p6 = pnand %p5173_p5, %p5170_p3 }
  0x67   : > { %5178 = shalt.err (!%p5175_p6)
}
  0x68   : > { %s5179_s15 = scalar_lea.vmem %s869_s16, 256  ;;  %p5187_p11 = scmp.lt.s32.totalorder %s869_s16, %s869_s16 }
  0x69   : > { %p5180_p7 = scmp.ne.s32.totalorder %s869_s16, %s5179_s15  ;;  %p5188_p8 = scmp.lt.s32.totalorder %s5179_s15, %s5179_s15 }
  0x6b   : > { %p5182_p9 = pnand %p5180_p7, %p6039_p1  ;;  %p5189_p4 = por %p5188_p8, %p5187_p11 }
  0x6d   : > { %p5183_p12 = pneg %p5182_p9 }
  0x6f   : > { %p5190_p10 = pnand %p5189_p4, %p5183_p12 }
  0x71   : > { %5193 = shalt.err (!%p5190_p10)
}
  0x72   : > { %s6781_s18 = smov 64   ;;  %s6783_s28 = smov 4  }
  0x73   : > { %4929 = dma.hbm_to_vmem [thread:$0]  (!%p6029_p13), %s6816_s21, 256, %s869_s16, [#allocation6], %s6781_s18, %s6781_s18, %s6783_s28  }
  0x74   : > { %s5194_s26 = scalar_lea.hbm %s5828_s29, 256 }
  0x75   : > { %p5195_p0 = scmp.ne.s32.totalorder %s5828_s29, %s5194_s26  ;;  %p5201_p4 = scmp.lt.u32.totalorder %s5194_s26, %s5828_s29 }
  0x77   : > { %p5197_p2 = pnand %p5195_p0, %p6039_p1 }
  0x79   : > { %p5198_p8 = pneg %p5197_p2 }
  0x7b   : > { %p5203_p10 = pnand %p5201_p4, %p5198_p8 }
  0x7d   : > { %5206 = shalt.err (!%p5203_p10)
}
  0x7e   : > { %s5207_s15 = scalar_lea.vmem %s6033_s7, 256  ;;  %p5215_p6 = scmp.lt.s32.totalorder %s6033_s7, %s6033_s7 }
  0x7f   : > { %p5208_p11 = scmp.ne.s32.totalorder %s6033_s7, %s5207_s15  ;;  %p5216_p7 = scmp.lt.s32.totalorder %s5207_s15, %s5207_s15 }
  0x81   : > { %p5210_p3 = pnand %p5208_p11, %p6039_p1  ;;  %p5217_p9 = por %p5216_p7, %p5215_p6 }
  0x83   : > { %p5211_p5 = pneg %p5210_p3 }
  0x85   : > { %p5218_p12 = pnand %p5217_p9, %p5211_p5 }
  0x87   : > { %5221 = shalt.err (!%p5218_p12)
}
  0x88   : > { %4935 = dma.hbm_to_vmem [thread:$0]  (!%p6029_p13), %s5828_s29, 256, %s6033_s7, [#allocation9], %s6781_s18, %s6781_s18, %s6783_s28  }
  0x89   : > { %s5766_s16 = smov [#allocation11]   ;;  %s5767_s21 = smov [#allocation14]  }
  0x8a   : > { %s916_s26 = sshll.u32 %s5766_s16, 4  ;;  %s944_s15 = sshll.u32 %s5767_s21, 4  ;;  %s917_s26 = int_to_ptr.vmem [resolvable:$true] %s916_s26  ;;  %s945_s15 = int_to_ptr.vmem [resolvable:$true] %s944_s15 }
  0x8b   : > { %s5222_s10 = scalar_lea.hbm %s6812_s8, 256 }
  0x8c   : > { %p5223_p0 = scmp.ne.s32.totalorder %s6812_s8, %s5222_s10  ;;  %p5229_p4 = scmp.lt.u32.totalorder %s5222_s10, %s6812_s8 }
  0x8e   : > { %p5225_p2 = pnand %p5223_p0, %p6039_p1 }
  0x90   : > { %p5226_p8 = pneg %p5225_p2 }
  0x92   : > { %p5231_p10 = pnand %p5229_p4, %p5226_p8 }
  0x94   : > { %5234 = shalt.err (!%p5231_p10)
}
  0x95   : > { %s5235_s5 = scalar_lea.vmem %s917_s26, 256  ;;  %p5243_p6 = scmp.lt.s32.totalorder %s917_s26, %s917_s26 }
  0x96   : > { %p5236_p11 = scmp.ne.s32.totalorder %s917_s26, %s5235_s5  ;;  %p5244_p7 = scmp.lt.s32.totalorder %s5235_s5, %s5235_s5 }
  0x98   : > { %p5238_p3 = pnand %p5236_p11, %p6039_p1  ;;  %p5245_p9 = por %p5244_p7, %p5243_p6 }
  0x9a   : > { %p5239_p5 = pneg %p5238_p3 }
  0x9c   : > { %p5246_p12 = pnand %p5245_p9, %p5239_p5 }
  0x9e   : > { %5249 = shalt.err (!%p5246_p12)
}
  0x9f   : > { %4941 = dma.hbm_to_vmem [thread:$0]  (!%p6029_p13), %s6812_s8, 256, %s917_s26, [#allocation12], %s6781_s18, %s6781_s18, %s6783_s28  }
  0xa0   : > { %s5250_s21 = scalar_lea.hbm %s5853_s24, 16 }
  0xa1   : > { %p5251_p0 = scmp.ne.s32.totalorder %s5853_s24, %s5250_s21  ;;  %p5257_p4 = scmp.lt.u32.totalorder %s5250_s21, %s5853_s24 }
  0xa3   : > { %p5253_p2 = pnand %p5251_p0, %p6039_p1 }
  0xa5   : > { %p5254_p8 = pneg %p5253_p2 }
  0xa7   : > { %p5259_p10 = pnand %p5257_p4, %p5254_p8 }
  0xa9   : > { %5262 = shalt.err (!%p5259_p10)
}
  0xaa   : > { %s5263_s5 = scalar_lea.vmem %s945_s15, 16  ;;  %s5270_s7 = scalar_lea.vmem %s945_s15, 32 }
  0xab   : > { %p5264_p11 = scmp.ne.s32.totalorder %s945_s15, %s5263_s5  ;;  %p5271_p6 = scmp.lt.s32.totalorder %s945_s15, %s945_s15 }
  0xac   : > { %p5272_p7 = scmp.lt.s32.totalorder %s5270_s7, %s5263_s5 }
  0xad   : > { %p5266_p3 = pnand %p5264_p11, %p6039_p1 }
  0xae   : > { %p5273_p9 = por %p5272_p7, %p5271_p6 }
  0xaf   : > { %p5267_p5 = pneg %p5266_p3 }
  0xb1   : > { %p5274_p12 = pnand %p5273_p9, %p5267_p5 }
  0xb3   : > { %5277 = shalt.err (!%p5274_p12)
}
  0xb4   : > { %4947 = dma.hbm_to_vmem [thread:$0]  (!%p6029_p13), %s5853_s24, 16, %s945_s15, [#allocation15]  }
  0xb5   : > { %s5768_s10 = smov [#allocation17]   ;;  %s5769_s26 = smov [#allocation20]  }
  0xb6   : > { %s966_s16 = sshll.u32 %s5768_s10, 4  ;;  %s990_s21 = sshll.u32 %s5769_s26, 4  ;;  %s967_s16 = int_to_ptr.vmem [resolvable:$true] %s966_s16  ;;  %s991_s21 = int_to_ptr.vmem [resolvable:$true] %s990_s21 }
  0xb7   : > { %s5278_s18 = scalar_lea.hbm %s6813_s6, 16 }
  0xb8   : > { %p5279_p0 = scmp.ne.s32.totalorder %s6813_s6, %s5278_s18  ;;  %p5285_p4 = scmp.lt.u32.totalorder %s5278_s18, %s6813_s6 }
  0xba   : > { %p5281_p2 = pnand %p5279_p0, %p6039_p1 }
  0xbc   : > { %p5282_p8 = pneg %p5281_p2 }
  0xbe   : > { %p5287_p10 = pnand %p5285_p4, %p5282_p8 }
  0xc0   : > { %5290 = shalt.err (!%p5287_p10)
}
  0xc1   : > { %s5291_s5 = scalar_lea.vmem %s967_s16, 16  ;;  %s5298_s15 = scalar_lea.vmem %s967_s16, 32 }
  0xc2   : > { %p5292_p11 = scmp.ne.s32.totalorder %s967_s16, %s5291_s5  ;;  %p5299_p6 = scmp.lt.s32.totalorder %s967_s16, %s967_s16 }
  0xc3   : > { %p5300_p7 = scmp.lt.s32.totalorder %s5298_s15, %s5291_s5 }
  0xc4   : > { %p5294_p3 = pnand %p5292_p11, %p6039_p1 }
  0xc5   : > { %p5301_p9 = por %p5300_p7, %p5299_p6 }
  0xc6   : > { %p5295_p5 = pneg %p5294_p3 }
  0xc8   : > { %p5302_p12 = pnand %p5301_p9, %p5295_p5 }
  0xca   : > { %5305 = shalt.err (!%p5302_p12)
}
  0xcb   : > { %4953 = dma.hbm_to_vmem [thread:$0]  (!%p6029_p13), %s6813_s6, 16, %s967_s16, [#allocation18]  }
  0xcc   : > { %s5306_s18 = scalar_lea.hbm %s5878_s27, 256 }
  0xcd   : > { %p5307_p0 = scmp.ne.s32.totalorder %s5878_s27, %s5306_s18  ;;  %p5313_p4 = scmp.lt.u32.totalorder %s5306_s18, %s5878_s27 }
  0xcf   : > { %p5309_p2 = pnand %p5307_p0, %p6039_p1 }
  0xd1   : > { %p5310_p8 = pneg %p5309_p2 }
  0xd3   : > { %p5315_p10 = pnand %p5313_p4, %p5310_p8 }
  0xd5   : > { %5318 = shalt.err (!%p5315_p10)
}
  0xd6   : > { %s5319_s7 = scalar_lea.vmem %s991_s21, 256  ;;  %p5327_p6 = scmp.lt.s32.totalorder %s991_s21, %s991_s21 }
  0xd7   : > { %p5320_p11 = scmp.ne.s32.totalorder %s991_s21, %s5319_s7  ;;  %p5328_p7 = scmp.lt.s32.totalorder %s5319_s7, %s5319_s7 }
  0xd9   : > { %p5322_p3 = pnand %p5320_p11, %p6039_p1  ;;  %p5329_p9 = por %p5328_p7, %p5327_p6 }
  0xdb   : > { %p5323_p5 = pneg %p5322_p3 }
  0xdd   : > { %p5330_p12 = pnand %p5329_p9, %p5323_p5 }
  0xdf   : > { %5333 = shalt.err (!%p5330_p12)
}
  0xe0   : > { %s6829_s10 = smov 64   ;;  %s5770_s16 = smov [#allocation2]  }
  0xe1   : > { %4959 = dma.hbm_to_vmem [thread:$0]  (!%p6029_p13), %s5878_s27, 256, %s991_s21, [#allocation21], %s6829_s10, %s6829_s10, %s6783_s28  }
  0xe2   : > { %s858_s26 = sshll.u32 %s5770_s16, 4  ;;  %s5771_s5 = smov [#allocation7]   ;;  %s859_s26 = int_to_ptr.vmem [resolvable:$true] %s858_s26 }
  0xe3   : > { %s882_s15 = sshll.u32 %s5771_s5, 4  ;;  %s5334_s18 = scalar_lea.hbm %s5813_s17, 128  ;;  %s883_s15 = int_to_ptr.vmem [resolvable:$true] %s882_s15 }
  0xe4   : > { %p5335_p0 = scmp.ne.s32.totalorder %s5813_s17, %s5334_s18  ;;  %p5341_p4 = scmp.lt.u32.totalorder %s5334_s18, %s5813_s17 }
  0xe6   : > { %p5337_p2 = pnand %p5335_p0, %p6039_p1 }
  0xe8   : > { %p5338_p8 = pneg %p5337_p2 }
  0xea   : > { %p5343_p10 = pnand %p5341_p4, %p5338_p8 }
  0xec   : > { %5346 = shalt.err (!%p5343_p10)
}
  0xed   : > { %s5347_s7 = scalar_lea.vmem %s859_s26, 128  ;;  %p5355_p6 = scmp.lt.s32.totalorder %s859_s26, %s859_s26 }
  0xee   : > { %p5348_p11 = scmp.ne.s32.totalorder %s859_s26, %s5347_s7  ;;  %p5356_p7 = scmp.lt.s32.totalorder %s5347_s7, %s5347_s7 }
  0xf0   : > { %p5350_p3 = pnand %p5348_p11, %p6039_p1  ;;  %p5357_p9 = por %p5356_p7, %p5355_p6 }
  0xf2   : > { %p5351_p5 = pneg %p5350_p3 }
  0xf4   : > { %p5358_p12 = pnand %p5357_p9, %p5351_p5 }
  0xf6   : > { %5361 = shalt.err (!%p5358_p12)
}
  0xf7   : > { %4926 = dma.hbm_to_vmem [thread:$0]  (!%p6029_p13), %s5813_s17, 128, %s859_s26, [#allocation3]  }
  0xf8   : > { %s5362_s21 = scalar_lea.hbm %s5823_s25, 16 }
  0xf9   : > { %p5363_p0 = scmp.ne.s32.totalorder %s5823_s25, %s5362_s21  ;;  %p5369_p4 = scmp.lt.u32.totalorder %s5362_s21, %s5823_s25 }
  0xfb   : > { %p5365_p2 = pnand %p5363_p0, %p6039_p1 }
  0xfd   : > { %p5366_p8 = pneg %p5365_p2 }
  0xff   : > { %p5371_p10 = pnand %p5369_p4, %p5366_p8 }
 0x101   : > { %5374 = shalt.err (!%p5371_p10)
}
 0x102   : > { %s5375_s16 = scalar_lea.vmem %s883_s15, 16  ;;  %s5382_s5 = scalar_lea.vmem %s883_s15, 32 }
 0x103   : > { %p5376_p11 = scmp.ne.s32.totalorder %s883_s15, %s5375_s16  ;;  %p5383_p6 = scmp.lt.s32.totalorder %s883_s15, %s883_s15 }
 0x104   : > { %p5384_p7 = scmp.lt.s32.totalorder %s5382_s5, %s5375_s16 }
 0x105   : > { %p5378_p3 = pnand %p5376_p11, %p6039_p1 }
 0x106   : > { %p5385_p9 = por %p5384_p7, %p5383_p6 }
 0x107   : > { %p5379_p5 = pneg %p5378_p3 }
 0x109   : > { %p5386_p12 = pnand %p5385_p9, %p5379_p5 }
 0x10b   : > { %5389 = shalt.err (!%p5386_p12)
}
 0x10c   : > { %4932 = dma.hbm_to_vmem [thread:$0]  (!%p6029_p13), %s5823_s25, 16, %s883_s15, [#allocation6]  }
 0x10d   : > { %s5772_s26 = smov [#allocation10]   ;;  %s5773_s7 = smov [#allocation13]  }
 0x10e   : > { %s906_s18 = sshll.u32 %s5772_s26, 4  ;;  %s930_s21 = sshll.u32 %s5773_s7, 4  ;;  %s907_s18 = int_to_ptr.vmem [resolvable:$true] %s906_s18  ;;  %s931_s21 = int_to_ptr.vmem [resolvable:$true] %s930_s21 }
 0x10f   : > { %s5390_s28 = scalar_lea.hbm %s6815_s3, 16 }
 0x110   : > { %p5391_p0 = scmp.ne.s32.totalorder %s6815_s3, %s5390_s28  ;;  %p5397_p4 = scmp.lt.u32.totalorder %s5390_s28, %s6815_s3 }
 0x112   : > { %p5393_p2 = pnand %p5391_p0, %p6039_p1 }
 0x114   : > { %p5394_p8 = pneg %p5393_p2 }
 0x116   : > { %p5399_p10 = pnand %p5397_p4, %p5394_p8 }
 0x118   : > { %5402 = shalt.err (!%p5399_p10)
}
 0x119   : > { %s5403_s16 = scalar_lea.vmem %s907_s18, 16  ;;  %s5410_s15 = scalar_lea.vmem %s907_s18, 32 }
 0x11a   : > { %p5404_p11 = scmp.ne.s32.totalorder %s907_s18, %s5403_s16  ;;  %p5411_p6 = scmp.lt.s32.totalorder %s907_s18, %s907_s18 }
 0x11b   : > { %p5412_p7 = scmp.lt.s32.totalorder %s5410_s15, %s5403_s16 }
 0x11c   : > { %p5406_p3 = pnand %p5404_p11, %p6039_p1 }
 0x11d   : > { %p5413_p9 = por %p5412_p7, %p5411_p6 }
 0x11e   : > { %p5407_p5 = pneg %p5406_p3 }
 0x120   : > { %p5414_p12 = pnand %p5413_p9, %p5407_p5 }
 0x122   : > { %5417 = shalt.err (!%p5414_p12)
}
 0x123   : > { %4938 = dma.hbm_to_vmem [thread:$0]  (!%p6029_p13), %s6815_s3, 16, %s907_s18, [#allocation9]  }
 0x124   : > { %s5418_s28 = scalar_lea.hbm %s5843_s14, 16 }
 0x125   : > { %p5419_p0 = scmp.ne.s32.totalorder %s5843_s14, %s5418_s28  ;;  %p5425_p4 = scmp.lt.u32.totalorder %s5418_s28, %s5843_s14 }
 0x127   : > { %p5421_p2 = pnand %p5419_p0, %p6039_p1 }
 0x129   : > { %p5422_p8 = pneg %p5421_p2 }
 0x12b   : > { %p5427_p10 = pnand %p5425_p4, %p5422_p8 }
 0x12d   : > { %5430 = shalt.err (!%p5427_p10)
}
 0x12e   : > { %s5431_s5 = scalar_lea.vmem %s931_s21, 16  ;;  %s5438_s26 = scalar_lea.vmem %s931_s21, 32 }
 0x12f   : > { %p5432_p11 = scmp.ne.s32.totalorder %s931_s21, %s5431_s5  ;;  %p5439_p6 = scmp.lt.s32.totalorder %s931_s21, %s931_s21 }
 0x130   : > { %p5440_p7 = scmp.lt.s32.totalorder %s5438_s26, %s5431_s5 }
 0x131   : > { %p5434_p3 = pnand %p5432_p11, %p6039_p1 }
 0x132   : > { %p5441_p9 = por %p5440_p7, %p5439_p6 }
 0x133   : > { %p5435_p5 = pneg %p5434_p3 }
 0x135   : > { %p5442_p12 = pnand %p5441_p9, %p5435_p5 }
 0x137   : > { %5445 = shalt.err (!%p5442_p12)
}
 0x138   : > { %4944 = dma.hbm_to_vmem [thread:$0]  (!%p6029_p13), %s5843_s14, 16, %s931_s21, [#allocation12]  }
 0x139   : > { %s5774_s18 = smov [#allocation16]   ;;  %s5775_s16 = smov [#allocation19]  }
 0x13a   : > { %s955_s7 = sshll.u32 %s5774_s18, 4  ;;  %s980_s15 = sshll.u32 %s5775_s16, 4  ;;  %s956_s7 = int_to_ptr.vmem [resolvable:$true] %s955_s7  ;;  %s981_s15 = int_to_ptr.vmem [resolvable:$true] %s980_s15 }
 0x13b   : > { %s5446_s28 = scalar_lea.hbm %s5858_s30, 16 }
 0x13c   : > { %p5447_p0 = scmp.ne.s32.totalorder %s5858_s30, %s5446_s28  ;;  %p5453_p4 = scmp.lt.u32.totalorder %s5446_s28, %s5858_s30 }
 0x13e   : > { %p5449_p2 = pnand %p5447_p0, %p6039_p1 }
 0x140   : > { %p5450_p8 = pneg %p5449_p2 }
 0x142   : > { %p5455_p10 = pnand %p5453_p4, %p5450_p8 }
 0x144   : > { %5458 = shalt.err (!%p5455_p10)
}
 0x145   : > { %s5459_s5 = scalar_lea.vmem %s956_s7, 16  ;;  %s5466_s21 = scalar_lea.vmem %s956_s7, 32 }
 0x146   : > { %p5460_p11 = scmp.ne.s32.totalorder %s956_s7, %s5459_s5  ;;  %p5467_p6 = scmp.lt.s32.totalorder %s956_s7, %s956_s7 }
 0x147   : > { %p5468_p7 = scmp.lt.s32.totalorder %s5466_s21, %s5459_s5 }
 0x148   : > { %p5462_p3 = pnand %p5460_p11, %p6039_p1 }
 0x149   : > { %p5469_p9 = por %p5468_p7, %p5467_p6 }
 0x14a   : > { %p5463_p5 = pneg %p5462_p3 }
 0x14c   : > { %p5470_p12 = pnand %p5469_p9, %p5463_p5 }
 0x14e   : > { %5473 = shalt.err (!%p5470_p12)
}
 0x14f   : > { %4950 = dma.hbm_to_vmem [thread:$0]  (!%p6029_p13), %s5858_s30, 16, %s956_s7, [#allocation15]  }
 0x150   : > { %s5474_s26 = scalar_lea.hbm %s5873_s20, 16 }
 0x151   : > { %p5475_p0 = scmp.ne.s32.totalorder %s5873_s20, %s5474_s26  ;;  %p5481_p4 = scmp.lt.u32.totalorder %s5474_s26, %s5873_s20 }
 0x153   : > { %p5477_p2 = pnand %p5475_p0, %p6039_p1 }
 0x155   : > { %p5478_p8 = pneg %p5477_p2 }
 0x157   : > { %p5483_p10 = pnand %p5481_p4, %p5478_p8 }
 0x159   : > { %5486 = shalt.err (!%p5483_p10)
}
 0x15a   : > { %s5487_s18 = scalar_lea.vmem %s981_s15, 16  ;;  %s5494_s16 = scalar_lea.vmem %s981_s15, 32 }
 0x15b   : > { %p5488_p11 = scmp.ne.s32.totalorder %s981_s15, %s5487_s18  ;;  %p5495_p6 = scmp.lt.s32.totalorder %s981_s15, %s981_s15 }
 0x15c   : > { %p5496_p7 = scmp.lt.s32.totalorder %s5494_s16, %s5487_s18 }
 0x15d   : > { %p5490_p3 = pnand %p5488_p11, %p6039_p1 }
 0x15e   : > { %p5497_p9 = por %p5496_p7, %p5495_p6 }
 0x15f   : > { %p5491_p5 = pneg %p5490_p3 }
 0x161   : > { %p5498_p12 = pnand %p5497_p9, %p5491_p5 }
 0x163   : > { %5501 = shalt.err (!%p5498_p12)
}
 0x164   : > { %4956 = dma.hbm_to_vmem [thread:$0]  (!%p6029_p13), %s5873_s20, 16, %s981_s15, [#allocation18]  }
 0x165   : > { %s5776_s7 = smov [#allocation22]   ;;  %s5777_s5 = smov [#allocation23]  }
 0x166   : > { %s1004_s28 = sshll.u32 %s5776_s7, 4  ;;  %s1020_s21 = sshll.u32 %s5777_s5, 4  ;;  %s1005_s28 = int_to_ptr.vmem [resolvable:$true] %s1004_s28  ;;  %s1021_s21 = int_to_ptr.vmem [resolvable:$true] %s1020_s21 }
 0x167   : > { %s5502_s26 = scalar_lea.hbm %s6814_s4, 16 }
 0x168   : > { %p5503_p0 = scmp.ne.s32.totalorder %s6814_s4, %s5502_s26  ;;  %p5509_p4 = scmp.lt.u32.totalorder %s5502_s26, %s6814_s4 }
 0x16a   : > { %p5505_p2 = pnand %p5503_p0, %p6039_p1 }
 0x16c   : > { %p5506_p8 = pneg %p5505_p2 }
 0x16e   : > { %p5511_p10 = pnand %p5509_p4, %p5506_p8 }
 0x170   : > { %5514 = shalt.err (!%p5511_p10)
}
 0x171   : > { %s5515_s18 = scalar_lea.vmem %s1005_s28, 16  ;;  %s5522_s15 = scalar_lea.vmem %s1005_s28, 32 }
 0x172   : > { %p5516_p11 = scmp.ne.s32.totalorder %s1005_s28, %s5515_s18  ;;  %p5523_p6 = scmp.lt.s32.totalorder %s1005_s28, %s1005_s28 }
 0x173   : > { %p5524_p7 = scmp.lt.s32.totalorder %s5522_s15, %s5515_s18 }
 0x174   : > { %p5518_p3 = pnand %p5516_p11, %p6039_p1 }
 0x175   : > { %p5525_p9 = por %p5524_p7, %p5523_p6 }
 0x176   : > { %p5519_p5 = pneg %p5518_p3 }
 0x178   : > { %p5526_p12 = pnand %p5525_p9, %p5519_p5 }
 0x17a   : > { %5529 = shalt.err (!%p5526_p12)
}
 0x17b   : > { %4962 = dma.hbm_to_vmem [thread:$0]  (!%p6029_p13), %s6814_s4, 16, %s1005_s28, [#allocation21]  }
 0x17c   : > { %s5530_s16 = scalar_lea.hbm %s5898_s19, 256 }
 0x17d   : > { %p5531_p0 = scmp.ne.s32.totalorder %s5898_s19, %s5530_s16  ;;  %p5537_p4 = scmp.lt.u32.totalorder %s5530_s16, %s5898_s19 }
 0x17f   : > { %p5533_p2 = pnand %p5531_p0, %p6039_p1 }
 0x181   : > { %p5534_p8 = pneg %p5533_p2 }
 0x183   : > { %p5539_p10 = pnand %p5537_p4, %p5534_p8 }
 0x185   : > { %5542 = shalt.err (!%p5539_p10)
}
 0x186   : > { %s5543_s7 = scalar_lea.vmem %s1021_s21, 256  ;;  %p5551_p6 = scmp.lt.s32.totalorder %s1021_s21, %s1021_s21 }
 0x187   : > { %p5544_p11 = scmp.ne.s32.totalorder %s1021_s21, %s5543_s7  ;;  %p5552_p7 = scmp.lt.s32.totalorder %s5543_s7, %s5543_s7 }
 0x189   : > { %p5546_p3 = pnand %p5544_p11, %p6039_p1  ;;  %p5553_p9 = por %p5552_p7, %p5551_p6 }
 0x18b   : > { %p5547_p5 = pneg %p5546_p3 }
 0x18d   : > { %p5554_p12 = pnand %p5553_p9, %p5547_p5 }
 0x18f   : > { %5557 = shalt.err (!%p5554_p12)
}
 0x190   : > { %s6830_s28 = smov 4   ;;  %p6831_p0 = scmp.ne.s32.totalorder %s6826_s12, 0 }
 0x191   : > { %4965 = dma.hbm_to_vmem [thread:$0]  (!%p6029_p13), %s5898_s19, 256, %s1021_s21, [#allocation24], %s6829_s10, %s6829_s10, %s6830_s28  }
 0x192   : > { %1087 = sbr.rel (%p6831_p0) target bundleno = 4582 (0x11e6), region = 140  ;;  %p6832_p2 = scmp.eq.s32.totalorder (!%p6831_p0), %s5991_s11, 0 }
 0x199   : > { %5667 = dma.done.wait (%p6832_p2), [#allocation3], 128   ;;  %p6833_p1 = pmov %p6832_p2 }
 0x19b   : > { %5669 = vsyncadd (%p6833_p1), [#allocation3], 4294967168  ;;  %p6834_p8 = pmov %p6833_p1 }
 0x19c   : > { %p6835_p4 = pmov %p6833_p1 }
 0x19d   : > { %5671 = dma.done.wait (%p6834_p8), [#allocation6], 272  }
 0x19e   : > { %5673 = vsyncadd (%p6835_p4), [#allocation6], 4294967024  ;;  %p6836_p10 = pmov %p6833_p1 }
 0x19f   : > { %p6837_p13 = pmov %p6833_p1 }
 0x1a0   : > { %5675 = dma.done.wait (%p6836_p10), [#allocation9], 272  }
 0x1a1   : > { %5677 = vsyncadd (%p6837_p13), [#allocation9], 4294967024  ;;  %p6838_p11 = pmov %p6833_p1 }
 0x1a2   : > { %p6839_p3 = pmov %p6833_p1 }
 0x1a3   : > { %5679 = dma.done.wait (%p6838_p11), [#allocation12], 272  }
 0x1a4   : > { %5681 = vsyncadd (%p6839_p3), [#allocation12], 4294967024  ;;  %p6840_p5 = pmov %p6833_p1 }
 0x1a5   : > { %p6841_p6 = pmov %p6833_p1 }
 0x1a6   : > { %5683 = dma.done.wait (%p6840_p5), [#allocation15], 32  }
 0x1a7   : > { %5685 = vsyncadd (%p6841_p6), [#allocation15], 4294967264  ;;  %p6842_p7 = pmov %p6833_p1 }
 0x1a8   : > { %p6843_p9 = pmov %p6833_p1 }
 0x1a9   : > { %5687 = dma.done.wait (%p6842_p7), [#allocation18], 32  }
 0x1aa   : > { %5689 = vsyncadd (%p6843_p9), [#allocation18], 4294967264  ;;  %p6844_p12 = pmov %p6833_p1 }
 0x1ab   : > { %p6845_p0 = pmov %p6833_p1 }
 0x1ac   : > { %5691 = dma.done.wait (%p6844_p12), [#allocation21], 272  }
 0x1ad   : > { %5693 = vsyncadd (%p6845_p0), [#allocation21], 4294967024  ;;  %p6846_p2 = pmov %p6845_p0 }
 0x1ae   : > { %p6847_p1 = pmov %p6845_p0 }
 0x1af   : > { %5695 = dma.done.wait (%p6846_p2), [#allocation24], 256  }
 0x1b0   : > { %5697 = vsyncadd (%p6847_p1), [#allocation24], 4294967040  ;;  %s6848_s12 = sld [smem:[#allocation40_spill]]  ;;  %s6849_s2 = sld [smem:[#allocation39_spill]]  ;;  %v5778_v0 = vmov 0.0   ;;  %vm5779_vm0 = vmmov 0   ;;  %v1474_v25 = vlaneseq }
 0x1b1   : > { %p1241_p8 = scmp.lt.s32.totalorder %s5720_s0, 1  ;;  %4657 = vmatprep.subr.bf16.mxu1 %v5778_v0  ;;  %4649 = vmatprep.subr.bf16.mxu0 %v5778_v0  ;;  %v5110_v1 = vld [vmem:[#allocation8] sm:$0xff]   ;;  %v5111_v2 = vld [vmem:[#allocation5] sm:$0xff]   ;;  %vm1286_vm1 = vcmask 261120   ;;  %v5113_v5 = vld [vmem:[#allocation5 + $0x8] sm:$0xff]   ;;  %s5780_s26 = smov 104  }
 0x1b2   : > { %4661 = vmatprep.mubr.msk.bf16.mxu1 %vm5779_vm0, %v5778_v0  ;;  %4653 = vmatprep.mubr.msk.bf16.mxu0 %vm5779_vm0, %v5778_v0  ;;  %v5112_v3 = vld [vmem:[#allocation8 + $0x8] sm:$0xff]   ;;  %v4489_v9 = vld [vmem:[#allocation10] ss:$0 sm:$0xff]  ;;  %v4485_v11 = vld [vmem:[#allocation7] ss:$0 sm:$0xff]  ;;  %s5781_s18 = smov 120  }
 0x1b3   : > { %s1242_s23 = scalar_select %p1241_p8, %s5720_s0, 1  ;;  %4658 = vmatpush3.bf16.msra.mxu1 %v5110_v1  ;;  %4650 = vmatpush3.bf16.msra.mxu0 %v5111_v2  ;;  %v5114_v15 = vld [vmem:[#allocation11] sm:$0xff]   ;;  %v5115_v22 = vld [vmem:[#allocation11 + $0x8] sm:$0xff]   ;;  %v5783_v23 = vmov 1983009808   ;;  %v1475_v29 = vshrl.u32 %v1474_v25, 7 }
 0x1b4   : > { %4659 = vmatprep.subr.bf16.mxu1 %v5778_v0  ;;  %4651 = vmatprep.subr.bf16.mxu0 %v5778_v0  ;;  %s5782_s15 = smov 112   ;;  %v1472_v24 = vunpack.c.l.s4 %v5783_v23  ;;  %v5784_v26 = vmov 1934713408   ;;  %vm1910_vm2 = vcmask 64512   ;;  %s6350_s16 = sand.u32 1, %s5712_s1   ;;  %vm2143_vm3 = vcmask 60416  }
 0x1b5   : > { %s6243_s10 = sshll.u32 %s1242_s23, 3  ;;  %v1504_v27 = vunpack.c.l.s4 %v5784_v26  ;;  %s4480_s7 = sshll.u32 %s6350_s16, 4  ;;  %vm2151_vm4 = vcmask 1043456   ;;  %vm3982_vm5 = vcmask 523264  }
 0x1b6   : > { %s1251_s5 = scalar_lea.vmem %s6848_s12, %s6243_s10  ;;  %s1247_s21 = scalar_lea.vmem %s6849_s2, %s6243_s10  ;;  %v1473_v28 = vunpack.c.0.s8 %v1472_v24 }
 0x1b7   : > { %v1258_v4 = vld [vmem:[%s1251_s5] sm:$0xff]  ;;  %4660 = vmatpush3.bf16.msra.mxu1 %v5112_v3  ;;  %4652 = vmatpush3.bf16.msra.mxu0 %v5113_v5  ;;  %v1505_v32 = vunpack.c.0.s8 %v1504_v27  ;;  %s6363_s28 = scalar_lea.vmem [#allocation26], %s4480_s7  ;;  %s6850_s12 = sld [smem:[#allocation45_spill]] }
 0x1b8   : > { %v6251_v6 = vld [vmem:[%s1247_s21] sm:$0xff]  ;;  %v1259_v7 = vpack.c.bf16 %v1258_v4, %v1258_v4  ;;  %4673 = vmatprep.subr.bf16.mxu1 %v5778_v0  ;;  %4665 = vmatprep.subr.bf16.mxu0 %v5778_v0  ;;  %v6274_v33 = vsub.s32 %v1473_v28, %v1475_v29  ;;  %s6851_s2 = sld [smem:[#allocation41_spill]]  ;;  %s6852_s5 = sld [smem:[#allocation47_spill]] }
 0x1b9   : > { %v1262_v8 = vpack.c.bf16 %v6251_v6, %v6251_v6  ;;  %v6276_v40 = vsub.s32 %v1505_v32, %v1475_v29  ;;  %p6864_p10 = scmp.ne.s32.totalorder %s6822_s22, 0 }
 0x1ba   : > { %4662 = vmatmul.mubr.msk.bf16.vlgmr.msra.gmra.mrb[0].mxu1 %vm1286_vm1, %v1259_v7 }
 0x1bb   : > { %4654 = vmatmul.mubr.msk.bf16.vlgmr.msra.gmra.mrb[0].mxu0 %vm1286_vm1, %v1262_v8  ;;  %4675 = vmatprep.mubr.msk.bf16.mxu1 %vm5779_vm0, %v5778_v0 }
 0x1bc   : > { %4669 = vmatprep.mubr.msk.bf16.mxu0 %vm5779_vm0, %v5778_v0  ;;  %4666 = vmatpush3.bf16.msra.mxu0 %v5114_v15 }
 0x1bd   : > { %4667 = vmatprep.subr.bf16.mxu0 %v5778_v0 }
 0x1be   : > { %s1255_s23 = scalar_lea.vmem %s6851_s2, %s6243_s10  ;;  %s6853_s10 = sld [smem:[#allocation49_spill]] }
 0x1bf   : > { %s6855_s2 = sld [smem:[#allocation50_spill]] }
 0x1c0   : > { %4668 = vmatpush3.bf16.msra.mxu0 %v5115_v22 }
 0x1c1   : > { %4679 = vmatprep.subr.bf16.mxu0 %v5778_v0 }
 0x1c3   : > { %4670 = vmatmul.mubr.msk.bf16.vlgmr.msra.gmra.mrb[4].mxu0 %vm1286_vm1, %v1259_v7 }
 0x1c4   : > { %4681 = vmatprep.mubr.msk.bf16.mxu0 %vm5779_vm0, %v5778_v0  ;;  %s6854_s21 = smov %s6853_s10 }
 0x28d   : > { %v1390_v10 = vpop.f32.mrb[0].mxu1 }
 0x28e   : > { %v1391_v12 = vadd.f32 %v4489_v9, %v1390_v10  ;;  %v4663_v13 = vpop.f32.mrb[1].mxu1  ;;  %v1324_v14 = vpop.f32.mrb[0].mxu0 }
 0x28f   : > { %v1393_v16 = vpop.f32.mrb[2].mxu1  ;;  %v4655_v17 = vpop.f32.mrb[1].mxu0  ;;  %v1325_v19 = vadd.f32 %v4485_v11, %v1324_v14 }
 0x290   : > { %1616 = vrot.lane.b32.xlu1 %v1391_v12, %s5780_s26  ;;  %1610 = vrot.lane.b32.xlu0 %v1391_v12, %s5781_s18  ;;  %v4664_v18 = vpop.f32.mrb[3].mxu1  ;;  %v1327_v20 = vpop.f32.mrb[2].mxu0 }
 0x291   : > { %v4656_v21 = vpop.f32.mrb[3].mxu0 }
 0x294   : > { %1613 = vrot.lane.b32.xlu0 %v1391_v12, %s5782_s15  ;;  %1460 = vrot.lane.b32.xlu1 %v1325_v19, %s5781_s18 }
 0x298   : > { %1463 = vrot.lane.b32.xlu0 %v1325_v19, %s5782_s15  ;;  %1466 = vrot.lane.b32.xlu1 %v1325_v19, %s5780_s26 }
 0x302   : > { %v1617_v30 = vpop.permute.xlu1 %1616  ;;  %v1611_v31 = vpop.permute.xlu0 %1610 }
 0x303   : > { %v1635_v34 = vcombine.low %v1611_v31, %v1617_v30  ;;  %v1636_v35 = vcombine.high %v1611_v31, %v1617_v30 }
 0x305   : > { %v1643_v41 = vrot.slane %v1635_v34, %v6274_v33  ;;  %v1650_v42 = vrot.slane %v1636_v35, %v6274_v33 }
 0x306   : > { %v1614_v36 = vpop.permute.xlu0 %1613  ;;  %v1461_v37 = vpop.permute.xlu1 %1460 }
 0x307   : > { %v1619_v38 = vcombine.low %v1391_v12, %v1614_v36  ;;  %v1620_v39 = vcombine.high %v1391_v12, %v1614_v36 }
 0x309   : > { %v1627_v43 = vrot.slane %v1619_v38, %v6274_v33  ;;  %v1634_v44 = vrot.slane %v1620_v39, %v6274_v33 }
 0x30a   : > { %v1464_v45 = vpop.permute.xlu0 %1463  ;;  %v1467_v46 = vpop.permute.xlu1 %1466 }
 0x30b   : > { %v1651_v47 = vcombine.low %v1627_v43, %v1643_v41  ;;  %v1652_v48 = vcombine.high %v1627_v43, %v1643_v41  ;;  %v1667_v49 = vcombine.low %v1634_v44, %v1650_v42  ;;  %v1668_v50 = vcombine.high %v1634_v44, %v1650_v42 }
 0x30c   : > { %v1469_v51 = vcombine.low %v1325_v19, %v1464_v45  ;;  %v1470_v52 = vcombine.high %v1325_v19, %v1464_v45  ;;  %v1485_v53 = vcombine.low %v1461_v37, %v1467_v46  ;;  %v1486_v54 = vcombine.high %v1461_v37, %v1467_v46 }
 0x30d   : > { %v1659_v55 = vrot.slane %v1651_v47, %v6276_v40  ;;  %v1666_v56 = vrot.slane %v1652_v48, %v6276_v40  ;;  %v1675_v57 = vrot.slane %v1667_v49, %v6276_v40  ;;  %v1682_v58 = vrot.slane %v1668_v50, %v6276_v40 }
 0x30e   : > { %v1477_v59 = vrot.slane %v1469_v51, %v6274_v33  ;;  %v1484_v60 = vrot.slane %v1470_v52, %v6274_v33  ;;  %v1493_v61 = vrot.slane %v1485_v53, %v6274_v33  ;;  %v1500_v62 = vrot.slane %v1486_v54, %v6274_v33 }
 0x30f   : > { %v1687_v63 = vcombine.low %v1659_v55, %v1666_v56  ;;  %v4499_v1 = vcombine.high %v1659_v55, %v1666_v56  ;;  %v1703_v2 = vcombine.low %v1675_v57, %v1682_v58  ;;  %v4500_v3 = vcombine.high %v1675_v57, %v1682_v58 }
 0x310   : > { %v1501_v4 = vcombine.low %v1477_v59, %v1493_v61  ;;  %v1502_v5 = vcombine.high %v1477_v59, %v1493_v61  ;;  %v1517_v7 = vcombine.low %v1484_v60, %v1500_v62  ;;  %v1518_v8 = vcombine.high %v1484_v60, %v1500_v62 }
 0x311   : > { %v1694_v9 = vrot.slane %v1687_v63, %v6274_v33  ;;  %v1702_v10 = vrot.slane %v4499_v1, %v6274_v33  ;;  %v1710_v11 = vrot.slane %v1703_v2, %v6274_v33  ;;  %v1718_v12 = vrot.slane %v4500_v3, %v6274_v33  ;;  %v1453_v63 = vpop.f32.mrb[4].mxu0 }
 0x312   : > { %v1509_v13 = vrot.slane %v1501_v4, %v6276_v40  ;;  %v1516_v14 = vrot.slane %v1502_v5, %v6276_v40  ;;  %v1525_v15 = vrot.slane %v1517_v7, %v6276_v40  ;;  %v1532_v16 = vrot.slane %v1518_v8, %v6276_v40  ;;  %v4671_v1 = vpop.f32.mrb[5].mxu0  ;;  %v1909_v4 = vld [vmem:[#allocation2] sm:$0xff] }
 0x313   : > { %v1719_v17 = vcombine.low %v1694_v9, %v1702_v10  ;;  %v1735_v18 = vcombine.low %v1710_v11, %v1718_v12  ;;  %v1720_v19 = vcombine.high %v1694_v9, %v1702_v10  ;;  %v1736_v20 = vcombine.high %v1710_v11, %v1718_v12  ;;  %v1456_v2 = vpop.f32.mrb[6].mxu0 }
 0x314   : > { %v1537_v21 = vcombine.low %v1509_v13, %v1516_v14  ;;  %v4497_v22 = vcombine.high %v1509_v13, %v1516_v14  ;;  %v1553_v23 = vcombine.low %v1525_v15, %v1532_v16  ;;  %v4498_v24 = vcombine.high %v1525_v15, %v1532_v16  ;;  %v4672_v3 = vpop.f32.mrb[7].mxu0 }
 0x315   : > { %v1727_v25 = vrot.slane %v1719_v17, %v6276_v40  ;;  %v1743_v26 = vrot.slane %v1735_v18, %v6276_v40  ;;  %v1734_v34 = vrot.slane %v1720_v19, %v6276_v40  ;;  %v1750_v35 = vrot.slane %v1736_v20, %v6276_v40 }
 0x316   : > { %v1544_v27 = vrot.slane %v1537_v21, %v6274_v33  ;;  %v1552_v28 = vrot.slane %v4497_v22, %v6274_v33  ;;  %v1560_v29 = vrot.slane %v1553_v23, %v6274_v33  ;;  %v1568_v30 = vrot.slane %v4498_v24, %v6274_v33 }
 0x317   : > { %v1751_v31 = vcombine.low %v1727_v25, %v1743_v26  ;;  %v1752_v32 = vcombine.high %v1727_v25, %v1743_v26  ;;  %v1753_v45 = vcombine.low %v1734_v34, %v1750_v35  ;;  %v1754_v46 = vcombine.high %v1734_v34, %v1750_v35 }
 0x318   : > { %v1569_v36 = vcombine.low %v1544_v27, %v1552_v28  ;;  %v1585_v37 = vcombine.low %v1560_v29, %v1568_v30  ;;  %v1570_v47 = vcombine.high %v1544_v27, %v1552_v28  ;;  %v1586_v48 = vcombine.high %v1560_v29, %v1568_v30  ;;  %v4493_v30 = vld [vmem:[#allocation13] ss:$0 sm:$0xff] }
 0x319   : > { %v1755_v38 = vpack.c.bf16 %v1751_v31, %v1751_v31  ;;  %v1756_v39 = vpack.c.bf16 %v1752_v32, %v1752_v32  ;;  %v1757_v51 = vpack.c.bf16 %v1753_v45, %v1753_v45  ;;  %v1758_v52 = vpack.c.bf16 %v1754_v46, %v1754_v46 }
 0x31a   : > { %v1577_v41 = vrot.slane %v1569_v36, %v6276_v40  ;;  %v1593_v42 = vrot.slane %v1585_v37, %v6276_v40  ;;  %v1584_v55 = vrot.slane %v1570_v47, %v6276_v40  ;;  %v1600_v56 = vrot.slane %v1586_v48, %v6276_v40 }
 0x31b   : > { %v1915_v43 = vsel %vm1910_vm2, %v1755_v38, 0  ;;  %v1961_v44 = vsel %vm1910_vm2, %v1756_v39, 0  ;;  %v2007_v57 = vsel %vm1910_vm2, %v1757_v51, 0  ;;  %v2053_v58 = vsel %vm1910_vm2, %v1758_v52, 0 }
 0x31c   : > { %4674 = vmatpush3.bf16.xpose.msra.mxu1 %v1915_v43  ;;  %4680 = vmatpush3.bf16.xpose.msra.mxu0 %v1961_v44  ;;  %v1601_v49 = vcombine.low %v1577_v41, %v1593_v42  ;;  %v1602_v50 = vcombine.high %v1577_v41, %v1593_v42  ;;  %v1603_v59 = vcombine.low %v1584_v55, %v1600_v56 }
 0x31d   : > { %4685 = vmatprep.subr.bf16.mxu1 %v5778_v0  ;;  %4691 = vmatprep.subr.bf16.mxu0 %v5778_v0  ;;  %v1604_v60 = vcombine.high %v1584_v55, %v1600_v56  ;;  %v1454_v31 = vadd.f32 %v4493_v30, %v1453_v63 }
 0x31e   : > { %v1605_v53 = vpack.c.bf16 %v1601_v49, %v1601_v49  ;;  %v1606_v54 = vpack.c.bf16 %v1602_v50, %v1602_v50  ;;  %v1607_v61 = vpack.c.bf16 %v1603_v59, %v1603_v59 }
 0x31f   : > { %v1608_v62 = vpack.c.bf16 %v1604_v60, %v1604_v60 }
 0x323   : > { %4676 = vmatmul.mubr.msk.bf16.vlgmr.msra.gmra.mrb[4].mxu1 %vm1910_vm2, %v1605_v53  ;;  %4682 = vmatmul.mubr.msk.bf16.vlgmr.msra.gmra.mrb[8].mxu0 %vm1910_vm2, %v1606_v54 }
 0x324   : > { %4686 = vmatpush3.bf16.xpose.msra.mxu1 %v2007_v57  ;;  %4692 = vmatpush3.bf16.xpose.msra.mxu0 %v2053_v58 }
 0x325   : > { %4687 = vmatprep.mubr.msk.bf16.mxu1 %vm5779_vm0, %v5778_v0  ;;  %4693 = vmatprep.mubr.msk.bf16.mxu0 %vm5779_vm0, %v5778_v0 }
 0x326   : > { %4697 = vmatprep.subr.bf16.mxu1 %v5778_v0  ;;  %4703 = vmatprep.subr.bf16.mxu0 %v5778_v0 }
 0x32b   : > { %4688 = vmatmul.mubr.msk.bf16.vlgmr.msra.gmra.mrb[8].mxu1 %vm1910_vm2, %v1607_v61  ;;  %4694 = vmatmul.mubr.msk.bf16.vlgmr.msra.gmra.mrb[12].mxu0 %vm1910_vm2, %v1608_v62 }
 0x32c   : > { %4699 = vmatprep.mubr.msk.bf16.mxu1 %vm5779_vm0, %v5778_v0  ;;  %4705 = vmatprep.mubr.msk.bf16.mxu0 %vm5779_vm0, %v5778_v0 }
 0x3f6   : > { %v1951_v5 = vpop.f32.mrb[4].mxu1  ;;  %v1997_v7 = vpop.f32.mrb[8].mxu0 }
 0x3f7   : > { %v1952_v8 = vadd.f32 %v1951_v5, %v1909_v4  ;;  %v1998_v9 = vadd.f32 %v1997_v7, %v1909_v4  ;;  %v4677_v10 = vpop.f32.mrb[5].mxu1  ;;  %v4683_v11 = vpop.f32.mrb[9].mxu0 }
 0x3f8   : > { %v1954_v12 = vpop.f32.mrb[6].mxu1  ;;  %v2000_v13 = vpop.f32.mrb[10].mxu0 }
 0x3f9   : > { %v4678_v14 = vpop.f32.mrb[7].mxu1  ;;  %v4684_v15 = vpop.f32.mrb[11].mxu0  ;;  %v2095_v16 = vsel %vm1910_vm2, %v1952_v8, -inf  ;;  %v2098_v17 = vsel %vm1910_vm2, %v1998_v9, -inf }
 0x3fa   : > { %2096 = vmax.xlane.f32.xlu0 %v2095_v16  ;;  %2099 = vmax.xlane.f32.xlu1 %v2098_v17 }
 0x3fe   : > { %v2043_v18 = vpop.f32.mrb[8].mxu1  ;;  %v2089_v19 = vpop.f32.mrb[12].mxu0 }
 0x3ff   : > { %v2044_v20 = vadd.f32 %v2043_v18, %v1909_v4  ;;  %v4689_v21 = vpop.f32.mrb[9].mxu1  ;;  %v4695_v22 = vpop.f32.mrb[13].mxu0  ;;  %v2090_v25 = vadd.f32 %v2089_v19, %v1909_v4 }
 0x400   : > { %v2046_v23 = vpop.f32.mrb[10].mxu1  ;;  %v2092_v24 = vpop.f32.mrb[14].mxu0 }
 0x401   : > { %v4690_v26 = vpop.f32.mrb[11].mxu1  ;;  %v4696_v27 = vpop.f32.mrb[15].mxu0  ;;  %v2101_v28 = vsel %vm1910_vm2, %v2044_v20, -inf  ;;  %v2104_v29 = vsel %vm1910_vm2, %v2090_v25, -inf }
 0x402   : > { %2102 = vmax.xlane.f32.xlu0 %v2101_v28 }
 0x406   : > { %2105 = vmax.xlane.f32.xlu0 %v2104_v29 }
 0x40b   : > { %1760 = vrot.lane.b32.xlu1 %v1454_v31, %s5781_s18 }
 0x487   : > { %v2097_v32 = vpop.xlane.xlu0 %2096  ;;  %v2100_v34 = vpop.xlane.xlu1 %2099 }
 0x488   : > { %v2107_v35 = vsub.f32 %v1952_v8, %v2097_v32  ;;  %v2108_v36 = vsub.f32 %v1998_v9, %v2100_v34 }
 0x48a   : > { %v2111_v37 = vmul.f32 1.442695, %v2107_v35  ;;  %v2113_v38 = vmul.f32 1.442695, %v2108_v36 }
 0x48b   : > { %v1761_v54 = vpop.permute.xlu1 %1760 }
 0x48c   : > { %5128 = vpow2.f32 %v2111_v37 }
 0x48d   : > { %5130 = vpow2.f32 %v2113_v38 }
 0x48f   : > { %v2103_v44 = vpop.xlane.xlu0 %2102 }
 0x490   : > { %v2109_v46 = vsub.f32 %v2044_v20, %v2103_v44 }
 0x492   : > { %v2115_v48 = vmul.f32 1.442695, %v2109_v46 }
 0x493   : > { %v2106_v45 = vpop.xlane.xlu0 %2105 }
 0x494   : > { %v2110_v47 = vsub.f32 %v2090_v25, %v2106_v45  ;;  %5132 = vpow2.f32 %v2115_v48 }
 0x496   : > { %v5129_v39 = vpop.eup %5128  ;;  %v2117_v49 = vmul.f32 1.442695, %v2110_v47 }
 0x497   : > { %v5131_v41 = vpop.eup %5130  ;;  %v2119_v42 = vsel %vm1910_vm2, %v5129_v39, 0.0 }
 0x498   : > { %2120 = vadd.xlane.f32.xlu1 %v2119_v42  ;;  %v2122_v43 = vsel %vm1910_vm2, %v5131_v41, 0.0  ;;  %5134 = vpow2.f32 %v2117_v49 }
 0x499   : > { %2123 = vadd.xlane.f32.xlu0 %v2122_v43 }
 0x49e   : > { %v6339_v50 = vpop.eup %5132 }
 0x49f   : > { %v2125_v52 = vsel %vm1910_vm2, %v6339_v50, 0.0 }
 0x4a2   : > { %v6341_v51 = vpop.eup %5134 }
 0x4a3   : > { %v2128_v53 = vsel %vm1910_vm2, %v6341_v51, 0.0 }
 0x4a9   : > { %1766 = vrot.lane.b32.xlu1 %v1454_v31, %s5780_s26 }
 0x4af   : > { %1763 = vrot.lane.b32.xlu0 %v1454_v31, %s5782_s15 }
 0x4cd   : > { %2126 = vadd.xlane.f32.xlu1 %v2125_v52 }
 0x4ce   : > { %2129 = vadd.xlane.f32.xlu0 %v2128_v53 }
 0x525   : > { %v2121_v55 = vpop.xlane.xlu1 %2120 }
 0x526   : > { %5136 = vrcp.f32 %v2121_v55  ;;  %v2124_v56 = vpop.xlane.xlu0 %2123 }
 0x527   : > { %5138 = vrcp.f32 %v2124_v56 }
 0x529   : > { %v1767_v57 = vpop.permute.xlu1 %1766 }
 0x52a   : > { %v1785_v58 = vcombine.low %v1761_v54, %v1767_v57  ;;  %v1786_v59 = vcombine.high %v1761_v54, %v1767_v57  ;;  %v1764_v60 = vpop.permute.xlu0 %1763 }
 0x52b   : > { %v1769_v61 = vcombine.low %v1454_v31, %v1764_v60  ;;  %v1770_v62 = vcombine.high %v1454_v31, %v1764_v60 }
 0x52c   : > { %v1793_v63 = vrot.slane %v1785_v58, %v6274_v33  ;;  %v1800_v1 = vrot.slane %v1786_v59, %v6274_v33 }
 0x52d   : > { %v1777_v2 = vrot.slane %v1769_v61, %v6274_v33  ;;  %v1784_v3 = vrot.slane %v1770_v62, %v6274_v33  ;;  %v2339_v61 = vld [vmem:[%s6850_s12 + $0x8] sm:$0xf]  ;;  %v2340_v62 = vld [vmem:[%s6850_s12 + $0xc] sm:$0xf] }
 0x52f   : > { %v1801_v4 = vcombine.low %v1777_v2, %v1793_v63  ;;  %v1802_v5 = vcombine.high %v1777_v2, %v1793_v63  ;;  %v1817_v7 = vcombine.low %v1784_v3, %v1800_v1  ;;  %v1818_v8 = vcombine.high %v1784_v3, %v1800_v1 }
 0x530   : > { %v5137_v9 = vpop.eup %5136 }
 0x531   : > { %v5139_v10 = vpop.eup %5138  ;;  %v2135_v11 = vmul.f32 %v5137_v9, %v5129_v39  ;;  %v1809_v12 = vrot.slane %v1801_v4, %v6276_v40  ;;  %v1816_v13 = vrot.slane %v1802_v5, %v6276_v40  ;;  %v1825_v14 = vrot.slane %v1817_v7, %v6276_v40 }
 0x532   : > { %v2136_v15 = vmul.f32 %v5139_v10, %v5131_v41  ;;  %v1832_v16 = vrot.slane %v1818_v8, %v6276_v40  ;;  %v2437_v7 = vsel %vm2151_vm4, %v2339_v61, 0  ;;  %v2483_v8 = vsel %vm2151_vm4, %v2340_v62, 0  ;;  %v5119_v61 = vld [vmem:[%s6852_s5 + $0x8] sm:$0xff]   ;;  %v4522_v62 = vld [vmem:[#allocation22] ss:$0 sm:$0xff] }
 0x533   : > { %v1837_v17 = vcombine.low %v1809_v12, %v1816_v13  ;;  %v4501_v18 = vcombine.high %v1809_v12, %v1816_v13  ;;  %v2139_v19 = vpack.c.bf16 %v2135_v11, %v2135_v11 }
 0x534   : > { %v1853_v20 = vcombine.low %v1825_v14, %v1832_v16  ;;  %v4502_v21 = vcombine.high %v1825_v14, %v1832_v16  ;;  %v2140_v22 = vpack.c.bf16 %v2136_v15, %v2136_v15 }
 0x535   : > { %v1844_v23 = vrot.slane %v1837_v17, %v6274_v33  ;;  %v1852_v24 = vrot.slane %v4501_v18, %v6274_v33  ;;  %2144 = vst.msk [vmem:[%s6363_s28] sm:$0xf] %vm2143_vm3, %v2139_v19 }
 0x536   : > { %v1860_v25 = vrot.slane %v1853_v20, %v6274_v33  ;;  %v1868_v26 = vrot.slane %v4502_v21, %v6274_v33  ;;  %2145 = vst.msk [vmem:[%s6363_s28 + $0x4] sm:$0xf] %vm2143_vm3, %v2140_v22 }
 0x537   : > { %v1869_v27 = vcombine.low %v1844_v23, %v1852_v24  ;;  %v1870_v28 = vcombine.high %v1844_v23, %v1852_v24 }
 0x538   : > { %v1885_v29 = vcombine.low %v1860_v25, %v1868_v26  ;;  %v1886_v30 = vcombine.high %v1860_v25, %v1868_v26 }
 0x539   : > { %v1877_v31 = vrot.slane %v1869_v27, %v6276_v40  ;;  %v1884_v32 = vrot.slane %v1870_v28, %v6276_v40 }
 0x53a   : > { %v1893_v34 = vrot.slane %v1885_v29, %v6276_v40  ;;  %v1900_v35 = vrot.slane %v1886_v30, %v6276_v40 }
 0x53c   : > { %v1901_v36 = vcombine.low %v1877_v31, %v1893_v34  ;;  %v1902_v37 = vcombine.high %v1877_v31, %v1893_v34  ;;  %v1903_v38 = vcombine.low %v1884_v32, %v1900_v35  ;;  %v1904_v39 = vcombine.high %v1884_v32, %v1900_v35 }
 0x53e   : > { %v1905_v41 = vpack.c.bf16 %v1901_v36, %v1901_v36  ;;  %v1906_v42 = vpack.c.bf16 %v1902_v37, %v1902_v37  ;;  %v1907_v45 = vpack.c.bf16 %v1903_v38, %v1903_v38  ;;  %v1908_v46 = vpack.c.bf16 %v1904_v39, %v1904_v39 }
 0x540   : > { %v2153_v43 = vsel %vm2151_vm4, %v1905_v41, 0  ;;  %v2199_v44 = vsel %vm2151_vm4, %v1906_v42, 0  ;;  %v2245_v47 = vsel %vm2151_vm4, %v1907_v45, 0  ;;  %v2291_v48 = vsel %vm2151_vm4, %v1908_v46, 0 }
 0x541   : > { %4698 = vmatpush3.bf16.msra.mxu1 %v2153_v43  ;;  %4704 = vmatpush3.bf16.msra.mxu0 %v2199_v44  ;;  %v4515_v44 = vld [vmem:[#allocation14] ss:$0 sm:$0xff] }
 0x542   : > { %4709 = vmatprep.subr.bf16.mxu1 %v5778_v0  ;;  %4715 = vmatprep.subr.bf16.mxu0 %v5778_v0 }
 0x544   : > { %4700 = vmatmul.mubr.msk.bf16.vlgmr.msra.gmra.mrb[12].mxu1 %vm1910_vm2, %v2139_v19  ;;  %4706 = vmatmul.mubr.msk.bf16.vlgmr.msra.gmra.mrb[16].mxu0 %vm1910_vm2, %v2140_v22 }
 0x545   : > { %4710 = vmatpush3.bf16.msra.mxu1 %v2245_v47  ;;  %4716 = vmatpush3.bf16.msra.mxu0 %v2291_v48 }
 0x546   : > { %4711 = vmatprep.mubr.msk.bf16.mxu1 %vm5779_vm0, %v5778_v0  ;;  %4717 = vmatprep.mubr.msk.bf16.mxu0 %vm5779_vm0, %v5778_v0 }
 0x547   : > { %4721 = vmatprep.subr.bf16.mxu1 %v5778_v0  ;;  %4727 = vmatprep.subr.bf16.mxu0 %v5778_v0 }
 0x55a   : > { %v2127_v49 = vpop.xlane.xlu1 %2126 }
 0x55b   : > { %5140 = vrcp.f32 %v2127_v49  ;;  %v2130_v52 = vpop.xlane.xlu0 %2129 }
 0x55c   : > { %5142 = vrcp.f32 %v2130_v52 }
 0x565   : > { %v5141_v53 = vpop.eup %5140 }
 0x566   : > { %v5143_v54 = vpop.eup %5142  ;;  %v2137_v55 = vmul.f32 %v5141_v53, %v6339_v50  ;;  %v2337_v50 = vld [vmem:[%s6850_s12] sm:$0xf] }
 0x567   : > { %v2138_v56 = vmul.f32 %v5143_v54, %v6341_v51  ;;  %v2338_v51 = vld [vmem:[%s6850_s12 + $0x4] sm:$0xf]  ;;  %v2345_v59 = vsel %vm2151_vm4, %v2337_v50, 0 }
 0x568   : > { %v2141_v57 = vpack.c.bf16 %v2137_v55, %v2137_v55  ;;  %v2391_v60 = vsel %vm2151_vm4, %v2338_v51, 0  ;;  %v5116_v54 = vld [vmem:[#allocation20] sm:$0xff]   ;;  %v5117_v55 = vld [vmem:[#allocation20 + $0x8] sm:$0xff]  }
 0x569   : > { %v2142_v58 = vpack.c.bf16 %v2138_v56, %v2138_v56  ;;  %v1260_v56 = vld [vmem:[%s1255_s23] sm:$0xff] }
 0x56a   : > { %2146 = vst.msk [vmem:[%s6363_s28 + $0x8] sm:$0xf] %vm2143_vm3, %v2141_v57  ;;  %4712 = vmatmul.mubr.msk.bf16.vlgmr.msra.gmra.mrb[16].mxu1 %vm1910_vm2, %v2141_v57  ;;  %v6434_v57 = vpack.c.bf16 %v1260_v56, %v1260_v56 }
 0x56b   : > { %2147 = vst.msk [vmem:[%s6363_s28 + $0xc] sm:$0xf] %vm2143_vm3, %v2142_v58  ;;  %4718 = vmatmul.mubr.msk.bf16.vlgmr.msra.gmra.mrb[20].mxu0 %vm1910_vm2, %v2142_v58  ;;  %4723 = vmatprep.mubr.msk.bf16.mxu1 %vm5779_vm0, %v5778_v0 }
 0x56c   : > { %4729 = vmatprep.mubr.msk.bf16.mxu0 %vm5779_vm0, %v5778_v0  ;;  %4722 = vmatpush3.bf16.msra.mxu1 %v2345_v59 }
 0x56d   : > { %4728 = vmatpush3.bf16.msra.mxu0 %v2391_v60  ;;  %4733 = vmatprep.subr.bf16.mxu1 %v5778_v0  ;;  %v5118_v60 = vld [vmem:[%s6852_s5] sm:$0xff]   ;;  %s5785_s5 = smov [#allocation26]  }
 0x56e   : > { %4739 = vmatprep.subr.bf16.mxu0 %v5778_v0  ;;  %s5562_s6 = sshll.u32 %s5785_s5, 4  ;;  %s5563_s6 = int_to_ptr.vmem [resolvable:$false] %s5562_s6 }
 0x617   : > { %v2189_v63 = vpop.f32.mrb[12].mxu1  ;;  %v2235_v1 = vpop.f32.mrb[16].mxu0 }
 0x618   : > { %v2333_v2 = vpack.c.bf16 %v2189_v63, %v2189_v63  ;;  %v2334_v3 = vpack.c.bf16 %v2235_v1, %v2235_v1  ;;  %v4701_v4 = vpop.f32.mrb[13].mxu1  ;;  %v4707_v5 = vpop.f32.mrb[17].mxu0 }
 0x619   : > { %v2192_v9 = vpop.f32.mrb[14].mxu1  ;;  %v2238_v10 = vpop.f32.mrb[18].mxu0 }
 0x61a   : > { %v4702_v11 = vpop.f32.mrb[15].mxu1  ;;  %v4708_v12 = vpop.f32.mrb[19].mxu0  ;;  %4724 = vmatmul.mubr.msk.bf16.vlgmr.msra.gmra.mrb[20].mxu1 %vm1910_vm2, %v2333_v2  ;;  %4730 = vmatmul.mubr.msk.bf16.vlgmr.msra.gmra.mrb[24].mxu0 %vm1910_vm2, %v2334_v3  ;;  %v4516_v10 = vld [vmem:[#allocation16] ss:$0 sm:$0xff] }
 0x61b   : > { %4734 = vmatpush3.bf16.msra.mxu1 %v2437_v7  ;;  %4740 = vmatpush3.bf16.msra.mxu0 %v2483_v8  ;;  %v4517_v12 = vld [vmem:[#allocation17] ss:$0 sm:$0xff] }
 0x61c   : > { %4735 = vmatprep.mubr.msk.bf16.mxu1 %vm5779_vm0, %v5778_v0  ;;  %4741 = vmatprep.mubr.msk.bf16.mxu0 %vm5779_vm0, %v5778_v0 }
 0x61d   : > { %4753 = vmatprep.subr.bf16.mxu0 %v5778_v0  ;;  %4745 = vmatprep.subr.bf16.mxu1 %v5778_v0 }
 0x63d   : > { %v2281_v13 = vpop.f32.mrb[16].mxu1 }
 0x63e   : > { %v2335_v14 = vpack.c.bf16 %v2281_v13, %v2281_v13  ;;  %v2327_v15 = vpop.f32.mrb[20].mxu0  ;;  %v4713_v16 = vpop.f32.mrb[17].mxu1 }
 0x63f   : > { %v2336_v17 = vpack.c.bf16 %v2327_v15, %v2327_v15  ;;  %v4719_v18 = vpop.f32.mrb[21].mxu0  ;;  %v2284_v19 = vpop.f32.mrb[18].mxu1 }
 0x640   : > { %v2330_v20 = vpop.f32.mrb[22].mxu0  ;;  %v4714_v21 = vpop.f32.mrb[19].mxu1  ;;  %4736 = vmatmul.mubr.msk.bf16.vlgmr.msra.gmra.mrb[24].mxu1 %vm1910_vm2, %v2335_v14 }
 0x641   : > { %v4720_v22 = vpop.f32.mrb[23].mxu0  ;;  %4742 = vmatmul.mubr.msk.bf16.vlgmr.msra.gmra.mrb[28].mxu0 %vm1910_vm2, %v2336_v17  ;;  %4749 = vmatprep.mubr.msk.bf16.mxu1 %vm5779_vm0, %v5778_v0 }
 0x642   : > { %4757 = vmatprep.mubr.msk.bf16.mxu0 %vm5779_vm0, %v5778_v0  ;;  %4754 = vmatpush3.bf16.msra.mxu0 %v5116_v54 }
 0x643   : > { %4755 = vmatprep.subr.bf16.mxu0 %v5778_v0  ;;  %4746 = vmatpush3.bf16.msra.mxu1 %v5118_v60 }
 0x644   : > { %4747 = vmatprep.subr.bf16.mxu1 %v5778_v0 }
 0x646   : > { %4756 = vmatpush3.bf16.msra.mxu0 %v5117_v55 }
 0x647   : > { %4769 = vmatprep.subr.bf16.mxu0 %v5778_v0  ;;  %4748 = vmatpush3.bf16.msra.mxu1 %v5119_v61 }
 0x648   : > { %4761 = vmatprep.subr.bf16.mxu1 %v5778_v0 }
 0x649   : > { %4758 = vmatmul.mubr.msk.bf16.vlgmr.msra.gmra.mrb[32].mxu0 %vm1286_vm1, %v6434_v57 }
 0x64a   : > { %4771 = vmatprep.mubr.msk.bf16.mxu0 %vm5779_vm0, %v5778_v0 }
 0x6ed   : > { %v2381_v23 = vpop.f32.mrb[20].mxu1  ;;  %v2427_v24 = vpop.f32.mrb[24].mxu0 }
 0x6ee   : > { %v2525_v25 = vsel %vm1286_vm1, %v2381_v23, 0.0  ;;  %v2526_v26 = vsel %vm1286_vm1, %v2427_v24, 0.0  ;;  %v4725_v27 = vpop.f32.mrb[21].mxu1  ;;  %v4731_v28 = vpop.f32.mrb[25].mxu0 }
 0x6ef   : > { %v2527_v29 = vadd.f32 %v2526_v26, %v2525_v25  ;;  %v2384_v30 = vpop.f32.mrb[22].mxu1  ;;  %v2430_v31 = vpop.f32.mrb[26].mxu0 }
 0x6f0   : > { %v4726_v32 = vpop.f32.mrb[23].mxu1  ;;  %v4732_v34 = vpop.f32.mrb[27].mxu0 }
 0x713   : > { %v2473_v35 = vpop.f32.mrb[24].mxu1 }
 0x714   : > { %v2528_v36 = vsel %vm1286_vm1, %v2473_v35, 0.0  ;;  %v2519_v37 = vpop.f32.mrb[28].mxu0  ;;  %v4737_v38 = vpop.f32.mrb[25].mxu1 }
 0x715   : > { %v2529_v39 = vadd.f32 %v2528_v36, %v2527_v29  ;;  %v4743_v41 = vpop.f32.mrb[29].mxu0  ;;  %v2476_v42 = vpop.f32.mrb[26].mxu1  ;;  %v2530_v43 = vsel %vm1286_vm1, %v2519_v37, 0.0 }
 0x716   : > { %v2522_v45 = vpop.f32.mrb[30].mxu0  ;;  %v4738_v46 = vpop.f32.mrb[27].mxu1 }
 0x717   : > { %v2531_v47 = vadd.f32 %v2530_v43, %v2529_v39  ;;  %v4744_v48 = vpop.f32.mrb[31].mxu0  ;;  %v5120_v45 = vld [vmem:[%s6853_s10] sm:$0xff]   ;;  %v5121_v46 = vld [vmem:[%s6854_s21 + $0x8] sm:$0xff]   ;;  %s6860_s10 = sld [smem:[#allocation52_spill]] }
 0x719   : > { %v2539_v49 = vadd.f32 %v4515_v44, %v2531_v47 }
 0x71b   : > { %v2540_v52 = vadd.f32 %v2539_v49, %v6251_v6 }
 0x71c   : > { %v2698_v63 = vpop.f32.mrb[32].mxu0 }
 0x71d   : > { %v2543_v53 = vsel %vm1286_vm1, %v2540_v52, 0.0  ;;  %v2699_v1 = vadd.f32 %v4522_v62, %v2698_v63  ;;  %v4759_v2 = vpop.f32.mrb[33].mxu0 }
 0x71e   : > { %2544 = vadd.xlane.f32.xlu0 %v2543_v53  ;;  %v2701_v3 = vpop.f32.mrb[34].mxu0 }
 0x71f   : > { %v4760_v4 = vpop.f32.mrb[35].mxu0 }
 0x734   : > { %2918 = vrot.lane.b32.xlu0 %v2699_v1, %s5781_s18 }
 0x7ab   : > { %v2545_v6 = vpop.xlane.xlu0 %2544 }
 0x7ac   : > { %v2547_v58 = vmul.f32 0.03125, %v2545_v6 }
 0x7ae   : > { %v2548_v50 = vsub.f32 %v2540_v52, %v2547_v58 }
 0x7af   : > { %v2919_v18 = vpop.permute.xlu0 %2918 }
 0x7b0   : > { %v2549_v51 = vmul.f32 %v2548_v50, %v2548_v50 }
 0x7b2   : > { %v2550_v59 = vsel %vm1286_vm1, %v2549_v51, 0.0 }
 0x7b3   : > { %2551 = vadd.xlane.f32.xlu1 %v2550_v59 }
 0x7c4   : > { %2921 = vrot.lane.b32.xlu1 %v2699_v1, %s5782_s15 }
 0x7c8   : > { %2924 = vrot.lane.b32.xlu1 %v2699_v1, %s5780_s26 }
 0x840   : > { %v2552_v5 = vpop.xlane.xlu1 %2551 }
 0x841   : > { %v2553_v7 = vmul.f32 0.03125, %v2552_v5 }
 0x843   : > { %v2554_v8 = vadd.f32 1e-06, %v2553_v7 }
 0x844   : > { %v2922_v16 = vpop.permute.xlu1 %2921 }
 0x845   : > { %5144 = vrsqrt.f32 %v2554_v8  ;;  %v2927_v19 = vcombine.low %v2699_v1, %v2922_v16  ;;  %v2928_v20 = vcombine.high %v2699_v1, %v2922_v16 }
 0x847   : > { %v2935_v23 = vrot.slane %v2927_v19, %v6274_v33  ;;  %v2942_v24 = vrot.slane %v2928_v20, %v6274_v33 }
 0x848   : > { %v2925_v17 = vpop.permute.xlu1 %2924 }
 0x849   : > { %v2943_v21 = vcombine.low %v2919_v18, %v2925_v17  ;;  %v2944_v22 = vcombine.high %v2919_v18, %v2925_v17 }
 0x84b   : > { %v2951_v25 = vrot.slane %v2943_v21, %v6274_v33  ;;  %v2958_v26 = vrot.slane %v2944_v22, %v6274_v33 }
 0x84d   : > { %v2959_v27 = vcombine.low %v2935_v23, %v2951_v25  ;;  %v2960_v28 = vcombine.high %v2935_v23, %v2951_v25  ;;  %v2975_v29 = vcombine.low %v2942_v24, %v2958_v26  ;;  %v2976_v30 = vcombine.high %v2942_v24, %v2958_v26 }
 0x84f   : > { %v5145_v9 = vpop.eup %5144  ;;  %v2967_v31 = vrot.slane %v2959_v27, %v6276_v40  ;;  %v2974_v32 = vrot.slane %v2960_v28, %v6276_v40  ;;  %v2983_v34 = vrot.slane %v2975_v29, %v6276_v40  ;;  %v2990_v35 = vrot.slane %v2976_v30, %v6276_v40 }
 0x850   : > { %v2556_v11 = vmul.f32 %v5145_v9, %v2548_v50 }
 0x851   : > { %v2995_v36 = vcombine.low %v2967_v31, %v2974_v32  ;;  %v4532_v37 = vcombine.high %v2967_v31, %v2974_v32  ;;  %v3011_v38 = vcombine.low %v2983_v34, %v2990_v35  ;;  %v4533_v39 = vcombine.high %v2983_v34, %v2990_v35 }
 0x852   : > { %v2563_v13 = vmul.f32 %v4516_v10, %v2556_v11 }
 0x853   : > { %v3002_v41 = vrot.slane %v2995_v36, %v6274_v33  ;;  %v3010_v42 = vrot.slane %v4532_v37, %v6274_v33  ;;  %v3018_v43 = vrot.slane %v3011_v38, %v6274_v33  ;;  %v3026_v44 = vrot.slane %v4533_v39, %v6274_v33 }
 0x854   : > { %v6449_v14 = vadd.f32 %v4517_v12, %v2563_v13 }
 0x855   : > { %v3027_v47 = vcombine.low %v3002_v41, %v3010_v42  ;;  %v3043_v48 = vcombine.low %v3018_v43, %v3026_v44  ;;  %v3028_v53 = vcombine.high %v3002_v41, %v3010_v42  ;;  %v3044_v54 = vcombine.high %v3018_v43, %v3026_v44 }
 0x856   : > { %v2571_v15 = vpack.c.bf16 %v6449_v14, %v6449_v14 }
 0x857   : > { %v3035_v49 = vrot.slane %v3027_v47, %v6276_v40  ;;  %v3051_v52 = vrot.slane %v3043_v48, %v6276_v40  ;;  %v3042_v6 = vrot.slane %v3028_v53, %v6276_v40  ;;  %v3058_v58 = vrot.slane %v3044_v54, %v6276_v40 }
 0x858   : > { %4750 = vmatmul.mubr.msk.bf16.vlgmr.msra.gmra.mrb[28].mxu1 %vm1286_vm1, %v2571_v15 }
 0x859   : > { %4765 = vmatprep.mubr.msk.bf16.mxu1 %vm5779_vm0, %v5778_v0  ;;  %4762 = vmatpush3.bf16.msra.mxu1 %v5120_v45  ;;  %v3059_v55 = vcombine.low %v3035_v49, %v3051_v52  ;;  %v3060_v56 = vcombine.high %v3035_v49, %v3051_v52  ;;  %v6480_v59 = vcombine.low %v3042_v6, %v3058_v58 }
 0x85a   : > { %4763 = vmatprep.subr.bf16.mxu1 %v5778_v0  ;;  %v6482_v60 = vcombine.high %v3042_v6, %v3058_v58 }
 0x85b   : > { %v3063_v50 = vpack.c.bf16 %v3059_v55, %v3059_v55  ;;  %v3064_v51 = vpack.c.bf16 %v3060_v56, %v3060_v56  ;;  %v3065_v48 = vpack.c.bf16 %v6480_v59, %v6480_v59 }
 0x85c   : > { %v3066_v49 = vpack.c.bf16 %v6482_v60, %v6482_v60 }
 0x85d   : > { %4764 = vmatpush3.bf16.msra.mxu1 %v5121_v46  ;;  %v3221_v61 = vsel %vm1910_vm2, %v3063_v50, 0  ;;  %v3267_v62 = vsel %vm1910_vm2, %v3064_v51, 0  ;;  %v3313_v56 = vsel %vm1910_vm2, %v3065_v48, 0 }
 0x85e   : > { %4775 = vmatprep.subr.bf16.mxu1 %v5778_v0  ;;  %4770 = vmatpush3.bf16.xpose.msra.mxu0 %v3221_v61  ;;  %v3359_v6 = vsel %vm1910_vm2, %v3066_v49, 0 }
 0x85f   : > { %4781 = vmatprep.subr.bf16.mxu0 %v5778_v0 }
 0x860   : > { %4766 = vmatmul.mubr.msk.bf16.vlgmr.msra.gmra.mrb[32].mxu1 %vm1286_vm1, %v6434_v57  ;;  %v4518_v57 = vld [vmem:[#allocation19] ss:$0 sm:$0xff] }
 0x861   : > { %4777 = vmatprep.mubr.msk.bf16.mxu1 %vm5779_vm0, %v5778_v0 }
 0x866   : > { %4776 = vmatpush3.bf16.xpose.msra.mxu1 %v3267_v62 }
 0x867   : > { %4787 = vmatprep.subr.bf16.mxu1 %v5778_v0 }
 0x92b   : > { %v2632_v63 = vpop.f32.mrb[28].mxu1 }
 0x92c   : > { %v2633_v1 = vadd.f32 %v4518_v57, %v2632_v63  ;;  %v4751_v2 = vpop.f32.mrb[29].mxu1 }
 0x92d   : > { %v2635_v3 = vpop.f32.mrb[30].mxu1 }
 0x92e   : > { %v4752_v4 = vpop.f32.mrb[31].mxu1  ;;  %2771 = vrot.lane.b32.xlu1 %v2633_v1, %s5782_s15  ;;  %2768 = vrot.lane.b32.xlu0 %v2633_v1, %s5781_s18 }
 0x932   : > { %2774 = vrot.lane.b32.xlu0 %v2633_v1, %s5780_s26 }
 0x933   : > { %v6491_v5 = vpop.f32.mrb[32].mxu1 }
 0x934   : > { %v4767_v7 = vpop.f32.mrb[33].mxu1 }
 0x935   : > { %v2764_v8 = vpop.f32.mrb[34].mxu1 }
 0x936   : > { %v4768_v9 = vpop.f32.mrb[35].mxu1 }
 0x9a0   : > { %v2772_v10 = vpop.permute.xlu1 %2771  ;;  %v2769_v11 = vpop.permute.xlu0 %2768 }
 0x9a1   : > { %v2777_v12 = vcombine.low %v2633_v1, %v2772_v10  ;;  %v2778_v13 = vcombine.high %v2633_v1, %v2772_v10 }
 0x9a3   : > { %v2785_v18 = vrot.slane %v2777_v12, %v6274_v33  ;;  %v2792_v19 = vrot.slane %v2778_v13, %v6274_v33 }
 0x9a4   : > { %v2775_v15 = vpop.permute.xlu0 %2774 }
 0x9a5   : > { %v2793_v16 = vcombine.low %v2769_v11, %v2775_v15  ;;  %v2794_v17 = vcombine.high %v2769_v11, %v2775_v15 }
 0x9a7   : > { %v2801_v20 = vrot.slane %v2793_v16, %v6274_v33  ;;  %v2808_v21 = vrot.slane %v2794_v17, %v6274_v33 }
 0x9a9   : > { %v2809_v22 = vcombine.low %v2785_v18, %v2801_v20  ;;  %v2810_v23 = vcombine.high %v2785_v18, %v2801_v20  ;;  %v2825_v24 = vcombine.low %v2792_v19, %v2808_v21  ;;  %v2826_v25 = vcombine.high %v2792_v19, %v2808_v21  ;;  %v4526_v19 = vld [vmem:[%s6855_s2] ss:$0 sm:$0xff]  ;;  %s6861_s2 = sld [smem:[#allocation53_spill]] }
 0x9aa   : > { %v2762_v20 = vadd.f32 %v4526_v19, %v6491_v5 }
 0x9ab   : > { %v2817_v26 = vrot.slane %v2809_v22, %v6276_v40  ;;  %v2824_v27 = vrot.slane %v2810_v23, %v6276_v40  ;;  %v2833_v28 = vrot.slane %v2825_v24, %v6276_v40  ;;  %v2840_v29 = vrot.slane %v2826_v25, %v6276_v40 }
 0x9ad   : > { %v2845_v30 = vcombine.low %v2817_v26, %v2824_v27  ;;  %v4530_v31 = vcombine.high %v2817_v26, %v2824_v27  ;;  %v2861_v32 = vcombine.low %v2833_v28, %v2840_v29  ;;  %v4531_v34 = vcombine.high %v2833_v28, %v2840_v29 }
 0x9af   : > { %v2852_v35 = vrot.slane %v2845_v30, %v6274_v33  ;;  %v2860_v36 = vrot.slane %v4530_v31, %v6274_v33  ;;  %v2868_v37 = vrot.slane %v2861_v32, %v6274_v33  ;;  %v2876_v38 = vrot.slane %v4531_v34, %v6274_v33 }
 0x9b1   : > { %v2877_v39 = vcombine.low %v2852_v35, %v2860_v36  ;;  %v2893_v41 = vcombine.low %v2868_v37, %v2876_v38  ;;  %v2878_v42 = vcombine.high %v2852_v35, %v2860_v36  ;;  %v2894_v43 = vcombine.high %v2868_v37, %v2876_v38 }
 0x9b3   : > { %v2885_v44 = vrot.slane %v2877_v39, %v6276_v40  ;;  %v2901_v45 = vrot.slane %v2893_v41, %v6276_v40  ;;  %v2892_v54 = vrot.slane %v2878_v42, %v6276_v40  ;;  %v2908_v55 = vrot.slane %v2894_v43, %v6276_v40 }
 0x9b5   : > { %v2909_v46 = vcombine.low %v2885_v44, %v2901_v45  ;;  %v2910_v47 = vcombine.high %v2885_v44, %v2901_v45  ;;  %v2911_v58 = vcombine.low %v2892_v54, %v2908_v55  ;;  %v2912_v50 = vcombine.high %v2892_v54, %v2908_v55 }
 0x9b7   : > { %v2913_v52 = vpack.c.bf16 %v2909_v46, %v2909_v46  ;;  %v2914_v53 = vpack.c.bf16 %v2910_v47, %v2910_v47  ;;  %v2915_v51 = vpack.c.bf16 %v2911_v58, %v2911_v58  ;;  %v2916_v59 = vpack.c.bf16 %v2912_v50, %v2912_v50 }
 0x9b9   : > { %4772 = vmatmul.mubr.msk.bf16.vlgmr.msra.gmra.mrb[36].mxu0 %vm1910_vm2, %v2913_v52  ;;  %4778 = vmatmul.mubr.msk.bf16.vlgmr.msra.gmra.mrb[36].mxu1 %vm1910_vm2, %v2914_v53 }
 0x9ba   : > { %4782 = vmatpush3.bf16.xpose.msra.mxu0 %v3313_v56  ;;  %4788 = vmatpush3.bf16.xpose.msra.mxu1 %v3359_v6 }
 0x9bb   : > { %4783 = vmatprep.mubr.msk.bf16.mxu0 %vm5779_vm0, %v5778_v0  ;;  %4789 = vmatprep.mubr.msk.bf16.mxu1 %vm5779_vm0, %v5778_v0 }
 0x9bc   : > { %4793 = vmatprep.subr.bf16.mxu0 %v5778_v0  ;;  %4799 = vmatprep.subr.bf16.mxu1 %v5778_v0 }
 0x9c1   : > { %4784 = vmatmul.mubr.msk.bf16.vlgmr.msra.gmra.mrb[40].mxu0 %vm1910_vm2, %v2915_v51  ;;  %4790 = vmatmul.mubr.msk.bf16.vlgmr.msra.gmra.mrb[40].mxu1 %vm1910_vm2, %v2916_v59 }
 0x9c2   : > { %4795 = vmatprep.mubr.msk.bf16.mxu0 %vm5779_vm0, %v5778_v0  ;;  %4801 = vmatprep.mubr.msk.bf16.mxu1 %vm5779_vm0, %v5778_v0 }
 0xa8c   : > { %v3257_v60 = vpop.f32.mrb[36].mxu0  ;;  %v3303_v61 = vpop.f32.mrb[36].mxu1 }
 0xa8d   : > { %v4773_v62 = vpop.f32.mrb[37].mxu0  ;;  %v4779_v57 = vpop.f32.mrb[37].mxu1  ;;  %v3404_v63 = vsel %vm1910_vm2, %v3303_v61, -inf  ;;  %v3401_v1 = vsel %vm1910_vm2, %v3257_v60, -inf }
 0xa8e   : > { %3405 = vmax.xlane.f32.xlu0 %v3404_v63  ;;  %v3306_v2 = vpop.f32.mrb[38].mxu1  ;;  %3402 = vmax.xlane.f32.xlu1 %v3401_v1  ;;  %v3260_v3 = vpop.f32.mrb[38].mxu0 }
 0xa8f   : > { %v4774_v4 = vpop.f32.mrb[39].mxu0  ;;  %v4780_v7 = vpop.f32.mrb[39].mxu1 }
 0xa94   : > { %v3349_v8 = vpop.f32.mrb[40].mxu0  ;;  %v3395_v9 = vpop.f32.mrb[40].mxu1 }
 0xa95   : > { %v4785_v10 = vpop.f32.mrb[41].mxu0  ;;  %v4791_v11 = vpop.f32.mrb[41].mxu1  ;;  %v3410_v12 = vsel %vm1910_vm2, %v3395_v9, -inf  ;;  %v3407_v13 = vsel %vm1910_vm2, %v3349_v8, -inf }
 0xa96   : > { %v3398_v15 = vpop.f32.mrb[42].mxu1  ;;  %3411 = vmax.xlane.f32.xlu1 %v3410_v12  ;;  %3408 = vmax.xlane.f32.xlu0 %v3407_v13  ;;  %v3352_v16 = vpop.f32.mrb[42].mxu0 }
 0xa97   : > { %v4786_v17 = vpop.f32.mrb[43].mxu0  ;;  %v4792_v18 = vpop.f32.mrb[43].mxu1 }
 0xaa7   : > { %3071 = vrot.lane.b32.xlu1 %v2762_v20, %s5782_s15  ;;  %s6857_s15 = sld [smem:[#allocation54_spill]] }
 0xb1b   : > { %v3406_v21 = vpop.xlane.xlu0 %3405  ;;  %v3403_v22 = vpop.xlane.xlu1 %3402 }
 0xb1c   : > { %v3414_v23 = vsub.f32 %v3303_v61, %v3406_v21  ;;  %v3413_v24 = vsub.f32 %v3257_v60, %v3403_v22 }
 0xb1e   : > { %v3419_v25 = vmul.f32 1.442695, %v3414_v23  ;;  %v3417_v26 = vmul.f32 1.442695, %v3413_v24 }
 0xb20   : > { %5146 = vpow2.f32 %v3419_v25 }
 0xb21   : > { %5148 = vpow2.f32 %v3417_v26 }
 0xb23   : > { %v3412_v5 = vpop.xlane.xlu1 %3411  ;;  %v3409_v31 = vpop.xlane.xlu0 %3408 }
 0xb24   : > { %v3416_v32 = vsub.f32 %v3395_v9, %v3412_v5  ;;  %v3415_v34 = vsub.f32 %v3349_v8, %v3409_v31 }
 0xb26   : > { %v3423_v35 = vmul.f32 1.442695, %v3416_v32  ;;  %v3421_v36 = vmul.f32 1.442695, %v3415_v34 }
 0xb27   : > { %v3072_v42 = vpop.permute.xlu1 %3071 }
 0xb28   : > { %5150 = vpow2.f32 %v3423_v35  ;;  %v3077_v45 = vcombine.low %v2762_v20, %v3072_v42  ;;  %v3078_v46 = vcombine.high %v2762_v20, %v3072_v42 }
 0xb29   : > { %5152 = vpow2.f32 %v3421_v36 }
 0xb2a   : > { %v5147_v27 = vpop.eup %5146  ;;  %v3085_v53 = vrot.slane %v3077_v45, %v6274_v33  ;;  %v3092_v54 = vrot.slane %v3078_v46, %v6274_v33  ;;  %v3641_v45 = vld [vmem:[#allocation23] sm:$0xf] }
 0xb2b   : > { %v5149_v28 = vpop.eup %5148  ;;  %v3428_v29 = vsel %vm1910_vm2, %v5147_v27, 0.0 }
 0xb2c   : > { %3429 = vadd.xlane.f32.xlu1 %v3428_v29  ;;  %v3425_v30 = vsel %vm1910_vm2, %v5149_v28, 0.0 }
 0xb2d   : > { %3426 = vadd.xlane.f32.xlu0 %v3425_v30 }
 0xb32   : > { %v6540_v37 = vpop.eup %5150 }
 0xb33   : > { %v6542_v38 = vpop.eup %5152  ;;  %v3434_v39 = vsel %vm1910_vm2, %v6540_v37, 0.0 }
 0xb34   : > { %v3431_v41 = vsel %vm1910_vm2, %v6542_v38, 0.0 }
 0xb3d   : > { %3074 = vrot.lane.b32.xlu1 %v2762_v20, %s5780_s26  ;;  %s6560_s26 = scalar_lea.vmem [#allocation28], %s4480_s7  ;;  %s6858_s7 = sld [smem:[#allocation56_spill]] }
 0xb43   : > { %3068 = vrot.lane.b32.xlu0 %v2762_v20, %s5781_s18  ;;  %s6856_s18 = sld [smem:[#allocation51_spill]]  ;;  %s6859_s23 = smov %s6858_s7 }
 0xb61   : > { %3435 = vadd.xlane.f32.xlu1 %v3434_v39 }
 0xb62   : > { %3432 = vadd.xlane.f32.xlu0 %v3431_v41 }
 0xbb9   : > { %v3430_v43 = vpop.xlane.xlu1 %3429 }
 0xbba   : > { %5154 = vrcp.f32 %v3430_v43  ;;  %v3427_v44 = vpop.xlane.xlu0 %3426 }
 0xbbb   : > { %5156 = vrcp.f32 %v3427_v44 }
 0xbbd   : > { %v3075_v47 = vpop.permute.xlu1 %3074 }
 0xbbe   : > { %v3069_v48 = vpop.permute.xlu0 %3068 }
 0xbbf   : > { %v3093_v49 = vcombine.low %v3069_v48, %v3075_v47  ;;  %v3094_v52 = vcombine.high %v3069_v48, %v3075_v47  ;;  %v3643_v47 = vld [vmem:[#allocation23 + $0x8] sm:$0xf]  ;;  %v3644_v48 = vld [vmem:[#allocation23 + $0xc] sm:$0xf] }
 0xbc1   : > { %v3101_v55 = vrot.slane %v3093_v49, %v6274_v33  ;;  %v3108_v56 = vrot.slane %v3094_v52, %v6274_v33 }
 0xbc3   : > { %v3109_v6 = vcombine.low %v3085_v53, %v3101_v55  ;;  %v3110_v58 = vcombine.high %v3085_v53, %v3101_v55  ;;  %v3125_v50 = vcombine.low %v3092_v54, %v3108_v56  ;;  %v3126_v51 = vcombine.high %v3092_v54, %v3108_v56 }
 0xbc4   : > { %v5155_v59 = vpop.eup %5154 }
 0xbc5   : > { %v5157_v60 = vpop.eup %5156  ;;  %v3442_v61 = vmul.f32 %v5155_v59, %v5147_v27  ;;  %v3117_v62 = vrot.slane %v3109_v6, %v6276_v40  ;;  %v3124_v57 = vrot.slane %v3110_v58, %v6276_v40  ;;  %v3133_v63 = vrot.slane %v3125_v50, %v6276_v40 }
 0xbc6   : > { %v3441_v1 = vmul.f32 %v5157_v60, %v5149_v28  ;;  %v3140_v2 = vrot.slane %v3126_v51, %v6276_v40  ;;  %v3741_v6 = vsel %vm2151_vm4, %v3643_v47, 0  ;;  %v3787_v58 = vsel %vm2151_vm4, %v3644_v48, 0  ;;  %v4549_v48 = vld [vmem:[%s6860_s10] ss:$0 sm:$0xff]  ;;  %s4062_s10 = sand.u32 1, %s5991_s11   ;;  %s5564_s11 = scalar_lea.vmem %s5563_s6, 512 }
 0xbc7   : > { %v3145_v3 = vcombine.low %v3117_v62, %v3124_v57  ;;  %v4534_v4 = vcombine.high %v3117_v62, %v3124_v57  ;;  %v3446_v7 = vpack.c.bf16 %v3442_v61, %v3442_v61  ;;  %s6657_s3 = scalar_lea.sflag [#allocation27], %s4062_s10 }
 0xbc8   : > { %v3161_v8 = vcombine.low %v3133_v63, %v3140_v2  ;;  %v4535_v9 = vcombine.high %v3133_v63, %v3140_v2  ;;  %v3445_v10 = vpack.c.bf16 %v3441_v1, %v3441_v1 }
 0xbc9   : > { %v3152_v11 = vrot.slane %v3145_v3, %v6274_v33  ;;  %v3160_v12 = vrot.slane %v4534_v4, %v6274_v33  ;;  %3450 = vst.msk [vmem:[%s6560_s26 + $0x4] sm:$0xf] %vm2143_vm3, %v3446_v7 }
 0xbca   : > { %v3168_v13 = vrot.slane %v3161_v8, %v6274_v33  ;;  %v3176_v15 = vrot.slane %v4535_v9, %v6274_v33  ;;  %3449 = vst.msk [vmem:[%s6560_s26] sm:$0xf] %vm2143_vm3, %v3445_v10 }
 0xbcb   : > { %v3177_v16 = vcombine.low %v3152_v11, %v3160_v12  ;;  %v3178_v17 = vcombine.high %v3152_v11, %v3160_v12 }
 0xbcc   : > { %v3193_v18 = vcombine.low %v3168_v13, %v3176_v15  ;;  %v3194_v19 = vcombine.high %v3168_v13, %v3176_v15 }
 0xbcd   : > { %v3185_v20 = vrot.slane %v3177_v16, %v6276_v40  ;;  %v3192_v21 = vrot.slane %v3178_v17, %v6276_v40 }
 0xbce   : > { %v3201_v22 = vrot.slane %v3193_v18, %v6276_v40  ;;  %v3208_v23 = vrot.slane %v3194_v19, %v6276_v40 }
 0xbd0   : > { %v3209_v24 = vcombine.low %v3185_v20, %v3201_v22  ;;  %v3210_v25 = vcombine.high %v3185_v20, %v3201_v22  ;;  %v3211_v26 = vcombine.low %v3192_v21, %v3208_v23  ;;  %v3212_v27 = vcombine.high %v3192_v21, %v3208_v23 }
 0xbd2   : > { %v3213_v28 = vpack.c.bf16 %v3209_v24, %v3209_v24  ;;  %v3214_v33 = vpack.c.bf16 %v3210_v25, %v3210_v25  ;;  %v3215_v5 = vpack.c.bf16 %v3211_v26, %v3211_v26  ;;  %v3216_v31 = vpack.c.bf16 %v3212_v27, %v3212_v27 }
 0xbd4   : > { %v3457_v29 = vsel %vm2151_vm4, %v3213_v28, 0  ;;  %v3503_v30 = vsel %vm2151_vm4, %v3214_v33, 0  ;;  %v3549_v40 = vsel %vm2151_vm4, %v3215_v5, 0  ;;  %v3595_v32 = vsel %vm2151_vm4, %v3216_v31, 0 }
 0xbd5   : > { %4794 = vmatpush3.bf16.msra.mxu0 %v3457_v29  ;;  %4800 = vmatpush3.bf16.msra.mxu1 %v3503_v30  ;;  %v4548_v30 = vld [vmem:[%s6856_s18] ss:$0 sm:$0xff]  ;;  %s6862_s18 = sld [smem:[#allocation55_spill]] }
 0xbd6   : > { %4805 = vmatprep.subr.bf16.mxu0 %v5778_v0  ;;  %4811 = vmatprep.subr.bf16.mxu1 %v5778_v0 }
 0xbd8   : > { %4796 = vmatmul.mubr.msk.bf16.vlgmr.msra.gmra.mrb[44].mxu0 %vm1910_vm2, %v3445_v10  ;;  %4802 = vmatmul.mubr.msk.bf16.vlgmr.msra.gmra.mrb[44].mxu1 %vm1910_vm2, %v3446_v7 }
 0xbd9   : > { %4806 = vmatpush3.bf16.msra.mxu0 %v3549_v40  ;;  %4812 = vmatpush3.bf16.msra.mxu1 %v3595_v32 }
 0xbda   : > { %4807 = vmatprep.mubr.msk.bf16.mxu0 %vm5779_vm0, %v5778_v0  ;;  %4813 = vmatprep.mubr.msk.bf16.mxu1 %vm5779_vm0, %v5778_v0 }
 0xbdb   : > { %4817 = vmatprep.subr.bf16.mxu0 %v5778_v0  ;;  %4823 = vmatprep.subr.bf16.mxu1 %v5778_v0 }
 0xbee   : > { %v3436_v34 = vpop.xlane.xlu1 %3435 }
 0xbef   : > { %5158 = vrcp.f32 %v3436_v34  ;;  %v3433_v35 = vpop.xlane.xlu0 %3432 }
 0xbf0   : > { %5160 = vrcp.f32 %v3433_v35 }
 0xbf9   : > { %v5159_v36 = vpop.eup %5158 }
 0xbfa   : > { %v5161_v39 = vpop.eup %5160  ;;  %v3444_v41 = vmul.f32 %v5159_v36, %v6540_v37  ;;  %v3642_v37 = vld [vmem:[#allocation23 + $0x4] sm:$0xf] }
 0xbfb   : > { %v3443_v42 = vmul.f32 %v5161_v39, %v6542_v38  ;;  %v3649_v38 = vsel %vm2151_vm4, %v3641_v45, 0  ;;  %v3695_v46 = vsel %vm2151_vm4, %v3642_v37, 0  ;;  %v5125_v45 = vld [vmem:[%s6859_s23 + $0x8] sm:$0xff]  }
 0xbfc   : > { %v3448_v43 = vpack.c.bf16 %v3444_v41, %v3444_v41 }
 0xbfd   : > { %v3447_v44 = vpack.c.bf16 %v3443_v42, %v3443_v42 }
 0xbfe   : > { %3452 = vst.msk [vmem:[%s6560_s26 + $0xc] sm:$0xf] %vm2143_vm3, %v3448_v43  ;;  %4814 = vmatmul.mubr.msk.bf16.vlgmr.msra.gmra.mrb[48].mxu1 %vm1910_vm2, %v3448_v43  ;;  %v5122_v43 = vld [vmem:[%s6857_s15] sm:$0xff]  }
 0xbff   : > { %3451 = vst.msk [vmem:[%s6560_s26 + $0x8] sm:$0xf] %vm2143_vm3, %v3447_v44  ;;  %4808 = vmatmul.mubr.msk.bf16.vlgmr.msra.gmra.mrb[48].mxu0 %vm1910_vm2, %v3447_v44  ;;  %4825 = vmatprep.mubr.msk.bf16.mxu1 %vm5779_vm0, %v5778_v0  ;;  %v5123_v44 = vld [vmem:[%s6857_s15 + $0x8] sm:$0xff]  }
 0xc00   : > { %4819 = vmatprep.mubr.msk.bf16.mxu0 %vm5779_vm0, %v5778_v0  ;;  %4818 = vmatpush3.bf16.msra.mxu0 %v3649_v38 }
 0xc01   : > { %4824 = vmatpush3.bf16.msra.mxu1 %v3695_v46  ;;  %4829 = vmatprep.subr.bf16.mxu0 %v5778_v0 }
 0xc02   : > { %4835 = vmatprep.subr.bf16.mxu1 %v5778_v0 }
 0xcab   : > { %v3493_v49 = vpop.f32.mrb[44].mxu0  ;;  %v3539_v52 = vpop.f32.mrb[44].mxu1 }
 0xcac   : > { %v3637_v53 = vpack.c.bf16 %v3493_v49, %v3493_v49  ;;  %v3638_v54 = vpack.c.bf16 %v3539_v52, %v3539_v52  ;;  %v4797_v55 = vpop.f32.mrb[45].mxu0  ;;  %v4803_v56 = vpop.f32.mrb[45].mxu1  ;;  %v4550_v52 = vld [vmem:[%s6861_s2] ss:$0 sm:$0xff]  ;;  %s4573_s2 = sshll.u32 %s5720_s0, 8 }
 0xcad   : > { %v3496_v50 = vpop.f32.mrb[46].mxu0  ;;  %v3542_v51 = vpop.f32.mrb[46].mxu1  ;;  %v5126_v56 = vld [vmem:[%s6859_s23 + $0x10] sm:$0xff]  }
 0xcae   : > { %v4798_v59 = vpop.f32.mrb[47].mxu0  ;;  %v4804_v60 = vpop.f32.mrb[47].mxu1  ;;  %4820 = vmatmul.mubr.msk.bf16.vlgmr.msra.gmra.mrb[52].mxu0 %vm1910_vm2, %v3637_v53  ;;  %4826 = vmatmul.mubr.msk.bf16.vlgmr.msra.gmra.mrb[52].mxu1 %vm1910_vm2, %v3638_v54 }
 0xcaf   : > { %4830 = vmatpush3.bf16.msra.mxu0 %v3741_v6  ;;  %4836 = vmatpush3.bf16.msra.mxu1 %v3787_v58  ;;  %v5127_v6 = vld [vmem:[%s6859_s23 + $0x18] sm:$0xff]   ;;  %v4551_v58 = vld [vmem:[%s6862_s18] ss:$0 sm:$0xff]  ;;  %s6652_s18 = scalar_lea.hbm %s5953_s13, %s4573_s2 }
 0xcb0   : > { %4831 = vmatprep.mubr.msk.bf16.mxu0 %vm5779_vm0, %v5778_v0  ;;  %4837 = vmatprep.mubr.msk.bf16.mxu1 %vm5779_vm0, %v5778_v0 }
 0xcb1   : > { %4841 = vmatprep.subr.bf16.mxu0 %v5778_v0  ;;  %4849 = vmatprep.subr.bf16.mxu1 %v5778_v0 }
 0xcd1   : > { %v3631_v61 = vpop.f32.mrb[48].mxu1 }
 0xcd2   : > { %v3585_v62 = vpop.f32.mrb[48].mxu0  ;;  %v3640_v57 = vpack.c.bf16 %v3631_v61, %v3631_v61  ;;  %v4815_v63 = vpop.f32.mrb[49].mxu1 }
 0xcd3   : > { %v3639_v1 = vpack.c.bf16 %v3585_v62, %v3585_v62  ;;  %v4809_v2 = vpop.f32.mrb[49].mxu0  ;;  %v3634_v3 = vpop.f32.mrb[50].mxu1 }
 0xcd4   : > { %v3588_v4 = vpop.f32.mrb[50].mxu0  ;;  %v4816_v7 = vpop.f32.mrb[51].mxu1  ;;  %4838 = vmatmul.mubr.msk.bf16.vlgmr.msra.gmra.mrb[56].mxu1 %vm1910_vm2, %v3640_v57 }
 0xcd5   : > { %v4810_v8 = vpop.f32.mrb[51].mxu0  ;;  %4832 = vmatmul.mubr.msk.bf16.vlgmr.msra.gmra.mrb[56].mxu0 %vm1910_vm2, %v3639_v1  ;;  %4857 = vmatprep.mubr.msk.bf16.mxu1 %vm5779_vm0, %v5778_v0 }
 0xcd6   : > { %4845 = vmatprep.mubr.msk.bf16.mxu0 %vm5779_vm0, %v5778_v0  ;;  %4842 = vmatpush3.bf16.msra.mxu0 %v5122_v43 }
 0xcd7   : > { %4843 = vmatprep.subr.bf16.mxu0 %v5778_v0 }
 0xcda   : > { %4844 = vmatpush3.bf16.msra.mxu0 %v5123_v44 }
 0xd81   : > { %v3685_v9 = vpop.f32.mrb[52].mxu0  ;;  %v3731_v10 = vpop.f32.mrb[52].mxu1 }
 0xd82   : > { %v3829_v11 = vsel %vm1286_vm1, %v3685_v9, 0.0  ;;  %v3830_v12 = vsel %vm1286_vm1, %v3731_v10, 0.0  ;;  %v4821_v13 = vpop.f32.mrb[53].mxu0  ;;  %v4827_v15 = vpop.f32.mrb[53].mxu1 }
 0xd83   : > { %v3831_v16 = vadd.f32 %v3830_v12, %v3829_v11  ;;  %v3688_v17 = vpop.f32.mrb[54].mxu0  ;;  %v3734_v18 = vpop.f32.mrb[54].mxu1 }
 0xd84   : > { %v4822_v19 = vpop.f32.mrb[55].mxu0  ;;  %v4828_v20 = vpop.f32.mrb[55].mxu1 }
 0xda7   : > { %v3823_v21 = vpop.f32.mrb[56].mxu1 }
 0xda8   : > { %v3777_v22 = vpop.f32.mrb[56].mxu0  ;;  %v4839_v23 = vpop.f32.mrb[57].mxu1  ;;  %v3834_v29 = vsel %vm1286_vm1, %v3823_v21, 0.0 }
 0xda9   : > { %v3832_v24 = vsel %vm1286_vm1, %v3777_v22, 0.0  ;;  %v4833_v25 = vpop.f32.mrb[57].mxu0  ;;  %v3826_v26 = vpop.f32.mrb[58].mxu1 }
 0xdaa   : > { %v3833_v27 = vadd.f32 %v3832_v24, %v3831_v16  ;;  %v3780_v28 = vpop.f32.mrb[58].mxu0  ;;  %v4840_v33 = vpop.f32.mrb[59].mxu1 }
 0xdab   : > { %v4834_v5 = vpop.f32.mrb[59].mxu0 }
 0xdac   : > { %v3835_v31 = vadd.f32 %v3834_v29, %v3833_v27 }
 0xdae   : > { %v3843_v40 = vadd.f32 %v4548_v30, %v3835_v31 }
 0xdb0   : > { %v3844_v32 = vadd.f32 %v3843_v40, %v6449_v14  ;;  %v5124_v14 = vld [vmem:[%s6858_s7] sm:$0xff]   ;;  %s6863_s7 = sld [smem:[#allocation57_spill]] }
 0xdb1   : > { %4850 = vmatpush3.bf16.msra.mxu1 %v5124_v14 }
 0xdb2   : > { %v3847_v34 = vsel %vm1286_vm1, %v3844_v32, 0.0  ;;  %4851 = vmatprep.subr.bf16.mxu1 %v5778_v0 }
 0xdb3   : > { %3848 = vadd.xlane.f32.xlu0 %v3847_v34 }
 0xdb5   : > { %4852 = vmatpush3.bf16.msra.mxu1 %v5125_v45 }
 0xdb6   : > { %4853 = vmatprep.subr.bf16.mxu1 %v5778_v0  ;;  %v4555_v63 = vld [vmem:[%s6863_s7] ss:$0 sm:$0xff]  ;;  %s4096_s7 = sshll.u32 %s6363_s28, 4  ;;  %s6655_s7 = int_to_ptr.vmem [resolvable:$true] %s4096_s7 }
 0xdb7   : > { %s5558_s4 = scalar_lea.vmem %s6655_s7, 256  ;;  %p5565_p3 = scmp.lt.s32.totalorder %s6655_s7, %s5563_s6 }
 0xdb8   : > { %p5559_p4 = scmp.ne.s32.totalorder %s6655_s7, %s5558_s4  ;;  %p5566_p5 = scmp.lt.s32.totalorder %s5564_s11, %s5558_s4 }
 0xdb9   : > { %4854 = vmatpush3.bf16.msra.mxu1 %v5126_v56 }
 0xdba   : > { %4855 = vmatprep.subr.bf16.mxu1 %v5778_v0  ;;  %p5560_p13 = pnand %p5559_p4, %p6864_p10  ;;  %p5567_p6 = por %p5566_p5, %p5565_p3 }
 0xdbc   : > { %p5561_p11 = pneg %p5560_p13 }
 0xdbd   : > { %4856 = vmatpush3.bf16.msra.mxu1 %v5127_v6 }
 0xdbe   : > { %p5568_p7 = pnand %p5567_p6, %p5561_p11 }
 0xe40   : > { %v3849_v35 = vpop.xlane.xlu0 %3848 }
 0xe41   : > { %v3850_v36 = vmul.f32 0.03125, %v3849_v35 }
 0xe43   : > { %v3851_v39 = vsub.f32 %v3844_v32, %v3850_v36 }
 0xe45   : > { %v3852_v41 = vmul.f32 %v3851_v39, %v3851_v39 }
 0xe47   : > { %v3853_v42 = vsel %vm1286_vm1, %v3852_v41, 0.0 }
 0xe48   : > { %3854 = vadd.xlane.f32.xlu0 %v3853_v42 }
 0xed5   : > { %v3855_v37 = vpop.xlane.xlu0 %3854 }
 0xed6   : > { %v3856_v38 = vmul.f32 0.03125, %v3855_v37 }
 0xed8   : > { %v3857_v46 = vadd.f32 1e-06, %v3856_v38 }
 0xeda   : > { %5162 = vrsqrt.f32 %v3857_v46 }
 0xee4   : > { %v5163_v47 = vpop.eup %5162 }
 0xee5   : > { %v3859_v49 = vmul.f32 %v5163_v47, %v3851_v39 }
 0xee7   : > { %v3866_v53 = vmul.f32 %v4549_v48, %v3859_v49 }
 0xee9   : > { %v3873_v54 = vadd.f32 %v4550_v52, %v3866_v53 }
 0xeeb   : > { %v3874_v55 = vpack.c.bf16 %v3873_v54, %v3873_v54 }
 0xeed   : > { %4846 = vmatmul.mubr.msk.bf16.vlgmr.msra.gmra.mrb[60].mxu0 %vm1286_vm1, %v3874_v55 }
 0xfc0   : > { %v3935_v50 = vpop.f32.mrb[60].mxu0 }
 0xfc1   : > { %v3936_v51 = vadd.f32 %v4551_v58, %v3935_v50  ;;  %v4847_v59 = vpop.f32.mrb[61].mxu0 }
 0xfc2   : > { %v3938_v60 = vpop.f32.mrb[62].mxu0 }
 0xfc3   : > { %v3941_v61 = vmax.f32 %v3936_v51, 0.0  ;;  %v4848_v62 = vpop.f32.mrb[63].mxu0 }
 0xfc5   : > { %v3942_v57 = vpack.c.bf16 %v3941_v61, %v3941_v61 }
 0xfc7   : > { %4858 = vmatmul.mubr.msk.bf16.vlgmr.msra.gmra.mrb[60].mxu1 %vm3982_vm5, %v3942_v57 }
0x109a   : > { %v4020_v1 = vpop.f32.mrb[60].mxu1 }
0x109b   : > { %v4021_v2 = vadd.f32 %v4555_v63, %v4020_v1  ;;  %v4859_v0 = vpop.f32.mrb[61].mxu1 }
0x109c   : > { %v4023_v3 = vpop.f32.mrb[62].mxu1 }
0x109d   : > { %v4860_v4 = vpop.f32.mrb[63].mxu1  ;;  %v4026_v7 = vadd.f32 %v4021_v2, %v3873_v54 }
0x109f   : > { %v4029_v8 = vsel %vm1286_vm1, %v4026_v7, 0.0 }
0x10a0   : > { %4030 = vadd.xlane.f32.xlu1 %v4029_v8 }
0x112d   : > { %v4031_v9 = vpop.xlane.xlu1 %4030 }
0x112e   : > { %v4032_v10 = vmul.f32 0.03125, %v4031_v9 }
0x1130   : > { %v6642_v11 = vsub.f32 %v4026_v7, %v4032_v10 }
0x1132   : > { %v4034_v12 = vmul.f32 %v6642_v11, %v6642_v11 }
0x1134   : > { %v4035_v13 = vsel %vm1286_vm1, %v4034_v12, 0.0 }
0x1135   : > { %4036 = vadd.xlane.f32.xlu0 %v4035_v13 }
0x1136   : > { %5571 = shalt.err (!%p5568_p7)
}
0x1137   : > { %s5572_s28 = scalar_lea.hbm %s6652_s18, 256  ;;  %s5576_s5 = scalar_lea.hbm %s5953_s13, 512 }
0x1138   : > { %p5573_p9 = scmp.ne.s32.totalorder %s6652_s18, %s5572_s28  ;;  %p5577_p2 = scmp.lt.u32.totalorder %s6652_s18, %s5953_s13 }
0x1139   : > { %p5578_p1 = scmp.lt.u32.totalorder %s5576_s5, %s5572_s28  ;;  %p5580_p4 = scmp.lt.u32.totalorder %s5572_s28, %s6652_s18 }
0x113a   : > { %p5574_p12 = pnand %p5573_p9, %p6864_p10 }
0x113b   : > { %p5579_p8 = por %p5578_p1, %p5577_p2 }
0x113c   : > { %p5575_p0 = pneg %p5574_p12 }
0x113d   : > { %p5581_p13 = por %p5580_p4, %p5579_p8 }
0x113f   : > { %p5582_p11 = pnand %p5581_p13, %p5575_p0 }
0x1141   : > { %5585 = shalt.err (!%p5582_p11)
}
0x1142   : > { %s5786_s6 = smov 64   ;;  %s5787_s4 = smov 4  }
0x1143   : > { %4918 = dma.vmem_to_hbm [thread:$0]  (%p6864_p10), %s6655_s7, 256, %s6652_s18, %s6657_s3, %s5786_s6, %s5786_s6, %s5787_s4  }
0x1144   : > { %s6683_s10 = scalar_lea.hbm %s5958_s9, %s4573_s2  ;;  %s4113_s11 = sshll.u32 %s6560_s26, 4  ;;  %s6686_s11 = int_to_ptr.vmem [resolvable:$true] %s4113_s11 }
0x1145   : > { %s5586_s28 = scalar_lea.vmem %s6686_s11, 256  ;;  %s5788_s5 = smov [#allocation28]  }
0x1146   : > { %p5587_p3 = scmp.ne.s32.totalorder %s6686_s11, %s5586_s28  ;;  %s5590_s8 = sshll.u32 %s5788_s5, 4  ;;  %s5591_s8 = int_to_ptr.vmem [resolvable:$false] %s5590_s8 }
0x1147   : > { %s5592_s12 = scalar_lea.vmem %s5591_s8, 512  ;;  %p5593_p7 = scmp.lt.s32.totalorder %s6686_s11, %s5591_s8 }
0x1148   : > { %p5588_p5 = pnand %p5587_p3, %p6864_p10  ;;  %p5594_p9 = scmp.lt.s32.totalorder %s5592_s12, %s5586_s28 }
0x114a   : > { %p5589_p6 = pneg %p5588_p5  ;;  %p5595_p12 = por %p5594_p9, %p5593_p7 }
0x114c   : > { %p5596_p0 = pnand %p5595_p12, %p5589_p6 }
0x114e   : > { %5599 = shalt.err (!%p5596_p0)
}
0x114f   : > { %s5600_s26 = scalar_lea.hbm %s6683_s10, 256  ;;  %s5604_s2 = scalar_lea.hbm %s5958_s9, 512 }
0x1150   : > { %p5601_p2 = scmp.ne.s32.totalorder %s6683_s10, %s5600_s26  ;;  %p5605_p4 = scmp.lt.u32.totalorder %s6683_s10, %s5958_s9 }
0x1151   : > { %p5606_p13 = scmp.lt.u32.totalorder %s5604_s2, %s5600_s26  ;;  %p5608_p3 = scmp.lt.u32.totalorder %s5600_s26, %s6683_s10 }
0x1152   : > { %p5602_p1 = pnand %p5601_p2, %p6864_p10 }
0x1153   : > { %p5607_p11 = por %p5606_p13, %p5605_p4 }
0x1154   : > { %p5603_p8 = pneg %p5602_p1 }
0x1155   : > { %p5609_p5 = por %p5608_p3, %p5607_p11 }
0x1157   : > { %p5610_p6 = pnand %p5609_p5, %p5603_p8 }
0x1159   : > { %5613 = shalt.err (!%p5610_p6)
}
0x115a   : > { %s6865_s8 = sld [smem:[#allocation58_spill]]  ;;  %s6866_s12 = sld [smem:[#allocation59_spill]] }
0x115b   : > { %s6867_s18 = sld [smem:[#allocation60_spill]]  ;;  %s4479_s7 = sshll.u32 %s6350_s16, 3 }
0x115c   : > { %4919 = dma.vmem_to_hbm [thread:$0]  (%p6864_p10), %s6686_s11, 256, %s6683_s10, %s6657_s3, %s5786_s6, %s5786_s6, %s5787_s4  }
0x115d   : > { %s4566_s28 = sshll.u32 %s5720_s0, 7  ;;  %s1226_s5 = scalar_lea.vmem [#allocation25], %s4479_s7 }
0x115e   : > { %s4082_s26 = sshll.u32 %s1226_s5, 4  ;;  %s4058_s3 = scalar_lea.sflag [#allocation4], %s6350_s16  ;;  %s6717_s26 = int_to_ptr.vmem [resolvable:$true] %s4082_s26 }
0x115f   : > { %s5614_s6 = scalar_lea.vmem %s6717_s26, 128  ;;  %s5789_s0 = smov [#allocation25]  }
0x1160   : > { %v4561_v19 = vld [vmem:[%s6865_s8] ss:$0 sm:$0xff]  ;;  %p5615_p7 = scmp.ne.s32.totalorder %s6717_s26, %s5614_s6  ;;  %s5618_s4 = sshll.u32 %s5789_s0, 4  ;;  %s5619_s4 = int_to_ptr.vmem [resolvable:$false] %s5618_s4 }
0x1161   : > { %v4562_v21 = vld [vmem:[%s6866_s12] ss:$0 sm:$0xff]  ;;  %s6715_s2 = scalar_lea.hbm %s6867_s18, %s4566_s28  ;;  %s5620_s10 = scalar_lea.vmem %s5619_s4, 256 }
0x1162   : > { %p5616_p9 = pnand %p5615_p7, %p6864_p10  ;;  %p5621_p0 = scmp.lt.s32.totalorder %s6717_s26, %s5619_s4 }
0x1163   : > { %p5622_p2 = scmp.lt.s32.totalorder %s5620_s10, %s5614_s6 }
0x1164   : > { %p5617_p12 = pneg %p5616_p9 }
0x1165   : > { %p5623_p1 = por %p5622_p2, %p5621_p0 }
0x1167   : > { %p5624_p8 = pnand %p5623_p1, %p5617_p12 }
0x11c2   : > { %v4037_v15 = vpop.xlane.xlu0 %4036 }
0x11c3   : > { %v4038_v16 = vmul.f32 0.03125, %v4037_v15 }
0x11c5   : > { %v4039_v17 = vadd.f32 1e-06, %v4038_v16 }
0x11c7   : > { %5164 = vrsqrt.f32 %v4039_v17 }
0x11d1   : > { %v5165_v18 = vpop.eup %5164 }
0x11d2   : > { %v4041_v20 = vmul.f32 %v5165_v18, %v6642_v11 }
0x11d4   : > { %v4048_v22 = vmul.f32 %v4561_v19, %v4041_v20 }
0x11d6   : > { %v4055_v23 = vadd.f32 %v4562_v21, %v4048_v22 }
0x11d8   : > { %4056 = vst.msk [vmem:[%s1226_s5] sm:$0xff] %vm1286_vm1, %v4055_v23 }
0x11d9   : > { %5627 = shalt.err (!%p5624_p8)
}
0x11da   : > { %s5628_s16 = scalar_lea.hbm %s6715_s2, 128  ;;  %s5632_s11 = scalar_lea.hbm %s6867_s18, 256 }
0x11db   : > { %p5629_p4 = scmp.ne.s32.totalorder %s6715_s2, %s5628_s16  ;;  %p5633_p3 = scmp.lt.u32.totalorder %s6715_s2, %s6867_s18 }
0x11dc   : > { %p5634_p5 = scmp.lt.u32.totalorder %s5632_s11, %s5628_s16  ;;  %p5636_p7 = scmp.lt.u32.totalorder %s5628_s16, %s6715_s2 }
0x11dd   : > { %p5630_p13 = pnand %p5629_p4, %p6864_p10 }
0x11de   : > { %p5635_p6 = por %p5634_p5, %p5633_p3 }
0x11df   : > { %p5631_p11 = pneg %p5630_p13 }
0x11e0   : > { %p5637_p9 = por %p5636_p7, %p5635_p6 }
0x11e2   : > { %p5638_p12 = pnand %p5637_p9, %p5631_p11 }
0x11e4   : > { %5641 = shalt.err (!%p5638_p12)
}
0x11e5   : > { %4917 = dma.vmem_to_hbm [thread:$0]  (%p6864_p10), %s6717_s26, 128, %s6715_s2, %s4058_s3  }
0x11e6 PF: > { %s6868_s8 = sld [smem:[#allocation64_spill]]  ;;  %s6869_s12 = sld [smem:[#allocation61_spill]] }
0x11e7   : > { %s6870_s7 = sld [smem:[#allocation66_spill]] }
0x11ec   : > { %p5004_p0 = scmp.ge.s32.totalorder %s6868_s8, 2  ;;  %s4128_s28 = sand.u32 1, %s6869_s12  }
0x11ed   : > { %p6871_p2 = scmp.ne.s32.totalorder %s6870_s7, 0  ;;  %s4129_s5 = scalar_lea.sflag [#allocation4], %s4128_s28 }
0x11ef   : > { %p4967_p1 = pnand %p5004_p0, %p6871_p2 }
0x11f1   : > { %5699 = dma.done.wait (!%p4967_p1), %s4129_s5, 128  }
0x11f2   : > { %5701 = vsyncadd (!%p4967_p1), %s4129_s5, 4294967168  ;;  %s6872_s6 = sadd.s32 4294967294, %s6868_s8  }
0x11f3   : > { %s4137_s0 = sand.u32 1, %s6872_s6  }
0x11f4   : > { %s4138_s4 = scalar_lea.sflag [#allocation27], %s4137_s0 }
0x11f5   : > { %5703 = dma.done.wait (!%p4967_p1), %s4138_s4, 512  }
0x11f6   : > { %5705 = vsyncadd (!%p4967_p1), %s4138_s4, 4294966784  ;;  %s90_s10 = sadd.s32 1, %s6868_s8   ;;  %s6873_s22 = sld [smem:[#allocation62_spill]] }
0x11f7   : > { %p87_p10 = scmp.ge.s32.totalorder %s90_s10, 4   ;;  %s6874_s2 = sld [smem:[#allocation67_spill]] }
0x11f8   : > { %s6875_s0 = sld [smem:[#allocation63_spill]]  ;;  %s6876_s7 = sld [smem:[#allocation65_spill]] }
0x11f9   : > { %s6877_s28 = smov %s5712_s1  ;;  %89 = sbr.rel (!%p87_p10) target bundleno = 72 (0x48), region = 303 }
0x11fc   : > { %s6878_s1 = smov %s6873_s22 }
0x1200   :  { %4152 = vsyncpa [#allocation3], 1 }
0x1201   :  { %4154 = vsyncpa [#allocation3 + $0x1], 1 }
0x1202   :  { %4155 = vsyncpa [#allocation6], 1 }
0x1203   :  { %4156 = vsyncpa [#allocation9], 1 }
0x1204   :  { %4157 = vsyncpa [#allocation12], 1 }
0x1205   :  { %4158 = vsyncpa [#allocation15], 1 }
0x1206   :  { %4159 = vsyncpa [#allocation18], 1 }
0x1207   :  { %4160 = vsyncpa [#allocation21], 1 }
0x1208   :  { %4161 = vsyncpa [#allocation24], 1 }
0x1209   :  { %4162 = vsyncpa [#allocation4], 1 }
0x120a   :  { %4164 = vsyncpa [#allocation4 + $0x1], 1 }
0x120b   :  { %4165 = vsyncpa [#allocation27], 1 }
0x120c   :  { %4167 = vsyncpa [#allocation27 + $0x1], 1 }

</bundles_post_ra>
